<compile_context>
chip_gen: v7x
topology: tpu7x:2x2x1
jax: 0.10.0
libtpu: 0.0.40
codegen_flags: <defaults>
</compile_context>

<pallas_src>
import functools

import jax
import jax.numpy as jnp
from jax.experimental import pallas as pl
from jax.experimental.pallas import tpu as pltpu


# --------------------------------------------------------------- chip detection / budgets

def _chip_kind():
    try:
        return jax.devices()[0].device_kind.lower()
    except Exception:
        return ""


_CHIP = _chip_kind()
# Physical VMEM: 128 MiB per core on v4/v5e/v6e, 64 MiB per TensorCore on v7x (default
# conservative when the generation cannot be identified).
_VMEM_PHYS = (128 << 20) if any(k in _CHIP for k in ("v4", "v5", "v6")) else (64 << 20)
_VMEM_BUDGET = int(_VMEM_PHYS * 0.6)
# bf16 exp on the EUP only on v6e / v7x; v5e and older have no bf16 EUP/VPU path.
_EXP_DTYPE = jnp.bfloat16 if any(k in _CHIP for k in ("v6", "7")) else jnp.float32

_TM_CAP, _TN_CAP, _TK_CAP = 512, 1024, 2048


# --------------------------------------------------------------------------- tiling helpers

def _tile_rows(M, cap=_TM_CAP):
    """Row (sublane) tile: full array if small, else the (8-multiple) cap."""
    if M <= cap:
        return M
    return cap                      # ragged edge handled by cdiv + masked writeback


def _tile_cols(N, cap=_TN_CAP):
    """Output-column (lane) tile: largest 128-multiple divisor of N under the cap
    (prefers 256-aligned widths like 768/1024 that fill the v6e/v7x MXU)."""
    if N <= cap:
        return N
    t = (cap // 128) * 128
    while t >= 128:
        if N % t == 0:
            return t
        t -= 128
    return cap                      # ragged; still a 128-multiple (writes masked)


def _tile_k(K, cap=_TK_CAP):
    """Reduction tile: must divide K exactly (padding would corrupt the accumulation)."""
    if K <= cap:
        return K
    t = (cap // 128) * 128
    while t >= 128:
        if K % t == 0:
            return t
        t -= 128
    return K


# --------------------------------------------------------------------- fused matmul kernel

def _make_mm_kernel(*, has_bias, has_res, fuse_ln, ln_cache, activation, eps, nk):
    """[LN ->] x @ w [+ b] [-> QuickGELU] [+ residual]; bf16 MXU operands, f32 accumulate."""

    def kernel(*refs):
        idx = 0
        x_ref = refs[idx]; idx += 1
        if fuse_ln:
            g_ref = refs[idx]; bln_ref = refs[idx + 1]; idx += 2
        w_ref = refs[idx]; idx += 1
        if has_bias:
            b_ref = refs[idx]; idx += 1
        if has_res:
            r_ref = refs[idx]; idx += 1
        o_ref = refs[idx]; idx += 1
        if nk > 1:
            acc_ref = refs[idx]; idx += 1
        if ln_cache:
            ln_ref = refs[idx]; idx += 1

        def ln_prologue():
            xv = x_ref[...].astype(jnp.float32)
            mean = jnp.mean(xv, axis=-1, keepdims=True)
            xc = xv - mean
            var = jnp.mean(xc * xc, axis=-1, keepdims=True)
            y = xc * jax.lax.rsqrt(var + eps) * g_ref[...] + bln_ref[...]
            return y.astype(jnp.bfloat16)

        def epilogue(out):                              # out: f32 (tm, tn)
            if has_bias:
                out = out + b_ref[...]                  # (1, tn) broadcast, f32
            if activation == "quick_gelu":              # x * sigmoid(1.702 x)
                out = out * jax.nn.sigmoid(1.702 * out)
            if has_res:
                out = out + r_ref[...].astype(jnp.float32)
            o_ref[...] = out.astype(o_ref.dtype)

        if fuse_ln:
            # fuse_ln forces tk == K, so nk == 1: no accumulator round trip needed.
            if ln_cache:
                # LN(x) (+ f32->bf16 cast) computed once per row tile, reused for j > 0.
                @pl.when(pl.program_id(1) == 0)
                def _():
                    ln_ref[...] = ln_prologue()
                xb = ln_ref[...]
            else:
                xb = ln_prologue()
            epilogue(jnp.dot(xb, w_ref[...], preferred_element_type=jnp.float32))
        elif nk == 1:
            # Single reduction step: write straight through, no VMEM accumulator.
            xb = x_ref[...].astype(jnp.bfloat16)
            epilogue(jnp.dot(xb, w_ref[...], preferred_element_type=jnp.float32))
        else:
            k = pl.program_id(2)

            @pl.when(k == 0)
            def _():
                acc_ref[...] = jnp.zeros_like(acc_ref)

            acc_ref[...] += jnp.dot(x_ref[...].astype(jnp.bfloat16), w_ref[...],
                                    preferred_element_type=jnp.float32)

            @pl.when(k == nk - 1)
            def _():
                epilogue(acc_ref[...])

    return kernel


def fused_matmul(x, w, b=None, *, ln_g=None, ln_b=None, residual=None,
                 activation=None, eps=1e-5, out_dtype=jnp.float32,
                 tile_m=None, tile_n=None, tile_k=None):
    """y = [LN(x)] @ w [+ b] [QuickGELU] [+ residual].  x:(M,K) f32/bf16, w:(K,N) bf16."""
    M, K = x.shape
    K2, N = w.shape
    assert K == K2
    fuse_ln = ln_g is not None
    has_bias = b is not None
    has_res = residual is not None

    tm = tile_m if tile_m is not None else _tile_rows(M)
    tn = tile_n if tile_n is not None else _tile_cols(N)
    if fuse_ln:
        tk = K                                   # LN prologue needs the full row
    else:
        tk = tile_k if tile_k is not None else _tile_k(K)
        if K % tk != 0:
            tk = K                               # never pad the reduction axis

    x_b = x.dtype.itemsize
    o_b = jnp.dtype(out_dtype).itemsize
    r_b = residual.dtype.itemsize if has_res else 0

    def usage(tm_, tn_, tk_):
        nk_ = K // tk_
        nn_ = pl.cdiv(N, tn_)
        u = 2 * (tm_ * tk_ * x_b + tk_ * tn_ * 2 + tm_ * tn_ * o_b)   # double-buffered
        if has_bias:
            u += 2 * tn_ * 4
        if has_res:
            u += 2 * tm_ * tn_ * r_b
        if fuse_ln:
            u += 2 * 2 * K * 4
            if nn_ > 1:
                u += tm_ * K * 2                  # cached LN(x), bf16
        if nk_ > 1:
            u += tm_ * tn_ * 4                    # f32 accumulator
        return u

    # Shrink tiles if the working set exceeds this generation's VMEM budget.
    while usage(tm, tn, tk) > _VMEM_BUDGET:
        if tn >= 512 and tn % 256 == 0:
            tn //= 2
        elif tm >= 128 and tm % 16 == 0:
            tm //= 2
        elif (not fuse_ln) and tk >= 1024 and tk % 256 == 0:
            tk //= 2
        else:
            break

    nm, nn, nk = pl.cdiv(M, tm), pl.cdiv(N, tn), K // tk
    ln_cache = fuse_ln and nn > 1

    in_specs = [pl.BlockSpec((tm, tk), lambda i, j, k: (i, k))]
    inputs = [x]
    if fuse_ln:
        in_specs += [pl.BlockSpec((1, K), lambda i, j, k: (0, 0)),
                     pl.BlockSpec((1, K), lambda i, j, k: (0, 0))]
        inputs += [ln_g.reshape(1, K).astype(jnp.float32),
                   ln_b.reshape(1, K).astype(jnp.float32)]
    in_specs.append(pl.BlockSpec((tk, tn), lambda i, j, k: (k, j)))
    inputs.append(w.astype(jnp.bfloat16))
    if has_bias:
        in_specs.append(pl.BlockSpec((1, tn), lambda i, j, k: (0, j)))
        inputs.append(b.reshape(1, N).astype(jnp.float32))
    if has_res:
        in_specs.append(pl.BlockSpec((tm, tn), lambda i, j, k: (i, j)))
        inputs.append(residual)

    scratch_shapes = []
    if nk > 1:
        scratch_shapes.append(pltpu.VMEM((tm, tn), jnp.float32))
    if ln_cache:
        scratch_shapes.append(pltpu.VMEM((tm, K), jnp.bfloat16))

    kernel = _make_mm_kernel(has_bias=has_bias, has_res=has_res, fuse_ln=fuse_ln,
                             ln_cache=ln_cache, activation=activation, eps=eps, nk=nk)

    bytes_accessed = (x_b * M * K + 2 * K * N + o_b * M * N
                      + (4 * N if has_bias else 0)
                      + (r_b * M * N if has_res else 0)
                      + (8 * K if fuse_ln else 0))
    cost = pl.CostEstimate(flops=2 * M * N * K,
                           transcendentals=(M * N if activation else 0),
                           bytes_accessed=int(bytes_accessed))

    vmem_est = usage(tm, tn, tk)
    vlimit = (int(min(_VMEM_BUDGET, max(32 << 20, 2 * vmem_est)))
              if vmem_est > (12 << 20) else None)

    # With the LN cache, column tiles for a fixed row tile must run in grid order (j==0
    # first), so the j axis becomes "arbitrary"; otherwise both i and j are "parallel".
    dims = ("parallel", "arbitrary" if ln_cache else "parallel", "arbitrary")

    return pl.pallas_call(
        kernel,
        grid=(nm, nn, nk),
        out_shape=jax.ShapeDtypeStruct((M, N), out_dtype),
        in_specs=in_specs,
        out_specs=pl.BlockSpec((tm, tn), lambda i, j, k: (i, j)),
        scratch_shapes=scratch_shapes,
        compiler_params=pltpu.CompilerParams(
            dimension_semantics=dims, vmem_limit_bytes=vlimit),
        cost_estimate=cost,
    )(*inputs)


# ---------------------------------------------------------- ln_pre (pos-emb add fused in)

def _ln_pre_kernel(x_ref, pos_ref, g_ref, b_ref, o_ref, *, eps):
    x = x_ref[...].astype(jnp.float32) + pos_ref[...].astype(jnp.float32)
    mean = jnp.mean(x, axis=-1, keepdims=True)
    xc = x - mean
    var = jnp.mean(xc * xc, axis=-1, keepdims=True)
    o_ref[...] = (xc * jax.lax.rsqrt(var + eps) * g_ref[...] + b_ref[...]).astype(o_ref.dtype)


def ln_pre(x, pos, g, b, eps=1e-5):
    """LayerNorm over channels with the positional-embedding add fused in.  x:(B,S,D)."""
    B, S, D = x.shape
    return pl.pallas_call(
        functools.partial(_ln_pre_kernel, eps=eps),
        grid=(B,),
        out_shape=jax.ShapeDtypeStruct((B, S, D), jnp.bfloat16),
        in_specs=[pl.BlockSpec((1, S, D), lambda i: (i, 0, 0)),
                  pl.BlockSpec((S, D), lambda i: (0, 0)),
                  pl.BlockSpec((1, D), lambda i: (0, 0)),
                  pl.BlockSpec((1, D), lambda i: (0, 0))],
        out_specs=pl.BlockSpec((1, S, D), lambda i: (i, 0, 0)),
        compiler_params=pltpu.CompilerParams(dimension_semantics=("parallel",)),
    )(x, pos.astype(jnp.float32), g.reshape(1, D).astype(jnp.float32),
      b.reshape(1, D).astype(jnp.float32))


# ----------------------------------------------------------------------------- attention

def _head_group_size(heads, head_dim):
    """Heads per attention group so each group's q/k/v slab is 128-lane aligned (or full
    width).  ViT-B/16: 12 heads x 64 -> pairs of heads (128-lane slabs)."""
    for hpg in range(1, heads):
        if heads % hpg == 0 and (hpg * head_dim) % 128 == 0:
            return hpg
    return heads


def _qkv_group_perm(D, heads, hpg):
    """Column permutation taking [q(D)|k(D)|v(D)] to [g0:(q|k|v), g1:(q|k|v), ...]."""
    Dh = D // heads
    G = heads // hpg
    idx = []
    for g in range(G):
        for part in range(3):                    # q, k, v
            base = part * D + g * hpg * Dh
            idx.extend(range(base, base + hpg * Dh))
    return jnp.asarray(idx, jnp.int32)


def _attention_kernel(qkv_ref, o_ref, *, hpg, Dh, scale, exp_dtype):
    # qkv_ref: (1, S, 3*Dg) block holding this head-group's contiguous [q | k | v] slabs.
    Dg = hpg * Dh
    for h in range(hpg):                         # static unroll over heads in the group
        q = qkv_ref[0, :, h * Dh:(h + 1) * Dh].astype(jnp.bfloat16)
        k = qkv_ref[0, :, Dg + h * Dh:Dg + (h + 1) * Dh].astype(jnp.bfloat16)
        v = qkv_ref[0, :, 2 * Dg + h * Dh:2 * Dg + (h + 1) * Dh].astype(jnp.bfloat16)
        s = jax.lax.dot_general(q, k, (((1,), (1,)), ((), ())),
                                preferred_element_type=jnp.float32) * scale
        s = s - jnp.max(s, axis=-1, keepdims=True)
        p = jnp.exp(s.astype(exp_dtype))                          # bf16 exp on v6e/v7x only
        denom = jnp.sum(p.astype(jnp.float32), axis=-1, keepdims=True)
        inv = pl.reciprocal(denom, approx=True)                   # EUP slot
        o = jnp.dot(p.astype(jnp.bfloat16), v, preferred_element_type=jnp.float32)
        # Write each head's result into its output slice as it is produced (no concat).
        o_ref[0, :, h * Dh:(h + 1) * Dh] = (o * inv).astype(o_ref.dtype)


def attention(qkv, *, heads, hpg, scale):
    """qkv: (B, S, 3D) with columns group-permuted as [g:(q|k|v)]; returns (B, S, D) bf16."""
    # TODO(synk): full (S,S) scores per head; switch to flash-style KV tiling with online
    # softmax before running at MaskCLIP segmentation resolutions (S ~ 800-1600).
    B, S, D3 = qkv.shape
    D = D3 // 3
    Dh = D // heads
    G = heads // hpg
    Dg = hpg * Dh
    cost = pl.CostEstimate(flops=4 * B * S * S * D,
                           transcendentals=B * heads * S * S,
                           bytes_accessed=int(qkv.dtype.itemsize * B * S * D3 + 2 * B * S * D))
    kernel = functools.partial(_attention_kernel, hpg=hpg, Dh=Dh, scale=scale,
                               exp_dtype=_EXP_DTYPE)
    return pl.pallas_call(
        kernel,
        grid=(B, G),                             # (batch, head-group): feeds both v7x TCs
        out_shape=jax.ShapeDtypeStruct((B, S, D), jnp.bfloat16),
        in_specs=[pl.BlockSpec((1, S, 3 * Dg), lambda b, g: (b, 0, g))],
        out_specs=pl.BlockSpec((1, S, Dg), lambda b, g: (b, 0, g)),
        compiler_params=pltpu.CompilerParams(dimension_semantics=("parallel", "parallel")),
        cost_estimate=cost,
    )(qkv)


# ----------------------------------------------------------------------------- model glue

def _mha(x2d, blk, B, S, D, heads, hpg):
    # LN1 fused into the QKV matmul prologue; bf16 intermediates between kernels.
    qkv = fused_matmul(x2d, blk["qkv_w"], blk["qkv_b"],
                       ln_g=blk["ln1_g"], ln_b=blk["ln1_b"], out_dtype=jnp.bfloat16)
    o = attention(qkv.reshape(B, S, 3 * D), heads=heads, hpg=hpg,
                  scale=(D // heads) ** -0.5)
    # Out-projection with the residual add fused into the epilogue.
    return fused_matmul(o.reshape(B * S, D), blk["out_w"], blk["out_b"],
                        residual=x2d, out_dtype=jnp.bfloat16)


def _maskclip_attn(x2d, blk):
    # MaskCLIP last-layer trick: drop q/k, each token goes through the value projection
    # followed by the attention output projection (no spatial mixing).
    # TODO(synk): verify against maskclip_onnx's exact last-block formulation.
    v = fused_matmul(x2d, blk["v_w"], blk["v_b"],
                     ln_g=blk["ln1_g"], ln_b=blk["ln1_b"], out_dtype=jnp.bfloat16)
    return fused_matmul(v, blk["out_w"], blk["out_b"], residual=x2d, out_dtype=jnp.bfloat16)


def _resblock(x2d, blk, B, S, D, heads, hpg, maskclip_last):
    if maskclip_last:
        x2d = _maskclip_attn(x2d, blk)
    else:
        x2d = _mha(x2d, blk, B, S, D, heads, hpg)
    # LN2 + fc + QuickGELU in one kernel; proj + residual in one kernel.
    h = fused_matmul(x2d, blk["fc_w"], blk["fc_b"],
                     ln_g=blk["ln2_g"], ln_b=blk["ln2_b"],
                     activation="quick_gelu", out_dtype=jnp.bfloat16)
    return fused_matmul(h, blk["proj_w"], blk["proj_b"], residual=x2d,
                        out_dtype=jnp.bfloat16)


def maskclip_backbone_forward(params, img, *, cfg):
    """img: NCHW float32.  Returns {'0': (B, out_dim, H//P, W//P)} like MaskclipBackbone."""
    P, D, heads, hpg = cfg["patch_size"], cfg["width"], cfg["heads"], cfg["hpg"]
    B, C, H, W = img.shape
    ph, pw = H // P, W // P
    N = ph * pw
    S = N + 1

    # Patch embedding: Conv2d(k=P, s=P, bias=False) expressed as patches @ W_flat (no bias).
    patches = (img.reshape(B, C, ph, P, pw, P)
                  .transpose(0, 2, 4, 1, 3, 5)             # B, ph, pw, C, P, P
                  .reshape(B * N, C * P * P))
    x = fused_matmul(patches, params["patch_w"], out_dtype=jnp.bfloat16).reshape(B, N, D)

    cls = jnp.broadcast_to(params["class_emb"].astype(jnp.bfloat16).reshape(1, 1, D),
                           (B, 1, D))
    x = jnp.concatenate([cls, x], axis=1)                   # (B, S, D) bf16 token slab
    # TODO(synk): positional-embedding interpolation for non-native input sizes not implemented.
    # The pos-emb add is fused into the ln_pre kernel (saves one HBM pass over (B,S,D)).
    x = ln_pre(x, params["pos_emb"], params["ln_pre_g"], params["ln_pre_b"])

    x2d = x.reshape(B * S, D)
    nblk = len(params["blocks"])
    for li, blk in enumerate(params["blocks"]):
        x2d = _resblock(x2d, blk, B, S, D, heads, hpg, maskclip_last=(li == nblk - 1))

    # ln_post fused into the final projection (no bias); final output stays f32.
    feats = fused_matmul(x2d, params["proj"],
                         ln_g=params["ln_post_g"], ln_b=params["ln_post_b"],
                         out_dtype=jnp.float32)
    out_dim = params["proj"].shape[1]
    feats = feats.reshape(B, S, out_dim)[:, 1:]             # drop CLS token
    return {"0": feats.reshape(B, ph, pw, out_dim).transpose(0, 3, 1, 2)}


def init_params(key, *, in_ch=3, patch_size=4, width=32, heads=4, layers=3,
                out_dim=32, num_patches=16):
    keys = iter(jax.random.split(key, 8 + layers * 6))

    # Weights stored in bf16 (halves weight DMA bytes; f32 accumulation in-kernel).
    # TODO(synk): on v7x, fp8 weight storage with per-channel scales in the epilogue
    # would halve weight bytes again (v7x MXU has fp8, no int8).
    def nrm(shape, scale=0.02, dtype=jnp.bfloat16):
        return (scale * jax.random.normal(next(keys), shape, jnp.float32)).astype(dtype)

    Dh = width // heads
    hpg = _head_group_size(heads, Dh)
    perm = _qkv_group_perm(width, heads, hpg)

    cfg = {"patch_size": patch_size, "width": width, "heads": heads, "hpg": hpg}
    params = {
        "patch_w": nrm((in_ch * patch_size * patch_size, width)),
        "class_emb": nrm((width,), dtype=jnp.float32),
        "pos_emb": nrm((num_patches + 1, width), dtype=jnp.float32),
        "ln_pre_g": jnp.ones((width,), jnp.float32),
        "ln_pre_b": jnp.zeros((width,), jnp.float32),
        "ln_post_g": jnp.ones((width,), jnp.float32),
        "ln_post_b": jnp.zeros((width,), jnp.float32),
        "proj": nrm((width, out_dim)),
        "blocks": [],
    }
    for _ in range(layers):
        in_w = nrm((width, 3 * width))
        in_b = jnp.zeros((3 * width,), jnp.float32)
        params["blocks"].append({
            "ln1_g": jnp.ones((width,), jnp.float32),
            "ln1_b": jnp.zeros((width,), jnp.float32),
            # Attention path: QKV columns permuted once (load time) to [g:(q|k|v)] so each
            # head-group's q/k/v slab is contiguous and lane-aligned in the attention kernel.
            "qkv_w": in_w[:, perm],
            "qkv_b": in_b[perm],
            # MaskCLIP last-block path uses the raw v-projection slice (original head order).
            "v_w": in_w[:, 2 * width:],
            "v_b": in_b[2 * width:],
            "out_w": nrm((width, width)),
            "out_b": jnp.zeros((width,), jnp.float32),
            "ln2_g": jnp.ones((width,), jnp.float32),
            "ln2_b": jnp.zeros((width,), jnp.float32),
            "fc_w": nrm((width, 4 * width)),
            "fc_b": jnp.zeros((4 * width,), jnp.float32),
            "proj_w": nrm((4 * width, width)),
            "proj_b": jnp.zeros((width,), jnp.float32),
        })
    return params, cfg


if __name__ == "__main__":
    key = jax.random.PRNGKey(0)
    pkey, ikey = jax.random.split(key)

    B, C, H, W = 2, 3, 16, 16
    P = 4                      # stand-in for ViT-B/16's patch_size=16
    OUT_DIM = 32               # stand-in for num_channels=512

    params, cfg = init_params(pkey, in_ch=C, patch_size=P, width=32, heads=4,
                              layers=3, out_dim=OUT_DIM,
                              num_patches=(H // P) * (W // P))
    img = jax.random.normal(ikey, (B, C, H, W), jnp.float32)

    fwd = jax.jit(functools.partial(maskclip_backbone_forward, cfg=cfg))
    out = fwd(params, img)
    feats = jax.block_until_ready(out["0"])
    assert feats.shape == (B, OUT_DIM, H // P, W // P)
    assert feats.dtype == jnp.float32
    assert bool(jnp.all(jnp.isfinite(feats)))

    # Exercise the LN-cache (nn > 1) and K-split accumulator (nk > 1) matmul paths against
    # a plain jnp reference (loose tolerance: bf16 MXU operands, f32 accumulation).
    k1, k2, k3, k4 = jax.random.split(jax.random.PRNGKey(1), 4)
    xt = jax.random.normal(k1, (64, 256), jnp.float32)
    wt = (0.05 * jax.random.normal(k2, (256, 512), jnp.float32)).astype(jnp.bfloat16)
    bt = 0.05 * jax.random.normal(k3, (512,), jnp.float32)
    gt = 1.0 + 0.1 * jax.random.normal(k4, (256,), jnp.float32)
    bet = jnp.zeros((256,), jnp.float32)

    mu = xt.mean(-1, keepdims=True)
    xc = xt - mu
    var = (xc * xc).mean(-1, keepdims=True)
    xln = (xc * jax.lax.rsqrt(var + 1e-5) * gt + bet).astype(jnp.bfloat16).astype(jnp.float32)
    ref_ln = xln @ wt.astype(jnp.float32) + bt
    y_ln = fused_matmul(xt, wt, bt, ln_g=gt, ln_b=bet, tile_n=128)
    assert jnp.allclose(y_ln, ref_ln, rtol=3e-2, atol=3e-2), "ln-cache path mismatch"

    ref_acc = xt.astype(jnp.bfloat16).astype(jnp.float32) @ wt.astype(jnp.float32) + bt
    y_acc = fused_matmul(xt, wt, bt, tile_k=128)
    assert jnp.allclose(y_acc, ref_acc, rtol=3e-2, atol=3e-2), "accumulator path mismatch"

    print("KERNEL_OK")
</pallas_src>

<mosaic_0001>
module attributes {stable_mosaic.version = 11 : i64} {
  func.func @_ln_pre_kernel(%arg0: i32, %arg1: memref<1x17x32xbf16, #tpu.memory_space<vmem>>, %arg2: memref<17x32xf32, #tpu.memory_space<vmem>>, %arg3: memref<1x32xf32, #tpu.memory_space<vmem>>, %arg4: memref<1x32xf32, #tpu.memory_space<vmem>>, %arg5: memref<1x17x32xbf16, #tpu.memory_space<vmem>>) attributes {dimension_semantics = [#tpu.dimension_semantics<parallel>], iteration_bounds = array<i64: 2>, scalar_prefetch = 0 : i64, scratch_operands = 0 : i64, tpu.core_type = #tpu.core_type<tc>, window_params = [{transform_indices = @transform_0, window_bounds = array<i64: 1, 17, 32>}, {pipeline_mode = #tpu.pipeline_mode<synchronous>, transform_indices = @transform_1, window_bounds = array<i64: 17, 32>}, {pipeline_mode = #tpu.pipeline_mode<synchronous>, transform_indices = @transform_2, window_bounds = array<i64: 1, 32>}, {pipeline_mode = #tpu.pipeline_mode<synchronous>, transform_indices = @transform_3, window_bounds = array<i64: 1, 32>}, {transform_indices = @transform_4, window_bounds = array<i64: 1, 17, 32>}]} {
    %c0 = arith.constant 0 : index
    %c0_0 = arith.constant 0 : index
    %c0_1 = arith.constant 0 : index
    %0 = vector.load %arg1[%c0, %c0_0, %c0_1] : memref<1x17x32xbf16, #tpu.memory_space<vmem>>, vector<1x17x32xbf16>
    %1 = arith.extf %0 : vector<1x17x32xbf16> to vector<1x17x32xf32>
    %c0_2 = arith.constant 0 : index
    %c0_3 = arith.constant 0 : index
    %2 = vector.load %arg2[%c0_2, %c0_3] : memref<17x32xf32, #tpu.memory_space<vmem>>, vector<17x32xf32>
    %3 = vector.shape_cast %2 : vector<17x32xf32> to vector<1x17x32xf32>
    %4 = arith.addf %1, %3 : vector<1x17x32xf32>
    %cst = arith.constant dense<0.000000e+00> : vector<1x17xf32>
    %5 = vector.multi_reduction <add>, %4, %cst [2] : vector<1x17x32xf32> to vector<1x17xf32>
    %6 = vector.shape_cast %5 : vector<1x17xf32> to vector<1x17x1xf32>
    %cst_4 = arith.constant 3.200000e+01 : f32
    %7 = vector.broadcast %cst_4 : f32 to vector<1x17x1xf32>
    %8 = arith.divf %6, %7 : vector<1x17x1xf32>
    %9 = vector.broadcast %8 : vector<1x17x1xf32> to vector<1x17x32xf32>
    %10 = arith.subf %4, %9 : vector<1x17x32xf32>
    %11 = arith.mulf %10, %10 : vector<1x17x32xf32>
    %cst_5 = arith.constant dense<0.000000e+00> : vector<1x17xf32>
    %12 = vector.multi_reduction <add>, %11, %cst_5 [2] : vector<1x17x32xf32> to vector<1x17xf32>
    %13 = vector.shape_cast %12 : vector<1x17xf32> to vector<1x17x1xf32>
    %cst_6 = arith.constant 3.200000e+01 : f32
    %14 = vector.broadcast %cst_6 : f32 to vector<1x17x1xf32>
    %15 = arith.divf %13, %14 : vector<1x17x1xf32>
    %cst_7 = arith.constant 9.99999974E-6 : f32
    %16 = vector.broadcast %cst_7 : f32 to vector<1x17x1xf32>
    %17 = arith.addf %15, %16 : vector<1x17x1xf32>
    %18 = math.rsqrt %17 : vector<1x17x1xf32>
    %19 = vector.broadcast %18 : vector<1x17x1xf32> to vector<1x17x32xf32>
    %20 = arith.mulf %10, %19 : vector<1x17x32xf32>
    %c0_8 = arith.constant 0 : index
    %c0_9 = arith.constant 0 : index
    %21 = vector.load %arg3[%c0_8, %c0_9] : memref<1x32xf32, #tpu.memory_space<vmem>>, vector<1x32xf32>
    %22 = vector.shape_cast %21 : vector<1x32xf32> to vector<1x1x32xf32>
    %23 = vector.broadcast %22 : vector<1x1x32xf32> to vector<1x17x32xf32>
    %24 = arith.mulf %20, %23 : vector<1x17x32xf32>
    %c0_10 = arith.constant 0 : index
    %c0_11 = arith.constant 0 : index
    %25 = vector.load %arg4[%c0_10, %c0_11] : memref<1x32xf32, #tpu.memory_space<vmem>>, vector<1x32xf32>
    %26 = vector.shape_cast %25 : vector<1x32xf32> to vector<1x1x32xf32>
    %27 = vector.broadcast %26 : vector<1x1x32xf32> to vector<1x17x32xf32>
    %28 = arith.addf %24, %27 : vector<1x17x32xf32>
    %29 = arith.truncf %28 : vector<1x17x32xf32> to vector<1x17x32xbf16>
    %c0_12 = arith.constant 0 : index
    %c0_13 = arith.constant 0 : index
    %c0_14 = arith.constant 0 : index
    %30 = vector.load %arg5[%c0_12, %c0_13, %c0_14] : memref<1x17x32xbf16, #tpu.memory_space<vmem>>, vector<1x17x32xbf16>
    tpu.vector_store %arg5[%c0_12, %c0_13, %c0_14], %29 {strides = array<i32>} : memref<1x17x32xbf16, #tpu.memory_space<vmem>>, vector<1x17x32xbf16>,
    return
  }
  func.func @transform_0(%arg0: i32) -> (i32, i32, i32) {
    %c0_i32 = arith.constant 0 : i32
    %c0_i32_0 = arith.constant 0 : i32
    %c0_i32_1 = arith.constant 0 : i32
    return %arg0, %c0_i32, %c0_i32_0 : i32, i32, i32
  }
  func.func @transform_1(%arg0: i32) -> (i32, i32) {
    %c0_i32 = arith.constant 0 : i32
    %c0_i32_0 = arith.constant 0 : i32
    %c0_i32_1 = arith.constant 0 : i32
    return %c0_i32, %c0_i32_0 : i32, i32
  }
  func.func @transform_2(%arg0: i32) -> (i32, i32) {
    %c0_i32 = arith.constant 0 : i32
    %c0_i32_0 = arith.constant 0 : i32
    %c0_i32_1 = arith.constant 0 : i32
    return %c0_i32, %c0_i32_0 : i32, i32
  }
  func.func @transform_3(%arg0: i32) -> (i32, i32) {
    %c0_i32 = arith.constant 0 : i32
    %c0_i32_0 = arith.constant 0 : i32
    %c0_i32_1 = arith.constant 0 : i32
    return %c0_i32, %c0_i32_0 : i32, i32
  }
  func.func @transform_4(%arg0: i32) -> (i32, i32, i32) {
    %c0_i32 = arith.constant 0 : i32
    %c0_i32_0 = arith.constant 0 : i32
    %c0_i32_1 = arith.constant 0 : i32
    return %arg0, %c0_i32, %c0_i32_0 : i32, i32, i32
  }
}

module attributes {stable_mosaic.version = 11 : i64} {
  func.func @kernel(%arg0: i32, %arg1: i32, %arg2: i32, %arg3: memref<32x48xf32, #tpu.memory_space<vmem>>, %arg4: memref<48x32xbf16, #tpu.memory_space<vmem>>, %arg5: memref<32x32xbf16, #tpu.memory_space<vmem>>) attributes {dimension_semantics = [#tpu.dimension_semantics<parallel>, #tpu.dimension_semantics<parallel>, #tpu.dimension_semantics<arbitrary>], iteration_bounds = array<i64: 1, 1, 1>, scalar_prefetch = 0 : i64, scratch_operands = 0 : i64, tpu.core_type = #tpu.core_type<tc>, window_params = [{transform_indices = @transform_0, window_bounds = array<i64: 32, 48>}, {transform_indices = @transform_1, window_bounds = array<i64: 48, 32>}, {transform_indices = @transform_2, window_bounds = array<i64: 32, 32>}]} {
    %c0 = arith.constant 0 : index
    %c0_0 = arith.constant 0 : index
    %0 = vector.load %arg3[%c0, %c0_0] : memref<32x48xf32, #tpu.memory_space<vmem>>, vector<32x48xf32>
    %1 = arith.truncf %0 : vector<32x48xf32> to vector<32x48xbf16>
    %c0_1 = arith.constant 0 : index
    %c0_2 = arith.constant 0 : index
    %2 = vector.load %arg4[%c0_1, %c0_2] : memref<48x32xbf16, #tpu.memory_space<vmem>>, vector<48x32xbf16>
    %cst = arith.constant dense<0.000000e+00> : vector<32x32xf32>
    %3 = tpu.matmul %1, %2, %cst {dimension_numbers = #tpu.dot_dimension_numbers<[1], [0], [0], [1], [0, 0, 1, 1], [], []>} : vector<32x48xbf16>, vector<48x32xbf16>, vector<32x32xf32> -> vector<32x32xf32>
    %4 = arith.truncf %3 : vector<32x32xf32> to vector<32x32xbf16>
    %c0_3 = arith.constant 0 : index
    %c0_4 = arith.constant 0 : index
    %5 = vector.load %arg5[%c0_3, %c0_4] : memref<32x32xbf16, #tpu.memory_space<vmem>>, vector<32x32xbf16>
    tpu.vector_store %arg5[%c0_3, %c0_4], %4 {strides = array<i32>} : memref<32x32xbf16, #tpu.memory_space<vmem>>, vector<32x32xbf16>,
    return
  }
  func.func @transform_0(%arg0: i32, %arg1: i32, %arg2: i32) -> (i32, i32) {
    %c0_i32 = arith.constant 0 : i32
    return %arg0, %arg2 : i32, i32
  }
  func.func @transform_1(%arg0: i32, %arg1: i32, %arg2: i32) -> (i32, i32) {
    %c0_i32 = arith.constant 0 : i32
    return %arg2, %arg1 : i32, i32
  }
  func.func @transform_2(%arg0: i32, %arg1: i32, %arg2: i32) -> (i32, i32) {
    %c0_i32 = arith.constant 0 : i32
    return %arg0, %arg1 : i32, i32
  }
}

module attributes {stable_mosaic.version = 11 : i64} {
  func.func @kernel(%arg0: i32, %arg1: i32, %arg2: i32, %arg3: memref<34x32xbf16, #tpu.memory_space<vmem>>, %arg4: memref<1x32xf32, #tpu.memory_space<vmem>>, %arg5: memref<1x32xf32, #tpu.memory_space<vmem>>, %arg6: memref<32x96xbf16, #tpu.memory_space<vmem>>, %arg7: memref<1x96xf32, #tpu.memory_space<vmem>>, %arg8: memref<34x96xbf16, #tpu.memory_space<vmem>>) attributes {dimension_semantics = [#tpu.dimension_semantics<parallel>, #tpu.dimension_semantics<parallel>, #tpu.dimension_semantics<arbitrary>], iteration_bounds = array<i64: 1, 1, 1>, scalar_prefetch = 0 : i64, scratch_operands = 0 : i64, tpu.core_type = #tpu.core_type<tc>, window_params = [{transform_indices = @transform_0, window_bounds = array<i64: 34, 32>}, {pipeline_mode = #tpu.pipeline_mode<synchronous>, transform_indices = @transform_1, window_bounds = array<i64: 1, 32>}, {pipeline_mode = #tpu.pipeline_mode<synchronous>, transform_indices = @transform_2, window_bounds = array<i64: 1, 32>}, {transform_indices = @transform_3, window_bounds = array<i64: 32, 96>}, {transform_indices = @transform_4, window_bounds = array<i64: 1, 96>}, {transform_indices = @transform_5, window_bounds = array<i64: 34, 96>}]} {
    %c0 = arith.constant 0 : index
    %c0_0 = arith.constant 0 : index
    %0 = vector.load %arg3[%c0, %c0_0] : memref<34x32xbf16, #tpu.memory_space<vmem>>, vector<34x32xbf16>
    %1 = arith.extf %0 : vector<34x32xbf16> to vector<34x32xf32>
    %cst = arith.constant dense<0.000000e+00> : vector<34xf32>
    %2 = vector.multi_reduction <add>, %1, %cst [1] : vector<34x32xf32> to vector<34xf32>
    %3 = vector.shape_cast %2 : vector<34xf32> to vector<34x1xf32>
    %cst_1 = arith.constant 3.200000e+01 : f32
    %4 = vector.broadcast %cst_1 : f32 to vector<34x1xf32>
    %5 = arith.divf %3, %4 : vector<34x1xf32>
    %6 = vector.broadcast %5 : vector<34x1xf32> to vector<34x32xf32>
    %7 = arith.subf %1, %6 : vector<34x32xf32>
    %8 = arith.mulf %7, %7 : vector<34x32xf32>
    %cst_2 = arith.constant dense<0.000000e+00> : vector<34xf32>
    %9 = vector.multi_reduction <add>, %8, %cst_2 [1] : vector<34x32xf32> to vector<34xf32>
    %10 = vector.shape_cast %9 : vector<34xf32> to vector<34x1xf32>
    %cst_3 = arith.constant 3.200000e+01 : f32
    %11 = vector.broadcast %cst_3 : f32 to vector<34x1xf32>
    %12 = arith.divf %10, %11 : vector<34x1xf32>
    %cst_4 = arith.constant 9.99999974E-6 : f32
    %13 = vector.broadcast %cst_4 : f32 to vector<34x1xf32>
    %14 = arith.addf %12, %13 : vector<34x1xf32>
    %15 = math.rsqrt %14 : vector<34x1xf32>
    %16 = vector.broadcast %15 : vector<34x1xf32> to vector<34x32xf32>
    %17 = arith.mulf %7, %16 : vector<34x32xf32>
    %c0_5 = arith.constant 0 : index
    %c0_6 = arith.constant 0 : index
    %18 = vector.load %arg4[%c0_5, %c0_6] : memref<1x32xf32, #tpu.memory_space<vmem>>, vector<1x32xf32>
    %19 = vector.broadcast %18 : vector<1x32xf32> to vector<34x32xf32>
    %20 = arith.mulf %17, %19 : vector<34x32xf32>
    %c0_7 = arith.constant 0 : index
    %c0_8 = arith.constant 0 : index
    %21 = vector.load %arg5[%c0_7, %c0_8] : memref<1x32xf32, #tpu.memory_space<vmem>>, vector<1x32xf32>
    %22 = vector.broadcast %21 : vector<1x32xf32> to vector<34x32xf32>
    %23 = arith.addf %20, %22 : vector<34x32xf32>
    %24 = arith.truncf %23 : vector<34x32xf32> to vector<34x32xbf16>
    %c0_9 = arith.constant 0 : index
    %c0_10 = arith.constant 0 : index
    %25 = vector.load %arg6[%c0_9, %c0_10] : memref<32x96xbf16, #tpu.memory_space<vmem>>, vector<32x96xbf16>
    %cst_11 = arith.constant dense<0.000000e+00> : vector<34x96xf32>
    %26 = tpu.matmul %24, %25, %cst_11 {dimension_numbers = #tpu.dot_dimension_numbers<[1], [0], [0], [1], [0, 0, 1, 1], [], []>} : vector<34x32xbf16>, vector<32x96xbf16>, vector<34x96xf32> -> vector<34x96xf32>
    %c0_12 = arith.constant 0 : index
    %c0_13 = arith.constant 0 : index
    %27 = vector.load %arg7[%c0_12, %c0_13] : memref<1x96xf32, #tpu.memory_space<vmem>>, vector<1x96xf32>
    %28 = vector.broadcast %27 : vector<1x96xf32> to vector<34x96xf32>
    %29 = arith.addf %26, %28 : vector<34x96xf32>
    %30 = arith.truncf %29 : vector<34x96xf32> to vector<34x96xbf16>
    %c0_14 = arith.constant 0 : index
    %c0_15 = arith.constant 0 : index
    %31 = vector.load %arg8[%c0_14, %c0_15] : memref<34x96xbf16, #tpu.memory_space<vmem>>, vector<34x96xbf16>
    tpu.vector_store %arg8[%c0_14, %c0_15], %30 {strides = array<i32>} : memref<34x96xbf16, #tpu.memory_space<vmem>>, vector<34x96xbf16>,
    return
  }
  func.func @transform_0(%arg0: i32, %arg1: i32, %arg2: i32) -> (i32, i32) {
    %c0_i32 = arith.constant 0 : i32
    return %arg0, %arg2 : i32, i32
  }
  func.func @transform_1(%arg0: i32, %arg1: i32, %arg2: i32) -> (i32, i32) {
    %c0_i32 = arith.constant 0 : i32
    %c0_i32_0 = arith.constant 0 : i32
    %c0_i32_1 = arith.constant 0 : i32
    return %c0_i32, %c0_i32_0 : i32, i32
  }
  func.func @transform_2(%arg0: i32, %arg1: i32, %arg2: i32) -> (i32, i32) {
    %c0_i32 = arith.constant 0 : i32
    %c0_i32_0 = arith.constant 0 : i32
    %c0_i32_1 = arith.constant 0 : i32
    return %c0_i32, %c0_i32_0 : i32, i32
  }
  func.func @transform_3(%arg0: i32, %arg1: i32, %arg2: i32) -> (i32, i32) {
    %c0_i32 = arith.constant 0 : i32
    return %arg2, %arg1 : i32, i32
  }
  func.func @transform_4(%arg0: i32, %arg1: i32, %arg2: i32) -> (i32, i32) {
    %c0_i32 = arith.constant 0 : i32
    %c0_i32_0 = arith.constant 0 : i32
    return %c0_i32, %arg1 : i32, i32
  }
  func.func @transform_5(%arg0: i32, %arg1: i32, %arg2: i32) -> (i32, i32) {
    %c0_i32 = arith.constant 0 : i32
    return %arg0, %arg1 : i32, i32
  }
}

module attributes {stable_mosaic.version = 11 : i64} {
  func.func @_attention_kernel(%arg0: i32, %arg1: i32, %arg2: memref<1x17x96xbf16, #tpu.memory_space<vmem>>, %arg3: memref<1x17x32xbf16, #tpu.memory_space<vmem>>) attributes {dimension_semantics = [#tpu.dimension_semantics<parallel>, #tpu.dimension_semantics<parallel>], iteration_bounds = array<i64: 2, 1>, scalar_prefetch = 0 : i64, scratch_operands = 0 : i64, tpu.core_type = #tpu.core_type<tc>, window_params = [{transform_indices = @transform_0, window_bounds = array<i64: 1, 17, 96>}, {transform_indices = @transform_1, window_bounds = array<i64: 1, 17, 32>}]} {
    %c0 = arith.constant 0 : index
    %c0_0 = arith.constant 0 : index
    %c0_1 = arith.constant 0 : index
    %0 = vector.load %arg2[%c0, %c0_0, %c0_1] : memref<1x17x96xbf16, #tpu.memory_space<vmem>>, vector<1x17x8xbf16>
    %1 = vector.shape_cast %0 : vector<1x17x8xbf16> to vector<17x8xbf16>
    %c0_2 = arith.constant 0 : index
    %c0_3 = arith.constant 0 : index
    %c32 = arith.constant 32 : index
    %2 = vector.load %arg2[%c0_2, %c0_3, %c32] : memref<1x17x96xbf16, #tpu.memory_space<vmem>>, vector<1x17x8xbf16>
    %3 = vector.shape_cast %2 : vector<1x17x8xbf16> to vector<17x8xbf16>
    %c0_4 = arith.constant 0 : index
    %c0_5 = arith.constant 0 : index
    %c64 = arith.constant 64 : index
    %4 = vector.load %arg2[%c0_4, %c0_5, %c64] : memref<1x17x96xbf16, #tpu.memory_space<vmem>>, vector<1x17x8xbf16>
    %5 = vector.shape_cast %4 : vector<1x17x8xbf16> to vector<17x8xbf16>
    %cst = arith.constant dense<0.000000e+00> : vector<17x17xf32>
    %6 = tpu.matmul %1, %3, %cst {dimension_numbers = #tpu.dot_dimension_numbers<[1], [1], [0], [0], [0, 0, 1, 0], [], []>} : vector<17x8xbf16>, vector<17x8xbf16>, vector<17x17xf32> -> vector<17x17xf32>
    %cst_6 = arith.constant 0.353553385 : f32
    %7 = vector.broadcast %cst_6 : f32 to vector<17x17xf32>
    %8 = arith.mulf %6, %7 : vector<17x17xf32>
    %cst_7 = arith.constant dense<0xFF800000> : vector<17xf32>
    %9 = vector.multi_reduction <maximumf>, %8, %cst_7 [1] : vector<17x17xf32> to vector<17xf32>
    %10 = vector.shape_cast %9 : vector<17xf32> to vector<17x1xf32>
    %11 = vector.broadcast %10 : vector<17x1xf32> to vector<17x17xf32>
    %12 = arith.subf %8, %11 : vector<17x17xf32>
    %13 = math.exp %12 : vector<17x17xf32>
    %cst_8 = arith.constant dense<0.000000e+00> : vector<17xf32>
    %14 = vector.multi_reduction <add>, %13, %cst_8 [1] : vector<17x17xf32> to vector<17xf32>
    %15 = vector.shape_cast %14 : vector<17xf32> to vector<17x1xf32>
    %16 = tpu.reciprocal %15 {approx = true} : vector<17x1xf32> -> vector<17x1xf32>
    %17 = arith.truncf %13 : vector<17x17xf32> to vector<17x17xbf16>
    %cst_9 = arith.constant dense<0.000000e+00> : vector<17x8xf32>
    %18 = tpu.matmul %17, %5, %cst_9 {dimension_numbers = #tpu.dot_dimension_numbers<[1], [0], [0], [1], [0, 0, 1, 1], [], []>} : vector<17x17xbf16>, vector<17x8xbf16>, vector<17x8xf32> -> vector<17x8xf32>
    %19 = vector.broadcast %16 : vector<17x1xf32> to vector<17x8xf32>
    %20 = arith.mulf %18, %19 : vector<17x8xf32>
    %21 = arith.truncf %20 : vector<17x8xf32> to vector<17x8xbf16>
    %c0_10 = arith.constant 0 : index
    %c0_11 = arith.constant 0 : index
    %c0_12 = arith.constant 0 : index
    %22 = vector.load %arg3[%c0_10, %c0_11, %c0_12] : memref<1x17x32xbf16, #tpu.memory_space<vmem>>, vector<1x17x8xbf16>
    %23 = vector.shape_cast %22 : vector<1x17x8xbf16> to vector<17x8xbf16>
    %24 = vector.shape_cast %21 : vector<17x8xbf16> to vector<1x17x8xbf16>
    tpu.vector_store %arg3[%c0_10, %c0_11, %c0_12], %24 {strides = array<i32>} : memref<1x17x32xbf16, #tpu.memory_space<vmem>>, vector<1x17x8xbf16>,
    %c0_13 = arith.constant 0 : index
    %c0_14 = arith.constant 0 : index
    %c8 = arith.constant 8 : index
    %25 = vector.load %arg2[%c0_13, %c0_14, %c8] : memref<1x17x96xbf16, #tpu.memory_space<vmem>>, vector<1x17x8xbf16>
    %26 = vector.shape_cast %25 : vector<1x17x8xbf16> to vector<17x8xbf16>
    %c0_15 = arith.constant 0 : index
    %c0_16 = arith.constant 0 : index
    %c40 = arith.constant 40 : index
    %27 = vector.load %arg2[%c0_15, %c0_16, %c40] : memref<1x17x96xbf16, #tpu.memory_space<vmem>>, vector<1x17x8xbf16>
    %28 = vector.shape_cast %27 : vector<1x17x8xbf16> to vector<17x8xbf16>
    %c0_17 = arith.constant 0 : index
    %c0_18 = arith.constant 0 : index
    %c72 = arith.constant 72 : index
    %29 = vector.load %arg2[%c0_17, %c0_18, %c72] : memref<1x17x96xbf16, #tpu.memory_space<vmem>>, vector<1x17x8xbf16>
    %30 = vector.shape_cast %29 : vector<1x17x8xbf16> to vector<17x8xbf16>
    %cst_19 = arith.constant dense<0.000000e+00> : vector<17x17xf32>
    %31 = tpu.matmul %26, %28, %cst_19 {dimension_numbers = #tpu.dot_dimension_numbers<[1], [1], [0], [0], [0, 0, 1, 0], [], []>} : vector<17x8xbf16>, vector<17x8xbf16>, vector<17x17xf32> -> vector<17x17xf32>
    %cst_20 = arith.constant 0.353553385 : f32
    %32 = vector.broadcast %cst_20 : f32 to vector<17x17xf32>
    %33 = arith.mulf %31, %32 : vector<17x17xf32>
    %cst_21 = arith.constant dense<0xFF800000> : vector<17xf32>
    %34 = vector.multi_reduction <maximumf>, %33, %cst_21 [1] : vector<17x17xf32> to vector<17xf32>
    %35 = vector.shape_cast %34 : vector<17xf32> to vector<17x1xf32>
    %36 = vector.broadcast %35 : vector<17x1xf32> to vector<17x17xf32>
    %37 = arith.subf %33, %36 : vector<17x17xf32>
    %38 = math.exp %37 : vector<17x17xf32>
    %cst_22 = arith.constant dense<0.000000e+00> : vector<17xf32>
    %39 = vector.multi_reduction <add>, %38, %cst_22 [1] : vector<17x17xf32> to vector<17xf32>
    %40 = vector.shape_cast %39 : vector<17xf32> to vector<17x1xf32>
    %41 = tpu.reciprocal %40 {approx = true} : vector<17x1xf32> -> vector<17x1xf32>
    %42 = arith.truncf %38 : vector<17x17xf32> to vector<17x17xbf16>
    %cst_23 = arith.constant dense<0.000000e+00> : vector<17x8xf32>
    %43 = tpu.matmul %42, %30, %cst_23 {dimension_numbers = #tpu.dot_dimension_numbers<[1], [0], [0], [1], [0, 0, 1, 1], [], []>} : vector<17x17xbf16>, vector<17x8xbf16>, vector<17x8xf32> -> vector<17x8xf32>
    %44 = vector.broadcast %41 : vector<17x1xf32> to vector<17x8xf32>
    %45 = arith.mulf %43, %44 : vector<17x8xf32>
    %46 = arith.truncf %45 : vector<17x8xf32> to vector<17x8xbf16>
    %c0_24 = arith.constant 0 : index
    %c0_25 = arith.constant 0 : index
    %c8_26 = arith.constant 8 : index
    %47 = vector.load %arg3[%c0_24, %c0_25, %c8_26] : memref<1x17x32xbf16, #tpu.memory_space<vmem>>, vector<1x17x8xbf16>
    %48 = vector.shape_cast %47 : vector<1x17x8xbf16> to vector<17x8xbf16>
    %49 = vector.shape_cast %46 : vector<17x8xbf16> to vector<1x17x8xbf16>
    tpu.vector_store %arg3[%c0_24, %c0_25, %c8_26], %49 {strides = array<i32>} : memref<1x17x32xbf16, #tpu.memory_space<vmem>>, vector<1x17x8xbf16>,
    %c0_27 = arith.constant 0 : index
    %c0_28 = arith.constant 0 : index
    %c16 = arith.constant 16 : index
    %50 = vector.load %arg2[%c0_27, %c0_28, %c16] : memref<1x17x96xbf16, #tpu.memory_space<vmem>>, vector<1x17x8xbf16>
    %51 = vector.shape_cast %50 : vector<1x17x8xbf16> to vector<17x8xbf16>
    %c0_29 = arith.constant 0 : index
    %c0_30 = arith.constant 0 : index
    %c48 = arith.constant 48 : index
    %52 = vector.load %arg2[%c0_29, %c0_30, %c48] : memref<1x17x96xbf16, #tpu.memory_space<vmem>>, vector<1x17x8xbf16>
    %53 = vector.shape_cast %52 : vector<1x17x8xbf16> to vector<17x8xbf16>
    %c0_31 = arith.constant 0 : index
    %c0_32 = arith.constant 0 : index
    %c80 = arith.constant 80 : index
    %54 = vector.load %arg2[%c0_31, %c0_32, %c80] : memref<1x17x96xbf16, #tpu.memory_space<vmem>>, vector<1x17x8xbf16>
    %55 = vector.shape_cast %54 : vector<1x17x8xbf16> to vector<17x8xbf16>
    %cst_33 = arith.constant dense<0.000000e+00> : vector<17x17xf32>
    %56 = tpu.matmul %51, %53, %cst_33 {dimension_numbers = #tpu.dot_dimension_numbers<[1], [1], [0], [0], [0, 0, 1, 0], [], []>} : vector<17x8xbf16>, vector<17x8xbf16>, vector<17x17xf32> -> vector<17x17xf32>
    %cst_34 = arith.constant 0.353553385 : f32
    %57 = vector.broadcast %cst_34 : f32 to vector<17x17xf32>
    %58 = arith.mulf %56, %57 : vector<17x17xf32>
    %cst_35 = arith.constant dense<0xFF800000> : vector<17xf32>
    %59 = vector.multi_reduction <maximumf>, %58, %cst_35 [1] : vector<17x17xf32> to vector<17xf32>
    %60 = vector.shape_cast %59 : vector<17xf32> to vector<17x1xf32>
    %61 = vector.broadcast %60 : vector<17x1xf32> to vector<17x17xf32>
    %62 = arith.subf %58, %61 : vector<17x17xf32>
    %63 = math.exp %62 : vector<17x17xf32>
    %cst_36 = arith.constant dense<0.000000e+00> : vector<17xf32>
    %64 = vector.multi_reduction <add>, %63, %cst_36 [1] : vector<17x17xf32> to vector<17xf32>
    %65 = vector.shape_cast %64 : vector<17xf32> to vector<17x1xf32>
    %66 = tpu.reciprocal %65 {approx = true} : vector<17x1xf32> -> vector<17x1xf32>
    %67 = arith.truncf %63 : vector<17x17xf32> to vector<17x17xbf16>
    %cst_37 = arith.constant dense<0.000000e+00> : vector<17x8xf32>
    %68 = tpu.matmul %67, %55, %cst_37 {dimension_numbers = #tpu.dot_dimension_numbers<[1], [0], [0], [1], [0, 0, 1, 1], [], []>} : vector<17x17xbf16>, vector<17x8xbf16>, vector<17x8xf32> -> vector<17x8xf32>
    %69 = vector.broadcast %66 : vector<17x1xf32> to vector<17x8xf32>
    %70 = arith.mulf %68, %69 : vector<17x8xf32>
    %71 = arith.truncf %70 : vector<17x8xf32> to vector<17x8xbf16>
    %c0_38 = arith.constant 0 : index
    %c0_39 = arith.constant 0 : index
    %c16_40 = arith.constant 16 : index
    %72 = vector.load %arg3[%c0_38, %c0_39, %c16_40] : memref<1x17x32xbf16, #tpu.memory_space<vmem>>, vector<1x17x8xbf16>
    %73 = vector.shape_cast %72 : vector<1x17x8xbf16> to vector<17x8xbf16>
    %74 = vector.shape_cast %71 : vector<17x8xbf16> to vector<1x17x8xbf16>
    tpu.vector_store %arg3[%c0_38, %c0_39, %c16_40], %74 {strides = array<i32>} : memref<1x17x32xbf16, #tpu.memory_space<vmem>>, vector<1x17x8xbf16>,
    %c0_41 = arith.constant 0 : index
    %c0_42 = arith.constant 0 : index
    %c24 = arith.constant 24 : index
    %75 = vector.load %arg2[%c0_41, %c0_42, %c24] : memref<1x17x96xbf16, #tpu.memory_space<vmem>>, vector<1x17x8xbf16>
    %76 = vector.shape_cast %75 : vector<1x17x8xbf16> to vector<17x8xbf16>
    %c0_43 = arith.constant 0 : index
    %c0_44 = arith.constant 0 : index
    %c56 = arith.constant 56 : index
    %77 = vector.load %arg2[%c0_43, %c0_44, %c56] : memref<1x17x96xbf16, #tpu.memory_space<vmem>>, vector<1x17x8xbf16>
    %78 = vector.shape_cast %77 : vector<1x17x8xbf16> to vector<17x8xbf16>
    %c0_45 = arith.constant 0 : index
    %c0_46 = arith.constant 0 : index
    %c88 = arith.constant 88 : index
    %79 = vector.load %arg2[%c0_45, %c0_46, %c88] : memref<1x17x96xbf16, #tpu.memory_space<vmem>>, vector<1x17x8xbf16>
    %80 = vector.shape_cast %79 : vector<1x17x8xbf16> to vector<17x8xbf16>
    %cst_47 = arith.constant dense<0.000000e+00> : vector<17x17xf32>
    %81 = tpu.matmul %76, %78, %cst_47 {dimension_numbers = #tpu.dot_dimension_numbers<[1], [1], [0], [0], [0, 0, 1, 0], [], []>} : vector<17x8xbf16>, vector<17x8xbf16>, vector<17x17xf32> -> vector<17x17xf32>
    %cst_48 = arith.constant 0.353553385 : f32
    %82 = vector.broadcast %cst_48 : f32 to vector<17x17xf32>
    %83 = arith.mulf %81, %82 : vector<17x17xf32>
    %cst_49 = arith.constant dense<0xFF800000> : vector<17xf32>
    %84 = vector.multi_reduction <maximumf>, %83, %cst_49 [1] : vector<17x17xf32> to vector<17xf32>
    %85 = vector.shape_cast %84 : vector<17xf32> to vector<17x1xf32>
    %86 = vector.broadcast %85 : vector<17x1xf32> to vector<17x17xf32>
    %87 = arith.subf %83, %86 : vector<17x17xf32>
    %88 = math.exp %87 : vector<17x17xf32>
    %cst_50 = arith.constant dense<0.000000e+00> : vector<17xf32>
    %89 = vector.multi_reduction <add>, %88, %cst_50 [1] : vector<17x17xf32> to vector<17xf32>
    %90 = vector.shape_cast %89 : vector<17xf32> to vector<17x1xf32>
    %91 = tpu.reciprocal %90 {approx = true} : vector<17x1xf32> -> vector<17x1xf32>
    %92 = arith.truncf %88 : vector<17x17xf32> to vector<17x17xbf16>
    %cst_51 = arith.constant dense<0.000000e+00> : vector<17x8xf32>
    %93 = tpu.matmul %92, %80, %cst_51 {dimension_numbers = #tpu.dot_dimension_numbers<[1], [0], [0], [1], [0, 0, 1, 1], [], []>} : vector<17x17xbf16>, vector<17x8xbf16>, vector<17x8xf32> -> vector<17x8xf32>
    %94 = vector.broadcast %91 : vector<17x1xf32> to vector<17x8xf32>
    %95 = arith.mulf %93, %94 : vector<17x8xf32>
    %96 = arith.truncf %95 : vector<17x8xf32> to vector<17x8xbf16>
    %c0_52 = arith.constant 0 : index
    %c0_53 = arith.constant 0 : index
    %c24_54 = arith.constant 24 : index
    %97 = vector.load %arg3[%c0_52, %c0_53, %c24_54] : memref<1x17x32xbf16, #tpu.memory_space<vmem>>, vector<1x17x8xbf16>
    %98 = vector.shape_cast %97 : vector<1x17x8xbf16> to vector<17x8xbf16>
    %99 = vector.shape_cast %96 : vector<17x8xbf16> to vector<1x17x8xbf16>
    tpu.vector_store %arg3[%c0_52, %c0_53, %c24_54], %99 {strides = array<i32>} : memref<1x17x32xbf16, #tpu.memory_space<vmem>>, vector<1x17x8xbf16>,
    return
  }
  func.func @transform_0(%arg0: i32, %arg1: i32) -> (i32, i32, i32) {
    %c0_i32 = arith.constant 0 : i32
    %c0_i32_0 = arith.constant 0 : i32
    return %arg0, %c0_i32, %arg1 : i32, i32, i32
  }
  func.func @transform_1(%arg0: i32, %arg1: i32) -> (i32, i32, i32) {
    %c0_i32 = arith.constant 0 : i32
    %c0_i32_0 = arith.constant 0 : i32
    return %arg0, %c0_i32, %arg1 : i32, i32, i32
  }
}

module attributes {stable_mosaic.version = 11 : i64} {
  func.func @kernel(%arg0: i32, %arg1: i32, %arg2: i32, %arg3: memref<34x32xbf16, #tpu.memory_space<vmem>>, %arg4: memref<32x32xbf16, #tpu.memory_space<vmem>>, %arg5: memref<1x32xf32, #tpu.memory_space<vmem>>, %arg6: memref<34x32xbf16, #tpu.memory_space<vmem>>, %arg7: memref<34x32xbf16, #tpu.memory_space<vmem>>) attributes {dimension_semantics = [#tpu.dimension_semantics<parallel>, #tpu.dimension_semantics<parallel>, #tpu.dimension_semantics<arbitrary>], iteration_bounds = array<i64: 1, 1, 1>, scalar_prefetch = 0 : i64, scratch_operands = 0 : i64, tpu.core_type = #tpu.core_type<tc>, window_params = [{transform_indices = @transform_0, window_bounds = array<i64: 34, 32>}, {transform_indices = @transform_1, window_bounds = array<i64: 32, 32>}, {transform_indices = @transform_2, window_bounds = array<i64: 1, 32>}, {transform_indices = @transform_3, window_bounds = array<i64: 34, 32>}, {transform_indices = @transform_4, window_bounds = array<i64: 34, 32>}]} {
    %c0 = arith.constant 0 : index
    %c0_0 = arith.constant 0 : index
    %0 = vector.load %arg3[%c0, %c0_0] : memref<34x32xbf16, #tpu.memory_space<vmem>>, vector<34x32xbf16>
    %c0_1 = arith.constant 0 : index
    %c0_2 = arith.constant 0 : index
    %1 = vector.load %arg4[%c0_1, %c0_2] : memref<32x32xbf16, #tpu.memory_space<vmem>>, vector<32x32xbf16>
    %cst = arith.constant dense<0.000000e+00> : vector<34x32xf32>
    %2 = tpu.matmul %0, %1, %cst {dimension_numbers = #tpu.dot_dimension_numbers<[1], [0], [0], [1], [0, 0, 1, 1], [], []>} : vector<34x32xbf16>, vector<32x32xbf16>, vector<34x32xf32> -> vector<34x32xf32>
    %c0_3 = arith.constant 0 : index
    %c0_4 = arith.constant 0 : index
    %3 = vector.load %arg5[%c0_3, %c0_4] : memref<1x32xf32, #tpu.memory_space<vmem>>, vector<1x32xf32>
    %4 = vector.broadcast %3 : vector<1x32xf32> to vector<34x32xf32>
    %5 = arith.addf %2, %4 : vector<34x32xf32>
    %c0_5 = arith.constant 0 : index
    %c0_6 = arith.constant 0 : index
    %6 = vector.load %arg6[%c0_5, %c0_6] : memref<34x32xbf16, #tpu.memory_space<vmem>>, vector<34x32xbf16>
    %7 = arith.extf %6 : vector<34x32xbf16> to vector<34x32xf32>
    %8 = arith.addf %5, %7 : vector<34x32xf32>
    %9 = arith.truncf %8 : vector<34x32xf32> to vector<34x32xbf16>
    %c0_7 = arith.constant 0 : index
    %c0_8 = arith.constant 0 : index
    %10 = vector.load %arg7[%c0_7, %c0_8] : memref<34x32xbf16, #tpu.memory_space<vmem>>, vector<34x32xbf16>
    tpu.vector_store %arg7[%c0_7, %c0_8], %9 {strides = array<i32>} : memref<34x32xbf16, #tpu.memory_space<vmem>>, vector<34x32xbf16>,
    return
  }
  func.func @transform_0(%arg0: i32, %arg1: i32, %arg2: i32) -> (i32, i32) {
    %c0_i32 = arith.constant 0 : i32
    return %arg0, %arg2 : i32, i32
  }
  func.func @transform_1(%arg0: i32, %arg1: i32, %arg2: i32) -> (i32, i32) {
    %c0_i32 = arith.constant 0 : i32
    return %arg2, %arg1 : i32, i32
  }
  func.func @transform_2(%arg0: i32, %arg1: i32, %arg2: i32) -> (i32, i32) {
    %c0_i32 = arith.constant 0 : i32
    %c0_i32_0 = arith.constant 0 : i32
    return %c0_i32, %arg1 : i32, i32
  }
  func.func @transform_3(%arg0: i32, %arg1: i32, %arg2: i32) -> (i32, i32) {
    %c0_i32 = arith.constant 0 : i32
    return %arg0, %arg1 : i32, i32
  }
  func.func @transform_4(%arg0: i32, %arg1: i32, %arg2: i32) -> (i32, i32) {
    %c0_i32 = arith.constant 0 : i32
    return %arg0, %arg1 : i32, i32
  }
}

module attributes {stable_mosaic.version = 11 : i64} {
  func.func @kernel(%arg0: i32, %arg1: i32, %arg2: i32, %arg3: memref<34x128xbf16, #tpu.memory_space<vmem>>, %arg4: memref<128x32xbf16, #tpu.memory_space<vmem>>, %arg5: memref<1x32xf32, #tpu.memory_space<vmem>>, %arg6: memref<34x32xbf16, #tpu.memory_space<vmem>>, %arg7: memref<34x32xbf16, #tpu.memory_space<vmem>>) attributes {dimension_semantics = [#tpu.dimension_semantics<parallel>, #tpu.dimension_semantics<parallel>, #tpu.dimension_semantics<arbitrary>], iteration_bounds = array<i64: 1, 1, 1>, scalar_prefetch = 0 : i64, scratch_operands = 0 : i64, tpu.core_type = #tpu.core_type<tc>, window_params = [{transform_indices = @transform_0, window_bounds = array<i64: 34, 128>}, {transform_indices = @transform_1, window_bounds = array<i64: 128, 32>}, {transform_indices = @transform_2, window_bounds = array<i64: 1, 32>}, {transform_indices = @transform_3, window_bounds = array<i64: 34, 32>}, {transform_indices = @transform_4, window_bounds = array<i64: 34, 32>}]} {
    %c0 = arith.constant 0 : index
    %c0_0 = arith.constant 0 : index
    %0 = vector.load %arg3[%c0, %c0_0] : memref<34x128xbf16, #tpu.memory_space<vmem>>, vector<34x128xbf16>
    %c0_1 = arith.constant 0 : index
    %c0_2 = arith.constant 0 : index
    %1 = vector.load %arg4[%c0_1, %c0_2] : memref<128x32xbf16, #tpu.memory_space<vmem>>, vector<128x32xbf16>
    %cst = arith.constant dense<0.000000e+00> : vector<34x32xf32>
    %2 = tpu.matmul %0, %1, %cst {dimension_numbers = #tpu.dot_dimension_numbers<[1], [0], [0], [1], [0, 0, 1, 1], [], []>} : vector<34x128xbf16>, vector<128x32xbf16>, vector<34x32xf32> -> vector<34x32xf32>
    %c0_3 = arith.constant 0 : index
    %c0_4 = arith.constant 0 : index
    %3 = vector.load %arg5[%c0_3, %c0_4] : memref<1x32xf32, #tpu.memory_space<vmem>>, vector<1x32xf32>
    %4 = vector.broadcast %3 : vector<1x32xf32> to vector<34x32xf32>
    %5 = arith.addf %2, %4 : vector<34x32xf32>
    %c0_5 = arith.constant 0 : index
    %c0_6 = arith.constant 0 : index
    %6 = vector.load %arg6[%c0_5, %c0_6] : memref<34x32xbf16, #tpu.memory_space<vmem>>, vector<34x32xbf16>
    %7 = arith.extf %6 : vector<34x32xbf16> to vector<34x32xf32>
    %8 = arith.addf %5, %7 : vector<34x32xf32>
    %9 = arith.truncf %8 : vector<34x32xf32> to vector<34x32xbf16>
    %c0_7 = arith.constant 0 : index
    %c0_8 = arith.constant 0 : index
    %10 = vector.load %arg7[%c0_7, %c0_8] : memref<34x32xbf16, #tpu.memory_space<vmem>>, vector<34x32xbf16>
    tpu.vector_store %arg7[%c0_7, %c0_8], %9 {strides = array<i32>} : memref<34x32xbf16, #tpu.memory_space<vmem>>, vector<34x32xbf16>,
    return
  }
  func.func @transform_0(%arg0: i32, %arg1: i32, %arg2: i32) -> (i32, i32) {
    %c0_i32 = arith.constant 0 : i32
    return %arg0, %arg2 : i32, i32
  }
  func.func @transform_1(%arg0: i32, %arg1: i32, %arg2: i32) -> (i32, i32) {
    %c0_i32 = arith.constant 0 : i32
    return %arg2, %arg1 : i32, i32
  }
  func.func @transform_2(%arg0: i32, %arg1: i32, %arg2: i32) -> (i32, i32) {
    %c0_i32 = arith.constant 0 : i32
    %c0_i32_0 = arith.constant 0 : i32
    return %c0_i32, %arg1 : i32, i32
  }
  func.func @transform_3(%arg0: i32, %arg1: i32, %arg2: i32) -> (i32, i32) {
    %c0_i32 = arith.constant 0 : i32
    return %arg0, %arg1 : i32, i32
  }
  func.func @transform_4(%arg0: i32, %arg1: i32, %arg2: i32) -> (i32, i32) {
    %c0_i32 = arith.constant 0 : i32
    return %arg0, %arg1 : i32, i32
  }
}

module attributes {stable_mosaic.version = 11 : i64} {
  func.func @kernel(%arg0: i32, %arg1: i32, %arg2: i32, %arg3: memref<34x32xbf16, #tpu.memory_space<vmem>>, %arg4: memref<1x32xf32, #tpu.memory_space<vmem>>, %arg5: memref<1x32xf32, #tpu.memory_space<vmem>>, %arg6: memref<32x128xbf16, #tpu.memory_space<vmem>>, %arg7: memref<1x128xf32, #tpu.memory_space<vmem>>, %arg8: memref<34x128xbf16, #tpu.memory_space<vmem>>) attributes {dimension_semantics = [#tpu.dimension_semantics<parallel>, #tpu.dimension_semantics<parallel>, #tpu.dimension_semantics<arbitrary>], iteration_bounds = array<i64: 1, 1, 1>, scalar_prefetch = 0 : i64, scratch_operands = 0 : i64, tpu.core_type = #tpu.core_type<tc>, window_params = [{transform_indices = @transform_0, window_bounds = array<i64: 34, 32>}, {pipeline_mode = #tpu.pipeline_mode<synchronous>, transform_indices = @transform_1, window_bounds = array<i64: 1, 32>}, {pipeline_mode = #tpu.pipeline_mode<synchronous>, transform_indices = @transform_2, window_bounds = array<i64: 1, 32>}, {transform_indices = @transform_3, window_bounds = array<i64: 32, 128>}, {transform_indices = @transform_4, window_bounds = array<i64: 1, 128>}, {transform_indices = @transform_5, window_bounds = array<i64: 34, 128>}]} {
    %c0 = arith.constant 0 : index
    %c0_0 = arith.constant 0 : index
    %0 = vector.load %arg3[%c0, %c0_0] : memref<34x32xbf16, #tpu.memory_space<vmem>>, vector<34x32xbf16>
    %1 = arith.extf %0 : vector<34x32xbf16> to vector<34x32xf32>
    %cst = arith.constant dense<0.000000e+00> : vector<34xf32>
    %2 = vector.multi_reduction <add>, %1, %cst [1] : vector<34x32xf32> to vector<34xf32>
    %3 = vector.shape_cast %2 : vector<34xf32> to vector<34x1xf32>
    %cst_1 = arith.constant 3.200000e+01 : f32
    %4 = vector.broadcast %cst_1 : f32 to vector<34x1xf32>
    %5 = arith.divf %3, %4 : vector<34x1xf32>
    %6 = vector.broadcast %5 : vector<34x1xf32> to vector<34x32xf32>
    %7 = arith.subf %1, %6 : vector<34x32xf32>
    %8 = arith.mulf %7, %7 : vector<34x32xf32>
    %cst_2 = arith.constant dense<0.000000e+00> : vector<34xf32>
    %9 = vector.multi_reduction <add>, %8, %cst_2 [1] : vector<34x32xf32> to vector<34xf32>
    %10 = vector.shape_cast %9 : vector<34xf32> to vector<34x1xf32>
    %cst_3 = arith.constant 3.200000e+01 : f32
    %11 = vector.broadcast %cst_3 : f32 to vector<34x1xf32>
    %12 = arith.divf %10, %11 : vector<34x1xf32>
    %cst_4 = arith.constant 9.99999974E-6 : f32
    %13 = vector.broadcast %cst_4 : f32 to vector<34x1xf32>
    %14 = arith.addf %12, %13 : vector<34x1xf32>
    %15 = math.rsqrt %14 : vector<34x1xf32>
    %16 = vector.broadcast %15 : vector<34x1xf32> to vector<34x32xf32>
    %17 = arith.mulf %7, %16 : vector<34x32xf32>
    %c0_5 = arith.constant 0 : index
    %c0_6 = arith.constant 0 : index
    %18 = vector.load %arg4[%c0_5, %c0_6] : memref<1x32xf32, #tpu.memory_space<vmem>>, vector<1x32xf32>
    %19 = vector.broadcast %18 : vector<1x32xf32> to vector<34x32xf32>
    %20 = arith.mulf %17, %19 : vector<34x32xf32>
    %c0_7 = arith.constant 0 : index
    %c0_8 = arith.constant 0 : index
    %21 = vector.load %arg5[%c0_7, %c0_8] : memref<1x32xf32, #tpu.memory_space<vmem>>, vector<1x32xf32>
    %22 = vector.broadcast %21 : vector<1x32xf32> to vector<34x32xf32>
    %23 = arith.addf %20, %22 : vector<34x32xf32>
    %24 = arith.truncf %23 : vector<34x32xf32> to vector<34x32xbf16>
    %c0_9 = arith.constant 0 : index
    %c0_10 = arith.constant 0 : index
    %25 = vector.load %arg6[%c0_9, %c0_10] : memref<32x128xbf16, #tpu.memory_space<vmem>>, vector<32x128xbf16>
    %cst_11 = arith.constant dense<0.000000e+00> : vector<34x128xf32>
    %26 = tpu.matmul %24, %25, %cst_11 {dimension_numbers = #tpu.dot_dimension_numbers<[1], [0], [0], [1], [0, 0, 1, 1], [], []>} : vector<34x32xbf16>, vector<32x128xbf16>, vector<34x128xf32> -> vector<34x128xf32>
    %c0_12 = arith.constant 0 : index
    %c0_13 = arith.constant 0 : index
    %27 = vector.load %arg7[%c0_12, %c0_13] : memref<1x128xf32, #tpu.memory_space<vmem>>, vector<1x128xf32>
    %28 = vector.broadcast %27 : vector<1x128xf32> to vector<34x128xf32>
    %29 = arith.addf %26, %28 : vector<34x128xf32>
    %cst_14 = arith.constant 1.702000e+00 : f32
    %30 = vector.broadcast %cst_14 : f32 to vector<34x128xf32>
    %31 = arith.mulf %30, %29 : vector<34x128xf32>
    %32 = arith.negf %31 : vector<34x128xf32>
    %33 = math.exp %32 : vector<34x128xf32>
    %cst_15 = arith.constant 1.000000e+00 : f32
    %34 = vector.broadcast %cst_15 : f32 to vector<34x128xf32>
    %35 = arith.addf %34, %33 : vector<34x128xf32>
    %36 = arith.divf %34, %35 : vector<34x128xf32>
    %37 = arith.mulf %29, %36 : vector<34x128xf32>
    %38 = arith.truncf %37 : vector<34x128xf32> to vector<34x128xbf16>
    %c0_16 = arith.constant 0 : index
    %c0_17 = arith.constant 0 : index
    %39 = vector.load %arg8[%c0_16, %c0_17] : memref<34x128xbf16, #tpu.memory_space<vmem>>, vector<34x128xbf16>
    tpu.vector_store %arg8[%c0_16, %c0_17], %38 {strides = array<i32>} : memref<34x128xbf16, #tpu.memory_space<vmem>>, vector<34x128xbf16>,
    return
  }
  func.func @transform_0(%arg0: i32, %arg1: i32, %arg2: i32) -> (i32, i32) {
    %c0_i32 = arith.constant 0 : i32
    return %arg0, %arg2 : i32, i32
  }
  func.func @transform_1(%arg0: i32, %arg1: i32, %arg2: i32) -> (i32, i32) {
    %c0_i32 = arith.constant 0 : i32
    %c0_i32_0 = arith.constant 0 : i32
    %c0_i32_1 = arith.constant 0 : i32
    return %c0_i32, %c0_i32_0 : i32, i32
  }
  func.func @transform_2(%arg0: i32, %arg1: i32, %arg2: i32) -> (i32, i32) {
    %c0_i32 = arith.constant 0 : i32
    %c0_i32_0 = arith.constant 0 : i32
    %c0_i32_1 = arith.constant 0 : i32
    return %c0_i32, %c0_i32_0 : i32, i32
  }
  func.func @transform_3(%arg0: i32, %arg1: i32, %arg2: i32) -> (i32, i32) {
    %c0_i32 = arith.constant 0 : i32
    return %arg2, %arg1 : i32, i32
  }
  func.func @transform_4(%arg0: i32, %arg1: i32, %arg2: i32) -> (i32, i32) {
    %c0_i32 = arith.constant 0 : i32
    %c0_i32_0 = arith.constant 0 : i32
    return %c0_i32, %arg1 : i32, i32
  }
  func.func @transform_5(%arg0: i32, %arg1: i32, %arg2: i32) -> (i32, i32) {
    %c0_i32 = arith.constant 0 : i32
    return %arg0, %arg1 : i32, i32
  }
}

module attributes {stable_mosaic.version = 11 : i64} {
  func.func @kernel(%arg0: i32, %arg1: i32, %arg2: i32, %arg3: memref<34x32xbf16, #tpu.memory_space<vmem>>, %arg4: memref<1x32xf32, #tpu.memory_space<vmem>>, %arg5: memref<1x32xf32, #tpu.memory_space<vmem>>, %arg6: memref<32x32xbf16, #tpu.memory_space<vmem>>, %arg7: memref<1x32xf32, #tpu.memory_space<vmem>>, %arg8: memref<34x32xbf16, #tpu.memory_space<vmem>>) attributes {dimension_semantics = [#tpu.dimension_semantics<parallel>, #tpu.dimension_semantics<parallel>, #tpu.dimension_semantics<arbitrary>], iteration_bounds = array<i64: 1, 1, 1>, scalar_prefetch = 0 : i64, scratch_operands = 0 : i64, tpu.core_type = #tpu.core_type<tc>, window_params = [{transform_indices = @transform_0, window_bounds = array<i64: 34, 32>}, {pipeline_mode = #tpu.pipeline_mode<synchronous>, transform_indices = @transform_1, window_bounds = array<i64: 1, 32>}, {pipeline_mode = #tpu.pipeline_mode<synchronous>, transform_indices = @transform_2, window_bounds = array<i64: 1, 32>}, {transform_indices = @transform_3, window_bounds = array<i64: 32, 32>}, {transform_indices = @transform_4, window_bounds = array<i64: 1, 32>}, {transform_indices = @transform_5, window_bounds = array<i64: 34, 32>}]} {
    %c0 = arith.constant 0 : index
    %c0_0 = arith.constant 0 : index
    %0 = vector.load %arg3[%c0, %c0_0] : memref<34x32xbf16, #tpu.memory_space<vmem>>, vector<34x32xbf16>
    %1 = arith.extf %0 : vector<34x32xbf16> to vector<34x32xf32>
    %cst = arith.constant dense<0.000000e+00> : vector<34xf32>
    %2 = vector.multi_reduction <add>, %1, %cst [1] : vector<34x32xf32> to vector<34xf32>
    %3 = vector.shape_cast %2 : vector<34xf32> to vector<34x1xf32>
    %cst_1 = arith.constant 3.200000e+01 : f32
    %4 = vector.broadcast %cst_1 : f32 to vector<34x1xf32>
    %5 = arith.divf %3, %4 : vector<34x1xf32>
    %6 = vector.broadcast %5 : vector<34x1xf32> to vector<34x32xf32>
    %7 = arith.subf %1, %6 : vector<34x32xf32>
    %8 = arith.mulf %7, %7 : vector<34x32xf32>
    %cst_2 = arith.constant dense<0.000000e+00> : vector<34xf32>
    %9 = vector.multi_reduction <add>, %8, %cst_2 [1] : vector<34x32xf32> to vector<34xf32>
    %10 = vector.shape_cast %9 : vector<34xf32> to vector<34x1xf32>
    %cst_3 = arith.constant 3.200000e+01 : f32
    %11 = vector.broadcast %cst_3 : f32 to vector<34x1xf32>
    %12 = arith.divf %10, %11 : vector<34x1xf32>
    %cst_4 = arith.constant 9.99999974E-6 : f32
    %13 = vector.broadcast %cst_4 : f32 to vector<34x1xf32>
    %14 = arith.addf %12, %13 : vector<34x1xf32>
    %15 = math.rsqrt %14 : vector<34x1xf32>
    %16 = vector.broadcast %15 : vector<34x1xf32> to vector<34x32xf32>
    %17 = arith.mulf %7, %16 : vector<34x32xf32>
    %c0_5 = arith.constant 0 : index
    %c0_6 = arith.constant 0 : index
    %18 = vector.load %arg4[%c0_5, %c0_6] : memref<1x32xf32, #tpu.memory_space<vmem>>, vector<1x32xf32>
    %19 = vector.broadcast %18 : vector<1x32xf32> to vector<34x32xf32>
    %20 = arith.mulf %17, %19 : vector<34x32xf32>
    %c0_7 = arith.constant 0 : index
    %c0_8 = arith.constant 0 : index
    %21 = vector.load %arg5[%c0_7, %c0_8] : memref<1x32xf32, #tpu.memory_space<vmem>>, vector<1x32xf32>
    %22 = vector.broadcast %21 : vector<1x32xf32> to vector<34x32xf32>
    %23 = arith.addf %20, %22 : vector<34x32xf32>
    %24 = arith.truncf %23 : vector<34x32xf32> to vector<34x32xbf16>
    %c0_9 = arith.constant 0 : index
    %c0_10 = arith.constant 0 : index
    %25 = vector.load %arg6[%c0_9, %c0_10] : memref<32x32xbf16, #tpu.memory_space<vmem>>, vector<32x32xbf16>
    %cst_11 = arith.constant dense<0.000000e+00> : vector<34x32xf32>
    %26 = tpu.matmul %24, %25, %cst_11 {dimension_numbers = #tpu.dot_dimension_numbers<[1], [0], [0], [1], [0, 0, 1, 1], [], []>} : vector<34x32xbf16>, vector<32x32xbf16>, vector<34x32xf32> -> vector<34x32xf32>
    %c0_12 = arith.constant 0 : index
    %c0_13 = arith.constant 0 : index
    %27 = vector.load %arg7[%c0_12, %c0_13] : memref<1x32xf32, #tpu.memory_space<vmem>>, vector<1x32xf32>
    %28 = vector.broadcast %27 : vector<1x32xf32> to vector<34x32xf32>
    %29 = arith.addf %26, %28 : vector<34x32xf32>
    %30 = arith.truncf %29 : vector<34x32xf32> to vector<34x32xbf16>
    %c0_14 = arith.constant 0 : index
    %c0_15 = arith.constant 0 : index
    %31 = vector.load %arg8[%c0_14, %c0_15] : memref<34x32xbf16, #tpu.memory_space<vmem>>, vector<34x32xbf16>
    tpu.vector_store %arg8[%c0_14, %c0_15], %30 {strides = array<i32>} : memref<34x32xbf16, #tpu.memory_space<vmem>>, vector<34x32xbf16>,
    return
  }
  func.func @transform_0(%arg0: i32, %arg1: i32, %arg2: i32) -> (i32, i32) {
    %c0_i32 = arith.constant 0 : i32
    return %arg0, %arg2 : i32, i32
  }
  func.func @transform_1(%arg0: i32, %arg1: i32, %arg2: i32) -> (i32, i32) {
    %c0_i32 = arith.constant 0 : i32
    %c0_i32_0 = arith.constant 0 : i32
    %c0_i32_1 = arith.constant 0 : i32
    return %c0_i32, %c0_i32_0 : i32, i32
  }
  func.func @transform_2(%arg0: i32, %arg1: i32, %arg2: i32) -> (i32, i32) {
    %c0_i32 = arith.constant 0 : i32
    %c0_i32_0 = arith.constant 0 : i32
    %c0_i32_1 = arith.constant 0 : i32
    return %c0_i32, %c0_i32_0 : i32, i32
  }
  func.func @transform_3(%arg0: i32, %arg1: i32, %arg2: i32) -> (i32, i32) {
    %c0_i32 = arith.constant 0 : i32
    return %arg2, %arg1 : i32, i32
  }
  func.func @transform_4(%arg0: i32, %arg1: i32, %arg2: i32) -> (i32, i32) {
    %c0_i32 = arith.constant 0 : i32
    %c0_i32_0 = arith.constant 0 : i32
    return %c0_i32, %arg1 : i32, i32
  }
  func.func @transform_5(%arg0: i32, %arg1: i32, %arg2: i32) -> (i32, i32) {
    %c0_i32 = arith.constant 0 : i32
    return %arg0, %arg1 : i32, i32
  }
}

module attributes {stable_mosaic.version = 11 : i64} {
  func.func @kernel(%arg0: i32, %arg1: i32, %arg2: i32, %arg3: memref<34x32xbf16, #tpu.memory_space<vmem>>, %arg4: memref<1x32xf32, #tpu.memory_space<vmem>>, %arg5: memref<1x32xf32, #tpu.memory_space<vmem>>, %arg6: memref<32x32xbf16, #tpu.memory_space<vmem>>, %arg7: memref<34x32xf32, #tpu.memory_space<vmem>>) attributes {dimension_semantics = [#tpu.dimension_semantics<parallel>, #tpu.dimension_semantics<parallel>, #tpu.dimension_semantics<arbitrary>], iteration_bounds = array<i64: 1, 1, 1>, scalar_prefetch = 0 : i64, scratch_operands = 0 : i64, tpu.core_type = #tpu.core_type<tc>, window_params = [{transform_indices = @transform_0, window_bounds = array<i64: 34, 32>}, {pipeline_mode = #tpu.pipeline_mode<synchronous>, transform_indices = @transform_1, window_bounds = array<i64: 1, 32>}, {pipeline_mode = #tpu.pipeline_mode<synchronous>, transform_indices = @transform_2, window_bounds = array<i64: 1, 32>}, {transform_indices = @transform_3, window_bounds = array<i64: 32, 32>}, {transform_indices = @transform_4, window_bounds = array<i64: 34, 32>}]} {
    %c0 = arith.constant 0 : index
    %c0_0 = arith.constant 0 : index
    %0 = vector.load %arg3[%c0, %c0_0] : memref<34x32xbf16, #tpu.memory_space<vmem>>, vector<34x32xbf16>
    %1 = arith.extf %0 : vector<34x32xbf16> to vector<34x32xf32>
    %cst = arith.constant dense<0.000000e+00> : vector<34xf32>
    %2 = vector.multi_reduction <add>, %1, %cst [1] : vector<34x32xf32> to vector<34xf32>
    %3 = vector.shape_cast %2 : vector<34xf32> to vector<34x1xf32>
    %cst_1 = arith.constant 3.200000e+01 : f32
    %4 = vector.broadcast %cst_1 : f32 to vector<34x1xf32>
    %5 = arith.divf %3, %4 : vector<34x1xf32>
    %6 = vector.broadcast %5 : vector<34x1xf32> to vector<34x32xf32>
    %7 = arith.subf %1, %6 : vector<34x32xf32>
    %8 = arith.mulf %7, %7 : vector<34x32xf32>
    %cst_2 = arith.constant dense<0.000000e+00> : vector<34xf32>
    %9 = vector.multi_reduction <add>, %8, %cst_2 [1] : vector<34x32xf32> to vector<34xf32>
    %10 = vector.shape_cast %9 : vector<34xf32> to vector<34x1xf32>
    %cst_3 = arith.constant 3.200000e+01 : f32
    %11 = vector.broadcast %cst_3 : f32 to vector<34x1xf32>
    %12 = arith.divf %10, %11 : vector<34x1xf32>
    %cst_4 = arith.constant 9.99999974E-6 : f32
    %13 = vector.broadcast %cst_4 : f32 to vector<34x1xf32>
    %14 = arith.addf %12, %13 : vector<34x1xf32>
    %15 = math.rsqrt %14 : vector<34x1xf32>
    %16 = vector.broadcast %15 : vector<34x1xf32> to vector<34x32xf32>
    %17 = arith.mulf %7, %16 : vector<34x32xf32>
    %c0_5 = arith.constant 0 : index
    %c0_6 = arith.constant 0 : index
    %18 = vector.load %arg4[%c0_5, %c0_6] : memref<1x32xf32, #tpu.memory_space<vmem>>, vector<1x32xf32>
    %19 = vector.broadcast %18 : vector<1x32xf32> to vector<34x32xf32>
    %20 = arith.mulf %17, %19 : vector<34x32xf32>
    %c0_7 = arith.constant 0 : index
    %c0_8 = arith.constant 0 : index
    %21 = vector.load %arg5[%c0_7, %c0_8] : memref<1x32xf32, #tpu.memory_space<vmem>>, vector<1x32xf32>
    %22 = vector.broadcast %21 : vector<1x32xf32> to vector<34x32xf32>
    %23 = arith.addf %20, %22 : vector<34x32xf32>
    %24 = arith.truncf %23 : vector<34x32xf32> to vector<34x32xbf16>
    %c0_9 = arith.constant 0 : index
    %c0_10 = arith.constant 0 : index
    %25 = vector.load %arg6[%c0_9, %c0_10] : memref<32x32xbf16, #tpu.memory_space<vmem>>, vector<32x32xbf16>
    %cst_11 = arith.constant dense<0.000000e+00> : vector<34x32xf32>
    %26 = tpu.matmul %24, %25, %cst_11 {dimension_numbers = #tpu.dot_dimension_numbers<[1], [0], [0], [1], [0, 0, 1, 1], [], []>} : vector<34x32xbf16>, vector<32x32xbf16>, vector<34x32xf32> -> vector<34x32xf32>
    %c0_12 = arith.constant 0 : index
    %c0_13 = arith.constant 0 : index
    %27 = vector.load %arg7[%c0_12, %c0_13] : memref<34x32xf32, #tpu.memory_space<vmem>>, vector<34x32xf32>
    tpu.vector_store %arg7[%c0_12, %c0_13], %26 {strides = array<i32>} : memref<34x32xf32, #tpu.memory_space<vmem>>, vector<34x32xf32>,
    return
  }
  func.func @transform_0(%arg0: i32, %arg1: i32, %arg2: i32) -> (i32, i32) {
    %c0_i32 = arith.constant 0 : i32
    return %arg0, %arg2 : i32, i32
  }
  func.func @transform_1(%arg0: i32, %arg1: i32, %arg2: i32) -> (i32, i32) {
    %c0_i32 = arith.constant 0 : i32
    %c0_i32_0 = arith.constant 0 : i32
    %c0_i32_1 = arith.constant 0 : i32
    return %c0_i32, %c0_i32_0 : i32, i32
  }
  func.func @transform_2(%arg0: i32, %arg1: i32, %arg2: i32) -> (i32, i32) {
    %c0_i32 = arith.constant 0 : i32
    %c0_i32_0 = arith.constant 0 : i32
    %c0_i32_1 = arith.constant 0 : i32
    return %c0_i32, %c0_i32_0 : i32, i32
  }
  func.func @transform_3(%arg0: i32, %arg1: i32, %arg2: i32) -> (i32, i32) {
    %c0_i32 = arith.constant 0 : i32
    return %arg2, %arg1 : i32, i32
  }
  func.func @transform_4(%arg0: i32, %arg1: i32, %arg2: i32) -> (i32, i32) {
    %c0_i32 = arith.constant 0 : i32
    return %arg0, %arg1 : i32, i32
  }
}

</mosaic_0001>

<bundles_post_ra>
// kernel: maskclip_backbone_forward.19
= control target key start
LH: loop header
LB: loop body
LE: loop exit
PB: predicated region body
PF: predicated region fallthrough
CT: control target
= control target key end

     0   :  { %vm31_vm0 = vcmask 261120   ;;  %vm44_vm1 = vcmask 254976   ;;  %v312_v39 = vmov 0.0   ;;  %vm313_vm2 = vmmov 0   ;;  %s418_s0 = inlined_call_operand.vmem [shape: bf16[34,32], index: 0, kind: input, shape index: {}]   ;;  %s419_s3 = inlined_call_operand.vmem [shape: bf16[32,96], index: 3, kind: input, shape index: {}]   ;;  %s420_s1 = inlined_call_operand.vmem [shape: f32[1,32], index: 1, kind: input, shape index: {}]   ;;  %s421_s2 = inlined_call_operand.vmem [shape: f32[1,32], index: 2, kind: input, shape index: {}]   ;;  %s422_s4 = inlined_call_operand.vmem [shape: f32[1,96], index: 4, kind: input, shape index: {}]   ;;  %s423_s5 = inlined_call_operand.vmem [shape: bf16[34,96], index: 5, kind: output, shape index: {}]  }
   0x1   :  { %v272_v0 = vld [vmem:[%s418_s0 + $0x8] sm:$0xff]   ;;  %v265_v1 = vld [vmem:[%s418_s0] sm:$0xff]   ;;  %v25_v5 = vld [vmem:[%s418_s0 + $0x10] sm:$0x1]  ;;  %294 = vmatprep.subr.bf16.mxu1 %v312_v39  ;;  %278 = vmatprep.subr.bf16.mxu0 %v312_v39  ;;  %vm235_vm3 = vcmask 781312   ;;  %vm240_vm4 = vcmask 778240  }
   0x2   :  { %v270_v2 = vunpack.c.l.bf16 %v272_v0  ;;  %v271_v3 = vunpack.c.h.bf16 %v272_v0  ;;  %v266_v4 = vunpack.c.l.bf16 %v265_v1  ;;  %v267_v6 = vunpack.c.h.bf16 %v265_v1  ;;  %v300_v38 = vld [vmem:[%s419_s3] sm:$0xff]   ;;  %v301_v40 = vld [vmem:[%s419_s3 + $0x8] sm:$0xff]   ;;  %286 = vmatprep.mubr.msk.bf16.mxu1 %vm313_vm2, %v312_v39  ;;  %282 = vmatprep.mubr.msk.bf16.mxu0 %vm313_vm2, %v312_v39 }
   0x3   :  { %v30_v10 = vunpack.c.l.bf16 %v25_v5  ;;  %296 = vmatpush3.bf16.msra.mxu1 %v300_v38  ;;  %279 = vmatpush3.bf16.msra.mxu0 %v300_v38  ;;  %v246_v58 = vld [vmem:[%s420_s1] ss:$0 sm:$0xff] }
   0x4   :  { %v38_v7 = vsel %vm31_vm0, %v270_v2, 0.0  ;;  %v32_v8 = vsel %vm31_vm0, %v266_v4, 0.0  ;;  %v41_v9 = vsel %vm31_vm0, %v271_v3, 0.0  ;;  %v35_v11 = vsel %vm31_vm0, %v267_v6, 0.0  ;;  %295 = vmatprep.subr.bf16.mxu1 %v312_v39  ;;  %280 = vmatprep.subr.bf16.mxu0 %v312_v39  ;;  %v247_v0 = vld [vmem:[%s421_s2] ss:$0 sm:$0xff] }
   0x5   :  { %39 = vadd.xlane.f32.xlu0 %v38_v7  ;;  %33 = vadd.xlane.f32.xlu1 %v32_v8  ;;  %v45_v12 = vsel %vm44_vm1, %v30_v10, 0.0 }
   0x7   :  { %297 = vmatpush3.bf16.msra.mxu1 %v301_v40  ;;  %281 = vmatpush3.bf16.msra.mxu0 %v301_v40 }
   0x9   :  { %42 = vadd.xlane.f32.xlu0 %v41_v9  ;;  %36 = vadd.xlane.f32.xlu1 %v35_v11 }
   0xd   :  { %46 = vadd.xlane.f32.xlu0 %v45_v12 }
  0x92   :  { %v40_v13 = vpop.xlane.xlu0 %39  ;;  %v34_v14 = vpop.xlane.xlu1 %33 }
  0x93   :  { %v51_v15 = vmul.f32 0.03125, %v40_v13  ;;  %v49_v16 = vmul.f32 0.03125, %v34_v14 }
  0x95   :  { %v358_v17 = vsub.f32 %v270_v2, %v51_v15  ;;  %v360_v18 = vsub.f32 %v266_v4, %v49_v16 }
  0x96   :  { %v43_v19 = vpop.xlane.xlu0 %42  ;;  %v37_v20 = vpop.xlane.xlu1 %36 }
  0x97   :  { %v52_v21 = vmul.f32 0.03125, %v43_v19  ;;  %v61_v22 = vmul.f32 %v358_v17, %v358_v17  ;;  %v50_v23 = vmul.f32 0.03125, %v37_v20  ;;  %v59_v24 = vmul.f32 %v360_v18, %v360_v18 }
  0x99   :  { %v57_v25 = vsub.f32 %v271_v3, %v52_v21  ;;  %v70_v26 = vsel %vm31_vm0, %v61_v22, 0.0  ;;  %v367_v27 = vsub.f32 %v267_v6, %v50_v23  ;;  %v64_v31 = vsel %vm31_vm0, %v59_v24, 0.0 }
  0x9a   :  { %v47_v28 = vpop.xlane.xlu0 %46  ;;  %71 = vadd.xlane.f32.xlu1 %v70_v26 }
  0x9b   :  { %v53_v29 = vmul.f32 0.03125, %v47_v28  ;;  %v62_v30 = vmul.f32 %v57_v25, %v57_v25  ;;  %v60_v32 = vmul.f32 %v367_v27, %v367_v27 }
  0x9d   :  { %v58_v33 = vsub.f32 %v30_v10, %v53_v29  ;;  %v73_v34 = vsel %vm31_vm0, %v62_v30, 0.0  ;;  %v67_v36 = vsel %vm31_vm0, %v60_v32, 0.0 }
  0x9e   :  { %74 = vadd.xlane.f32.xlu0 %v73_v34  ;;  %65 = vadd.xlane.f32.xlu1 %v64_v31 }
  0x9f   :  { %v63_v35 = vmul.f32 %v58_v33, %v58_v33 }
  0xa1   :  { %v76_v37 = vsel %vm44_vm1, %v63_v35, 0.0 }
  0xa2   :  { %77 = vadd.xlane.f32.xlu1 %v76_v37  ;;  %68 = vadd.xlane.f32.xlu0 %v67_v36 }
 0x127   :  { %v72_v41 = vpop.xlane.xlu1 %71 }
 0x128   :  { %v81_v42 = vmul.f32 0.03125, %v72_v41 }
 0x12a   :  { %v86_v43 = vadd.f32 1e-05, %v81_v42 }
 0x12b   :  { %v75_v44 = vpop.xlane.xlu0 %74  ;;  %v66_v45 = vpop.xlane.xlu1 %65 }
 0x12c   :  { %302 = vrsqrt.f32 %v86_v43  ;;  %v82_v46 = vmul.f32 0.03125, %v75_v44  ;;  %v79_v47 = vmul.f32 0.03125, %v66_v45 }
 0x12e   :  { %v87_v48 = vadd.f32 1e-05, %v82_v46  ;;  %v84_v49 = vadd.f32 1e-05, %v79_v47 }
 0x12f   :  { %v69_v50 = vpop.xlane.xlu0 %68  ;;  %v78_v51 = vpop.xlane.xlu1 %77 }
 0x130   :  { %304 = vrsqrt.f32 %v87_v48  ;;  %v80_v52 = vmul.f32 0.03125, %v69_v50  ;;  %v83_v53 = vmul.f32 0.03125, %v78_v51 }
 0x131   :  { %306 = vrsqrt.f32 %v84_v49 }
 0x132   :  { %v85_v54 = vadd.f32 1e-05, %v80_v52  ;;  %v88_v55 = vadd.f32 1e-05, %v83_v53 }
 0x134   :  { %308 = vrsqrt.f32 %v85_v54 }
 0x135   :  { %310 = vrsqrt.f32 %v88_v55 }
 0x136   :  { %v303_v56 = vpop.eup %302 }
 0x137   :  { %v96_v57 = vmul.f32 %v303_v56, %v358_v17  ;;  %v248_v17 = vld [vmem:[%s422_s4] ss:$0 sm:$0xff] }
 0x139   :  { %v108_v62 = vmul.f32 %v246_v58, %v96_v57 }
 0x13a   :  { %v305_v59 = vpop.eup %304 }
 0x13b   :  { %v307_v60 = vpop.eup %306  ;;  %v97_v61 = vmul.f32 %v305_v59, %v57_v25  ;;  %v120_v5 = vadd.f32 %v247_v0, %v108_v62 }
 0x13c   :  { %v94_v63 = vmul.f32 %v307_v60, %v360_v18 }
 0x13d   :  { %v109_v1 = vmul.f32 %v246_v58, %v97_v61 }
 0x13e   :  { %v309_v2 = vpop.eup %308  ;;  %v106_v7 = vmul.f32 %v246_v58, %v94_v63 }
 0x13f   :  { %v311_v3 = vpop.eup %310  ;;  %v95_v4 = vmul.f32 %v309_v2, %v367_v27  ;;  %v121_v6 = vadd.f32 %v247_v0, %v109_v1 }
 0x140   :  { %v98_v8 = vmul.f32 %v311_v3, %v58_v33  ;;  %v118_v12 = vadd.f32 %v247_v0, %v106_v7 }
 0x141   :  { %v124_v9 = vpack.c.bf16 %v121_v6, %v120_v5  ;;  %v107_v10 = vmul.f32 %v246_v58, %v95_v4 }
 0x142   :  { %v110_v11 = vmul.f32 %v246_v58, %v98_v8 }
 0x143   :  { %287 = vmatmul.mubr.msk.bf16.vlgmr.msra.gmra.mrb[0].mxu1 %vm31_vm0, %v124_v9  ;;  %v119_v13 = vadd.f32 %v247_v0, %v107_v10 }
 0x144   :  { %290 = vmatprep.mubr.msk.bf16.mxu1 %vm313_vm2, %v312_v39  ;;  %v122_v15 = vadd.f32 %v247_v0, %v110_v11 }
 0x145   :  { %v123_v14 = vpack.c.bf16 %v119_v13, %v118_v12 }
 0x146   :  { %v125_v16 = vpack.c.bf16 %v122_v15, %v122_v15 }
 0x147   :  { %283 = vmatmul.mubr.msk.bf16.vlgmr.msra.gmra.mrb[0].mxu0 %vm31_vm0, %v123_v14 }
 0x14b   :  { %291 = vmatmul.mubr.msk.bf16.gmra.mrb[4].mxu1 %vm31_vm0, %v125_v16 }
 0x216   :  { %v200_v18 = vpop.f32.mrb[0].mxu1 }
 0x217   :  { %v201_v19 = vadd.f32 %v248_v17, %v200_v18  ;;  %v288_v20 = vpop.f32.mrb[1].mxu1 }
 0x218   :  { %v203_v21 = vpop.f32.mrb[2].mxu1 }
 0x219   :  { %v261_v22 = vpack.c.bf16 %v201_v19, %v201_v19  ;;  %v204_v23 = vadd.f32 %v248_v17, %v203_v21  ;;  %v289_v24 = vpop.f32.mrb[3].mxu1 }
 0x21a   :  { %v192_v25 = vpop.f32.mrb[0].mxu0 }
 0x21b   :  { %238 = vst.msk [vmem:[%s423_s5 + $0x8] sm:$0xf] %vm235_vm3, %v261_v22  ;;  %v262_v26 = vpack.c.bf16 %v204_v23, %v204_v23  ;;  %v193_v27 = vadd.f32 %v248_v17, %v192_v25  ;;  %v284_v28 = vpop.f32.mrb[1].mxu0 }
 0x21c   :  { %v195_v29 = vpop.f32.mrb[2].mxu0 }
 0x21d   :  { %239 = vst.msk [vmem:[%s423_s5 + $0xc] sm:$0xf] %vm235_vm3, %v262_v26  ;;  %v259_v30 = vpack.c.bf16 %v193_v27, %v193_v27  ;;  %v196_v31 = vadd.f32 %v248_v17, %v195_v29  ;;  %v285_v32 = vpop.f32.mrb[3].mxu0 }
 0x21e   :  { %v208_v33 = vpop.f32.mrb[4].mxu1 }
 0x21f   :  { %236 = vst.msk [vmem:[%s423_s5] sm:$0xf] %vm235_vm3, %v259_v30  ;;  %v260_v34 = vpack.c.bf16 %v196_v31, %v196_v31  ;;  %v209_v35 = vadd.f32 %v248_v17, %v208_v33  ;;  %v292_v36 = vpop.f32.mrb[5].mxu1 }
 0x220   :  { %v211_v37 = vpop.f32.mrb[6].mxu1 }
 0x221   :  { %237 = vst.msk [vmem:[%s423_s5 + $0x4] sm:$0xf] %vm235_vm3, %v260_v34  ;;  %v263_v38 = vpack.c.bf16 %v209_v35, %v209_v35  ;;  %v293_v39 = vpop.f32.mrb[7].mxu1 }
 0x223   :  { %241 = vst.msk [vmem:[%s423_s5 + $0x10] sm:$0x1] %vm240_vm4, %v263_v38 }

// kernel: maskclip_backbone_forward.17
= control target key start
LH: loop header
LB: loop body
LE: loop exit
PB: predicated region body
PF: predicated region fallthrough
CT: control target
= control target key end

     0   :  { %vm42_vm0 = vcmask 392192   ;;  %vm114_vm1 = vcmask 257024   ;;  %s202_s1 = inlined_call_operand.vmem [shape: bf16[48,32], index: 1, kind: input, shape index: {}]   ;;  %s203_s0 = inlined_call_operand.vmem [shape: f32[32,48], index: 0, kind: input, shape index: {}]   ;;  %s204_s2 = inlined_call_operand.vmem [shape: bf16[32,32], index: 2, kind: output, shape index: {}]  }
   0x1   :  { %v151_v0 = vld [vmem:[%s202_s1] sm:$0xff]   ;;  %v152_v1 = vld [vmem:[%s202_s1 + $0x8] sm:$0xff]   ;;  %v153_v4 = vld [vmem:[%s202_s1 + $0x10] sm:$0xff]  }
   0x2   :  { %141 = vmatprep.subr.bf16.mxu0 %v151_v0  ;;  %v12_v2 = vld [vmem:[%s203_s0] sm:$0xff]  ;;  %v13_v3 = vld [vmem:[%s203_s0 + $0x8] sm:$0xff]  ;;  %v14_v6 = vld [vmem:[%s203_s0 + $0x10] sm:$0xff] }
   0x3   :  { %142 = vmatpush3.bf16.msra.mxu0 %v151_v0  ;;  %v16_v5 = vpack.c.bf16 %v13_v3, %v12_v2  ;;  %v15_v7 = vld [vmem:[%s203_s0 + $0x18] sm:$0xff] }
   0x4   :  { %143 = vmatprep.subr.bf16.mxu0 %v152_v1  ;;  %v17_v8 = vpack.c.bf16 %v15_v7, %v14_v6 }
   0x5   :  { %147 = vmatprep.mubr.msk.bf16.mxu0 %vm42_vm0, %v16_v5 }
   0x7   :  { %144 = vmatpush3.bf16.msra.mxu0 %v152_v1 }
   0x8   :  { %145 = vmatprep.subr.bf16.mxu0 %v153_v4 }
   0xb   :  { %146 = vmatpush3.bf16.msra.mxu0 %v153_v4 }
   0xe   :  { %148 = vmatmul.mubr.msk.bf16.vlgmr.msra.gmra.mrb[0].mxu0 %vm42_vm0, %v17_v8 }
  0xe1   :  { %v149_v9 = vpop.f32.mrb[0].mxu0 }
  0xe2   :  { %v134_v10 = vpack.c.bf16 %v149_v9, %v149_v9  ;;  %v83_v11 = vpop.f32.mrb[1].mxu0 }
  0xe3   :  { %v132_v12 = vpack.c.bf16 %v83_v11, %v83_v11  ;;  %v150_v13 = vpop.f32.mrb[2].mxu0 }
  0xe4   :  { %117 = vst.msk [vmem:[%s204_s2 + $0x8] sm:$0xf] %vm114_vm1, %v134_v10  ;;  %v135_v14 = vpack.c.bf16 %v150_v13, %v150_v13  ;;  %v86_v15 = vpop.f32.mrb[3].mxu0 }
  0xe5   :  { %115 = vst.msk [vmem:[%s204_s2] sm:$0xf] %vm114_vm1, %v132_v12  ;;  %v133_v16 = vpack.c.bf16 %v86_v15, %v86_v15 }
  0xe6   :  { %118 = vst.msk [vmem:[%s204_s2 + $0xc] sm:$0xf] %vm114_vm1, %v135_v14 }
  0xe7   :  { %116 = vst.msk [vmem:[%s204_s2 + $0x4] sm:$0xf] %vm114_vm1, %v133_v16 }

// kernel: maskclip_backbone_forward.18
= control target key start
LH: loop header
LB: loop body
LE: loop exit
PB: predicated region body
PF: predicated region fallthrough
CT: control target
= control target key end

     0   :  { %s418_s15 = smov 0   ;;  %s464_s0 = inlined_call_operand.vmem [shape: bf16[2,17,32], index: 0, kind: input, shape index: {}]   ;;  %s465_s1 = inlined_call_operand.vmem [shape: f32[17,32], index: 1, kind: input, shape index: {}]   ;;  %s466_s2 = inlined_call_operand.vmem [shape: f32[1,32], index: 2, kind: input, shape index: {}]   ;;  %s467_s3 = inlined_call_operand.vmem [shape: f32[1,32], index: 3, kind: input, shape index: {}]   ;;  %s468_s4 = inlined_call_operand.vmem [shape: bf16[2,17,32], index: 4, kind: output, shape index: {}]  }
   0x1 LB: > { %s349_s16 = sadd.s32 4294967295, %s391_s15   ;;  %p353_p0 = scmp.ge.s32.totalorder %s391_s15, 1  ;;  %s391_s15 = sphi %s418_s15, %s14_s15  }
   0x2   : > { %p162_p1 = scmp.lt.s32.totalorder %s391_s15, 3 }
   0x4   : > { %p163_p2 = pnand %p353_p0, %p162_p1 }
   0x5   : > { %p188_p3 = scmp.lt.s32.totalorder (!%p163_p2), %s349_s16, 1  ;;  %v206_v0 = vld [vmem:[%s465_s1 + $0x10] sm:$0x1] (!%p163_p2)  ;;  %v205_v1 = vld [vmem:[%s465_s1 + $0x8] sm:$0xff] (!%p163_p2)  ;;  %v204_v4 = vld [vmem:[%s465_s1] sm:$0xff] (!%p163_p2)  ;;  %vm217_vm0 = vcmask (!%p163_p2), 253952  }
   0x6   : > { %166 = sbr.rel (%p163_p2) target bundleno = 343 (0x157), region = 36  ;;  %vm210_vm1 = vcmask (!%p163_p2), 261120   ;;  %v356_v39 = vld [vmem:[%s466_s2] ss:$0 sm:$0xff] (!%p163_p2)  ;;  %vm289_vm2 = vsmask.f32 (!%p163_p2), 256 }
   0x7   : > { %v357_v41 = vld [vmem:[%s467_s3] ss:$0 sm:$0xff] (!%p163_p2)  ;;  %vm290_vm3 = vmand (!%p163_p2), %vm217_vm0, %vm289_vm2  ;;  %vm285_vm4 = vcmask (!%p163_p2), 257024  }
   0xd   : > { %s470_s16 = smov (!%p188_p3, %s349_s16), 1 }
   0xe   : > { %s370_s17 = smul.u32 12, %s470_s16 }
  0x10   : > { %s192_s20 = scalar_lea.vmem %s464_s0, %s370_s17  ;;  %s197_s7 = scalar_lea.vmem %s468_s4, %s370_s17 }
  0x11   : > { %v200_v2 = vld [vmem:[%s192_s20 + $0x8] sm:$0x1]  ;;  %v367_v3 = vld [vmem:[%s192_s20] sm:$0xff]  }
  0x12   : > { %v203_v5 = vunpack.c.l.bf16 %v200_v2  ;;  %v369_v6 = vunpack.c.h.bf16 %v367_v3  ;;  %v368_v7 = vunpack.c.l.bf16 %v367_v3  ;;  %v291_v47 = vld [vmem:[%s197_s7 + $0x8] sm:$0x1] }
  0x14   : > { %v209_v8 = vadd.f32 %v206_v0, %v203_v5  ;;  %v208_v9 = vadd.f32 %v369_v6, %v205_v1  ;;  %v207_v10 = vadd.f32 %v368_v7, %v204_v4 }
  0x16   : > { %v218_v11 = vsel %vm217_vm0, %v209_v8, 0.0  ;;  %v214_v12 = vsel %vm210_vm1, %v208_v9, 0.0  ;;  %v211_v13 = vsel %vm210_vm1, %v207_v10, 0.0 }
  0x17   : > { %219 = vadd.xlane.f32.xlu0 %v218_v11  ;;  %215 = vadd.xlane.f32.xlu1 %v214_v12 }
  0x1b   : > { %212 = vadd.xlane.f32.xlu0 %v211_v13 }
  0xa4   : > { %v220_v14 = vpop.xlane.xlu0 %219  ;;  %v216_v15 = vpop.xlane.xlu1 %215 }
  0xa5   : > { %v224_v16 = vmul.f32 0.03125, %v220_v14  ;;  %v223_v17 = vmul.f32 0.03125, %v216_v15 }
  0xa7   : > { %v227_v18 = vsub.f32 %v209_v8, %v224_v16  ;;  %v226_v19 = vsub.f32 %v208_v9, %v223_v17 }
  0xa8   : > { %v213_v20 = vpop.xlane.xlu0 %212 }
  0xa9   : > { %v222_v21 = vmul.f32 0.03125, %v213_v20  ;;  %v230_v22 = vmul.f32 %v227_v18, %v227_v18  ;;  %v229_v23 = vmul.f32 %v226_v19, %v226_v19 }
  0xab   : > { %v225_v24 = vsub.f32 %v207_v10, %v222_v21  ;;  %v237_v25 = vsel %vm217_vm0, %v230_v22, 0.0  ;;  %v234_v26 = vsel %vm210_vm1, %v229_v23, 0.0 }
  0xac   : > { %238 = vadd.xlane.f32.xlu1 %v237_v25 }
  0xad   : > { %v228_v27 = vmul.f32 %v225_v24, %v225_v24 }
  0xaf   : > { %v231_v28 = vsel %vm210_vm1, %v228_v27, 0.0 }
  0xb0   : > { %235 = vadd.xlane.f32.xlu1 %v234_v26  ;;  %232 = vadd.xlane.f32.xlu0 %v231_v28 }
 0x139   : > { %v239_v29 = vpop.xlane.xlu1 %238 }
 0x13a   : > { %v242_v30 = vmul.f32 0.03125, %v239_v29 }
 0x13c   : > { %v245_v31 = vadd.f32 1e-05, %v242_v30 }
 0x13d   : > { %v236_v32 = vpop.xlane.xlu1 %235  ;;  %v233_v33 = vpop.xlane.xlu0 %232 }
 0x13e   : > { %379 = vrsqrt.f32 %v245_v31  ;;  %v241_v34 = vmul.f32 0.03125, %v236_v32  ;;  %v240_v35 = vmul.f32 0.03125, %v233_v33 }
 0x140   : > { %v244_v36 = vadd.f32 1e-05, %v241_v34  ;;  %v243_v37 = vadd.f32 1e-05, %v240_v35 }
 0x142   : > { %381 = vrsqrt.f32 %v244_v36 }
 0x143   : > { %383 = vrsqrt.f32 %v243_v37 }
 0x148   : > { %v380_v38 = vpop.eup %379 }
 0x149   : > { %v251_v40 = vmul.f32 %v380_v38, %v227_v18 }
 0x14b   : > { %v261_v42 = vmul.f32 %v356_v39, %v251_v40 }
 0x14c   : > { %v382_v43 = vpop.eup %381 }
 0x14d   : > { %v384_v44 = vpop.eup %383  ;;  %v271_v45 = vadd.f32 %v357_v41, %v261_v42  ;;  %v250_v46 = vmul.f32 %v382_v43, %v226_v19 }
 0x14e   : > { %v249_v48 = vmul.f32 %v384_v44, %v225_v24 }
 0x14f   : > { %v365_v49 = vpack.c.bf16 %v271_v45, %v271_v45  ;;  %v260_v50 = vmul.f32 %v356_v39, %v250_v46 }
 0x150   : > { %v259_v51 = vmul.f32 %v356_v39, %v249_v48 }
 0x151   : > { %v292_v52 = vsel %vm290_vm3, %v365_v49, %v291_v47  ;;  %v270_v53 = vadd.f32 %v357_v41, %v260_v50 }
 0x152   : > { %293 = vst [vmem:[%s197_s7 + $0x8] sm:$0x1] %v292_v52  ;;  %v269_v54 = vadd.f32 %v357_v41, %v259_v51 }
 0x153   : > { %v364_v55 = vpack.c.bf16 %v270_v53, %v270_v53 }
 0x154   : > { %v363_v56 = vpack.c.bf16 %v269_v54, %v269_v54 }
 0x155   : > { %287 = vst.msk [vmem:[%s197_s7 + $0x4] sm:$0xf] %vm285_vm4, %v364_v55 }
 0x156   : > { %286 = vst.msk [vmem:[%s197_s7] sm:$0xf] %vm285_vm4, %v363_v56 }
 0x157 PF: > { %s14_s15 = sadd.s32 1, %s391_s15  }
 0x158   : > { %p11_p4 = scmp.ge.s32.totalorder %s14_s15, 4  }
 0x15a   :  { %13 = sbr.rel (!%p11_p4) target bundleno = 1 (0x1), region = 66 }

// kernel: maskclip_backbone_forward.20
= control target key start
LH: loop header
LB: loop body
LE: loop exit
PB: predicated region body
PF: predicated region fallthrough
CT: control target
= control target key end

     0   :  { %s1359_s6 = smov 0   ;;  %s1361_s7 = smov 0   ;;  %s1565_s0 = inlined_call_operand.vmem [shape: bf16[2,17,96], index: 0, kind: input, shape index: {}]   ;;  %s1566_s1 = inlined_call_operand.vmem [shape: bf16[2,17,32], index: 1, kind: output, shape index: {}]  }
   0x1   :  { %s1363_s8 = smov 0  }
   0x2 LB: > { %s23_s9 = sadd.s32 1, %s1328_s7  ;;  %p1057_p0 = scmp.ge.s32.totalorder %s1332_s8, 1  ;;  %s1332_s8 = sphi %s1363_s8, %s11_s8   ;;  %s1328_s7 = sphi %s1361_s7, %s1568_s7   ;;  %s1324_s6 = sphi %s1359_s6, %s1567_s6  }
   0x3   : > { %p25_p1 = scmp.ge.s32.totalorder %s23_s9, 2  ;;  %p106_p2 = scmp.lt.s32.totalorder %s1332_s8, 3 }
   0x5   : > { %s1570_s9 = smov (%p25_p1, %s23_s9), 0  ;;  %p107_p3 = pnand %p1057_p0, %p106_p2 }
   0x6   : > { %p132_p4 = scmp.lt.s32.totalorder (!%p107_p3), %s1324_s6, 1  ;;  %vm164_vm0 = vcmask (!%p107_p3), 64512   ;;  %s1334_s14 = smov (!%p107_p3), 96   ;;  %vm273_vm1 = vcmask (!%p107_p3), 1040384   ;;  %v1336_v7 = vmov (!%p107_p3), 0   ;;  %vm235_vm2 = vcmask (!%p107_p3), 131072  }
   0x7   : > { %110 = sbr.rel (%p107_p3) target bundleno = 2051 (0x803), region = 24  ;;  %s1335_s15 = smov (!%p107_p3), 64   ;;  %v1395_v8 = vsel (!%p107_p3), %vm273_vm1, 65535, %v1336_v7  ;;  %vm228_vm3 = vcmask (!%p107_p3), 138240   ;;  %vm346_vm4 = vcmask (!%p107_p3), 57344   ;;  %vm343_vm7 = vcmask (!%p107_p3), 60416  }
   0x8   : > { %s1337_s16 = smov (!%p107_p3), 88   ;;  %s1338_s17 = smov (!%p107_p3), 120   ;;  %vm347_vm5 = vsmask.f32 (!%p107_p3), 256  ;;  %vm553_vm8 = vcmask (!%p107_p3), 122944   ;;  %vm550_vm10 = vcmask (!%p107_p3), 126016  }
   0x9   : > { %s1339_s18 = smov (!%p107_p3), 56   ;;  %s1340_s19 = smov (!%p107_p3), 80   ;;  %vm348_vm6 = vmand (!%p107_p3), %vm346_vm4, %vm347_vm5  ;;  %vm756_vm11 = vcmask (!%p107_p3), 191616   ;;  %vm759_vm12 = vcmask (!%p107_p3), 188544   ;;  %vm965_vm14 = vcmask (!%p107_p3), 254144  }
   0xa   : > { %s1341_s20 = smov (!%p107_p3), 112   ;;  %s1342_s21 = smov (!%p107_p3), 48   ;;  %vm554_vm9 = vmand (!%p107_p3), %vm553_vm8, %vm347_vm5 }
   0xb   : > { %s1343_s22 = smov (!%p107_p3), 72   ;;  %s1344_s23 = smov (!%p107_p3), 104   ;;  %vm760_vm13 = vmand (!%p107_p3), %vm759_vm12, %vm347_vm5 }
   0xc   : > { %s1345_s24 = smov (!%p107_p3), 40   ;;  %s1346_s25 = smov (!%p107_p3), 8   ;;  %vm966_vm15 = vmand (!%p107_p3), %vm965_vm14, %vm347_vm5 }
   0xd   : > { %s1347_s26 = smov (!%p107_p3), 16   ;;  %s1348_s30 = smov (!%p107_p3), 24  }
   0xe   : > { %s1572_s6 = smov (!%p132_p4, %s1324_s6), 1 }
   0xf   : > { %s1214_s10 = smul.u32 12, %s1572_s6 }
  0x11   : > { %s1385_s13 = scalar_lea.vmem %s1565_s0, %s1214_s10  ;;  %s1531_s29 = scalar_lea.vmem %s1566_s1, %s1214_s10 }
  0x12   : > { %v1254_v0 = vld [vmem:[%s1385_s13] sm:$0xff]   ;;  %v1255_v1 = vld [vmem:[%s1385_s13 + $0x8] ss:$0 sps:$4 sm:$0x11]  }
  0x13   : > { %160 = vrot.lane.b32.xlu0 %v1254_v0, %s1334_s14  ;;  %1146 = vmatprep.mubr.msk.bf16.mxu0 %vm164_vm0, %v1254_v0  ;;  %v1256_v21 = vld [vmem:[%s1385_s13] sm:$0xff]   ;;  %v1403_v22 = vld [vmem:[%s1385_s13 + $0x8] ss:$0 sps:$4 sm:$0x11]  }
  0x14   : > { %262 = vrot.lane.b32.xlu1 %v1254_v0, %s1335_s15  ;;  %v1436_v58 = vld [vmem:[%s1385_s13] sm:$0xff]   ;;  %v1259_v59 = vld [vmem:[%s1385_s13 + $0x8] ss:$0 sps:$4 sm:$0x11]  }
  0x17   : > { %162 = vrot.lane.b32.xlu0 %v1255_v1, %s1334_s14 }
  0x18   : > { %264 = vrot.lane.b32.xlu1 %v1255_v1, %s1335_s15 }
  0x85   : > { %v161_v2 = vpop.permute.xlu0 %160 }
  0x86   : > { %1206 = vmatprep.subr.msk.bf16.mxu0 %vm164_vm0, %v161_v2  ;;  %v172_v3 = vsel %vm164_vm0, %v161_v2, 0  ;;  %v263_v6 = vpop.permute.xlu1 %262 }
  0x87   : > { %1143 = vmatpush3.bf16.xpose.msra.mxu0 %v172_v3  ;;  %1150 = vmatprep.subr.bf16.mxu1 %v263_v6 }
  0x88   : > { %1151 = vmatpush3.bf16.msra.mxu1 %v263_v6 }
  0x89   : > { %v163_v4 = vpop.permute.xlu0 %162 }
  0x8a   : > { %1207 = vmatprep.subr.msk.bf16.mxu0 %vm164_vm0, %v163_v4  ;;  %v175_v5 = vsel %vm164_vm0, %v163_v4, 0  ;;  %v265_v9 = vpop.permute.xlu1 %264 }
  0x8b   : > { %v277_v10 = vand.u32 %v1395_v8, %v265_v9 }
  0x8d   : > { %1152 = vmatprep.subr.bf16.mxu1 %v277_v10 }
  0x8e   : > { %1153 = vmatpush3.bf16.msra.mxu1 %v277_v10 }
  0x8f   : > { %1145 = vmatpush3.bf16.xpose.msra.mxu0 %v175_v5 }
  0x96   : > { %1147 = vmatmul.mubr.msk.bf16.vlgmr.msra.gmra.mrb[0].mxu0 %vm164_vm0, %v1255_v1 }
 0x169   : > { %v1148_v11 = vpop.f32.mrb[0].mxu0 }
 0x16a   : > { %v227_v12 = vmul.f32 0.35355338, %v1148_v11  ;;  %v211_v13 = vpop.f32.mrb[1].mxu0 }
 0x16b   : > { %v225_v14 = vmul.f32 0.35355338, %v211_v13  ;;  %v1149_v15 = vpop.f32.mrb[2].mxu0 }
 0x16c   : > { %v214_v16 = vpop.f32.mrb[3].mxu0  ;;  %v236_v17 = vsel %vm235_vm2, %v227_v12, -inf }
 0x16d   : > { %v226_v18 = vmul.f32 0.35355338, %v214_v16  ;;  %237 = vmax.xlane.f32.xlu0 %v236_v17  ;;  %v229_v19 = vsel %vm228_vm3, %v225_v14, -inf }
 0x16e   : > { %230 = vmax.xlane.f32.xlu1 %v229_v19 }
 0x16f   : > { %v232_v20 = vsel %vm228_vm3, %v226_v18, -inf }
 0x172   : > { %233 = vmax.xlane.f32.xlu1 %v232_v20 }
 0x183   : > { %367 = vrot.lane.b32.xlu1 %v1256_v21, %s1337_s16  ;;  %365 = vrot.lane.b32.xlu0 %v1403_v22, %s1338_s17 }
 0x187   : > { %369 = vrot.lane.b32.xlu1 %v1403_v22, %s1337_s16 }
 0x18b   : > { %363 = vrot.lane.b32.xlu1 %v1256_v21, %s1338_s17 }
 0x18f   : > { %466 = vrot.lane.b32.xlu1 %v1256_v21, %s1339_s18 }
 0x1fa   : > { %v238_v23 = vpop.xlane.xlu0 %237 }
 0x1fb   : > { %v241_v24 = vsub.f32 %v227_v12, %v238_v23  ;;  %v231_v25 = vpop.xlane.xlu1 %230 }
 0x1fc   : > { %v239_v26 = vsub.f32 %v225_v14, %v231_v25 }
 0x1fd   : > { %v246_v27 = vmul.f32 1.442695, %v241_v24 }
 0x1fe   : > { %v242_v28 = vmul.f32 1.442695, %v239_v26  ;;  %v366_v42 = vpop.permute.xlu0 %365 }
 0x1ff   : > { %v234_v29 = vpop.xlane.xlu1 %233  ;;  %1262 = vpow2.f32 %v246_v27 }
 0x200   : > { %v240_v30 = vsub.f32 %v226_v18, %v234_v29  ;;  %1264 = vpow2.f32 %v242_v28 }
 0x202   : > { %v244_v31 = vmul.f32 1.442695, %v240_v30 }
 0x203   : > { %v368_v32 = vpop.permute.xlu1 %367 }
 0x204   : > { %1266 = vpow2.f32 %v244_v31  ;;  %1208 = vmatprep.subr.msk.bf16.mxu1 %vm164_vm0, %v368_v32  ;;  %v378_v38 = vsel %vm164_vm0, %v368_v32, 0 }
 0x207   : > { %v370_v34 = vpop.permute.xlu1 %369 }
 0x208   : > { %v381_v41 = vsel %vm164_vm0, %v370_v34, 0 }
 0x209   : > { %v1409_v33 = vpop.eup %1262 }
 0x20a   : > { %v1411_v35 = vpop.eup %1264  ;;  %v261_v39 = vpack.c.bf16 %v1409_v33, %v1409_v33 }
 0x20b   : > { %v364_v40 = vpop.permute.xlu1 %363 }
 0x20e   : > { %v1413_v36 = vpop.eup %1266 }
 0x20f   : > { %v260_v37 = vpack.c.bf16 %v1413_v36, %v1411_v35  ;;  %v467_v43 = vpop.permute.xlu1 %466 }
 0x210   : > { %1166 = vmatprep.subr.bf16.mxu0 %v467_v43 }
 0x211   : > { %1154 = vmatprep.mubr.msk.bf16.mxu1 %vm228_vm3, %v260_v37  ;;  %1167 = vmatpush3.bf16.msra.mxu0 %v467_v43  ;;  %v1261_v37 = vld [vmem:[%s1385_s13 + $0x8] ss:$0 sps:$4 sm:$0x11]  }
 0x212   : > { %1155 = vmatmul.mubr.msk.bf16.vlgmr.msra.gmra.mrb[0].mxu1 %vm228_vm3, %v261_v39 }
 0x213   : > { %1159 = vmatpush3.bf16.xpose.msra.mxu1 %v378_v38  ;;  %1162 = vmatprep.mubr.msk.bf16.mxu1 %vm164_vm0, %v364_v40 }
 0x214   : > { %1209 = vmatprep.subr.msk.bf16.mxu1 %vm164_vm0, %v370_v34  ;;  %v1473_v34 = vld [vmem:[%s1385_s13] sm:$0xff]  }
 0x21b   : > { %1161 = vmatpush3.bf16.xpose.msra.mxu1 %v381_v41 }
 0x222   : > { %1163 = vmatmul.mubr.msk.bf16.vlgmr.msra.gmra.mrb[4].mxu1 %vm164_vm0, %v366_v42 }
 0x2e5   : > { %v1426_v44 = vpop.f32.mrb[0].mxu1 }
 0x2e6   : > { %v1428_v45 = vpop.f32.mrb[1].mxu1 }
 0x2e7   : > { %v1157_v46 = vpop.f32.mrb[2].mxu1 }
 0x2e8   : > { %v1430_v47 = vpop.f32.mrb[3].mxu1 }
 0x2f5   : > { %v1164_v48 = vpop.f32.mrb[4].mxu1 }
 0x2f6   : > { %v433_v49 = vmul.f32 0.35355338, %v1164_v48  ;;  %v417_v50 = vpop.f32.mrb[5].mxu1 }
 0x2f7   : > { %v1165_v51 = vpop.f32.mrb[6].mxu1  ;;  %v431_v52 = vmul.f32 0.35355338, %v417_v50 }
 0x2f8   : > { %v420_v53 = vpop.f32.mrb[7].mxu1  ;;  %v440_v54 = vsel %vm235_vm2, %v433_v49, -inf }
 0x2f9   : > { %v432_v55 = vmul.f32 0.35355338, %v420_v53  ;;  %441 = vmax.xlane.f32.xlu1 %v440_v54  ;;  %v434_v57 = vsel %vm228_vm3, %v431_v52, -inf }
 0x2fb   : > { %v437_v56 = vsel %vm228_vm3, %v432_v55, -inf }
 0x2fc   : > { %438 = vmax.xlane.f32.xlu0 %v437_v56 }
 0x2fd   : > { %435 = vmax.xlane.f32.xlu1 %v434_v57 }
 0x30e   : > { %573 = vrot.lane.b32.xlu1 %v1436_v58, %s1340_s19 }
 0x312   : > { %468 = vrot.lane.b32.xlu0 %v1403_v22, %s1339_s18  ;;  %575 = vrot.lane.b32.xlu1 %v1259_v59, %s1340_s19 }
 0x316   : > { %569 = vrot.lane.b32.xlu1 %v1436_v58, %s1341_s20 }
 0x31a   : > { %571 = vrot.lane.b32.xlu1 %v1259_v59, %s1341_s20 }
 0x31e   : > { %674 = vrot.lane.b32.xlu1 %v1259_v59, %s1342_s21 }
 0x386   : > { %v442_v60 = vpop.xlane.xlu1 %441 }
 0x387   : > { %v445_v61 = vsub.f32 %v433_v49, %v442_v60 }
 0x389   : > { %v450_v62 = vmul.f32 1.442695, %v445_v61  ;;  %v439_v63 = vpop.xlane.xlu0 %438 }
 0x38a   : > { %v444_v0 = vsub.f32 %v432_v55, %v439_v63  ;;  %v436_v1 = vpop.xlane.xlu1 %435 }
 0x38b   : > { %v443_v2 = vsub.f32 %v431_v52, %v436_v1  ;;  %1268 = vpow2.f32 %v450_v62 }
 0x38c   : > { %v448_v3 = vmul.f32 1.442695, %v444_v0 }
 0x38d   : > { %v446_v4 = vmul.f32 1.442695, %v443_v2  ;;  %v469_v5 = vpop.permute.xlu0 %468 }
 0x38e   : > { %1270 = vpow2.f32 %v448_v3  ;;  %v478_v6 = vand.u32 %v469_v5, %v1395_v8  ;;  %v574_v7 = vpop.permute.xlu1 %573 }
 0x38f   : > { %1272 = vpow2.f32 %v446_v4  ;;  %v584_v14 = vsel %vm164_vm0, %v574_v7, 0 }
 0x390   : > { %1168 = vmatprep.subr.bf16.mxu0 %v478_v6 }
 0x391   : > { %1169 = vmatpush3.bf16.msra.mxu0 %v478_v6 }
 0x392   : > { %1210 = vmatprep.subr.msk.bf16.mxu0 %vm164_vm0, %v574_v7  ;;  %v576_v9 = vpop.permute.xlu1 %575 }
 0x393   : > { %v587_v17 = vsel %vm164_vm0, %v576_v9, 0 }
 0x395   : > { %v1446_v10 = vpop.eup %1268 }
 0x396   : > { %v465_v15 = vpack.c.bf16 %v1446_v10, %v1446_v10  ;;  %v570_v16 = vpop.permute.xlu1 %569 }
 0x398   : > { %v1448_v11 = vpop.eup %1270 }
 0x399   : > { %v1450_v12 = vpop.eup %1272 }
 0x39a   : > { %v464_v13 = vpack.c.bf16 %v1448_v11, %v1450_v12  ;;  %v572_v18 = vpop.permute.xlu1 %571 }
 0x39c   : > { %1170 = vmatprep.mubr.msk.bf16.mxu0 %vm228_vm3, %v464_v13 }
 0x39d   : > { %1171 = vmatmul.mubr.msk.bf16.vlgmr.msra.gmra.mrb[4].mxu0 %vm228_vm3, %v465_v15 }
 0x39e   : > { %1175 = vmatpush3.bf16.xpose.msra.mxu0 %v584_v14  ;;  %1178 = vmatprep.mubr.msk.bf16.mxu0 %vm164_vm0, %v570_v16  ;;  %v675_v38 = vpop.permute.xlu1 %674 }
 0x39f   : > { %1211 = vmatprep.subr.msk.bf16.mxu0 %vm164_vm0, %v576_v9  ;;  %v684_v52 = vand.u32 %v675_v38, %v1395_v8 }
 0x3a6   : > { %1177 = vmatpush3.bf16.xpose.msra.mxu0 %v587_v17 }
 0x3ad   : > { %1179 = vmatmul.mubr.msk.bf16.vlgmr.msra.gmra.mrb[8].mxu0 %vm164_vm0, %v572_v18  ;;  %v458_v18 = vsel %vm235_vm2, %v1446_v10, 0.0 }
 0x470   : > { %v1463_v19 = vpop.f32.mrb[4].mxu0 }
 0x471   : > { %v1465_v20 = vpop.f32.mrb[5].mxu0 }
 0x472   : > { %v1173_v21 = vpop.f32.mrb[6].mxu0 }
 0x473   : > { %v1467_v22 = vpop.f32.mrb[7].mxu0 }
 0x480   : > { %v1180_v23 = vpop.f32.mrb[8].mxu0 }
 0x481   : > { %v639_v24 = vmul.f32 0.35355338, %v1180_v23  ;;  %v623_v25 = vpop.f32.mrb[9].mxu0  ;;  %v452_v23 = vsel %vm228_vm3, %v1450_v12, 0.0 }
 0x482   : > { %v1181_v26 = vpop.f32.mrb[10].mxu0  ;;  %v637_v27 = vmul.f32 0.35355338, %v623_v25 }
 0x483   : > { %v626_v28 = vpop.f32.mrb[11].mxu0  ;;  %v646_v29 = vsel %vm235_vm2, %v639_v24, -inf }
 0x484   : > { %v638_v30 = vmul.f32 0.35355338, %v626_v28  ;;  %647 = vmax.xlane.f32.xlu0 %v646_v29  ;;  %v640_v32 = vsel %vm228_vm3, %v637_v27, -inf }
 0x486   : > { %v643_v31 = vsel %vm228_vm3, %v638_v30, -inf }
 0x487   : > { %644 = vmax.xlane.f32.xlu1 %v643_v31 }
 0x488   : > { %641 = vmax.xlane.f32.xlu0 %v640_v32 }
 0x498   : > { %779 = vrot.lane.b32.xlu1 %v1473_v34, %s1343_s22 }
 0x49c   : > { %775 = vrot.lane.b32.xlu1 %v1473_v34, %s1344_s23 }
 0x49e   : > { %672 = vrot.lane.b32.xlu0 %v1436_v58, %s1342_s21 }
 0x4a2   : > { %781 = vrot.lane.b32.xlu0 %v1261_v37, %s1343_s22 }
 0x4a6   : > { %777 = vrot.lane.b32.xlu0 %v1261_v37, %s1344_s23 }
 0x511   : > { %v648_v39 = vpop.xlane.xlu0 %647 }
 0x512   : > { %v651_v40 = vsub.f32 %v639_v24, %v648_v39  ;;  %v455_v24 = vsel %vm228_vm3, %v1448_v11, 0.0 }
 0x514   : > { %v656_v41 = vmul.f32 1.442695, %v651_v40  ;;  %v645_v42 = vpop.xlane.xlu1 %644 }
 0x515   : > { %v650_v43 = vsub.f32 %v638_v30, %v645_v42  ;;  %v642_v46 = vpop.xlane.xlu0 %641 }
 0x516   : > { %v649_v48 = vsub.f32 %v637_v27, %v642_v46  ;;  %1274 = vpow2.f32 %v656_v41 }
 0x517   : > { %v654_v49 = vmul.f32 1.442695, %v650_v43 }
 0x518   : > { %v652_v50 = vmul.f32 1.442695, %v649_v48  ;;  %v780_v53 = vpop.permute.xlu1 %779 }
 0x519   : > { %1276 = vpow2.f32 %v654_v49  ;;  %v673_v51 = vpop.permute.xlu0 %672  ;;  %v790_v58 = vsel %vm164_vm0, %v780_v53, 0  ;;  %v254_v49 = vsel %vm235_vm2, %v1409_v33, 0.0 }
 0x51a   : > { %1278 = vpow2.f32 %v652_v50  ;;  %1182 = vmatprep.subr.bf16.mxu1 %v673_v51 }
 0x51b   : > { %1183 = vmatpush3.bf16.msra.mxu1 %v673_v51  ;;  %v251_v51 = vsel %vm228_vm3, %v1413_v36, 0.0 }
 0x51c   : > { %1184 = vmatprep.subr.bf16.mxu1 %v684_v52  ;;  %v776_v60 = vpop.permute.xlu1 %775 }
 0x51d   : > { %v782_v61 = vpop.permute.xlu0 %781 }
 0x51e   : > { %v793_v62 = vsel %vm164_vm0, %v782_v61, 0 }
 0x51f   : > { %1185 = vmatpush3.bf16.msra.mxu1 %v684_v52 }
 0x520   : > { %1212 = vmatprep.subr.msk.bf16.mxu1 %vm164_vm0, %v780_v53  ;;  %v1275_v54 = vpop.eup %1274 }
 0x521   : > { %v671_v59 = vpack.c.bf16 %v1275_v54, %v1275_v54  ;;  %v778_v63 = vpop.permute.xlu0 %777  ;;  %v664_v21 = vsel %vm235_vm2, %v1275_v54, 0.0 }
 0x523   : > { %v1277_v55 = vpop.eup %1276 }
 0x524   : > { %v1279_v56 = vpop.eup %1278  ;;  %v661_v26 = vsel %vm228_vm3, %v1277_v55, 0.0 }
 0x525   : > { %v670_v57 = vpack.c.bf16 %v1277_v55, %v1279_v56  ;;  %v658_v25 = vsel %vm228_vm3, %v1279_v56, 0.0 }
 0x527   : > { %1186 = vmatprep.mubr.msk.bf16.mxu1 %vm228_vm3, %v670_v57 }
 0x528   : > { %1187 = vmatmul.mubr.msk.bf16.vlgmr.msra.gmra.mrb[8].mxu1 %vm228_vm3, %v671_v59 }
 0x529   : > { %1191 = vmatpush3.bf16.xpose.msra.mxu1 %v790_v58  ;;  %1194 = vmatprep.mubr.msk.bf16.mxu1 %vm164_vm0, %v776_v60 }
 0x52a   : > { %1213 = vmatprep.subr.msk.bf16.mxu1 %vm164_vm0, %v782_v61 }
 0x531   : > { %1193 = vmatpush3.bf16.xpose.msra.mxu1 %v793_v62 }
 0x538   : > { %1195 = vmatmul.mubr.msk.bf16.vlgmr.msra.gmra.mrb[12].mxu1 %vm164_vm0, %v778_v63  ;;  %vm962_vm0 = vcmask 257216  }
 0x5fb   : > { %v1489_v0 = vpop.f32.mrb[8].mxu1 }
 0x5fc   : > { %v1491_v1 = vpop.f32.mrb[9].mxu1 }
 0x5fd   : > { %v1189_v2 = vpop.f32.mrb[10].mxu1 }
 0x5fe   : > { %v1493_v3 = vpop.f32.mrb[11].mxu1 }
 0x60b   : > { %v1196_v4 = vpop.f32.mrb[12].mxu1 }
 0x60c   : > { %v845_v5 = vmul.f32 0.35355338, %v1196_v4  ;;  %v829_v6 = vpop.f32.mrb[13].mxu1 }
 0x60d   : > { %v843_v7 = vmul.f32 0.35355338, %v829_v6  ;;  %v1197_v9 = vpop.f32.mrb[14].mxu1 }
 0x60e   : > { %v832_v13 = vpop.f32.mrb[15].mxu1  ;;  %v852_v14 = vsel %vm235_vm2, %v845_v5, -inf }
 0x60f   : > { %v844_v15 = vmul.f32 0.35355338, %v832_v13  ;;  %853 = vmax.xlane.f32.xlu0 %v852_v14  ;;  %v846_v16 = vsel %vm228_vm3, %v843_v7, -inf }
 0x610   : > { %847 = vmax.xlane.f32.xlu1 %v846_v16 }
 0x611   : > { %v849_v17 = vsel %vm228_vm3, %v844_v15, -inf }
 0x613   : > { %850 = vmax.xlane.f32.xlu0 %v849_v17 }
 0x621   : > { %878 = vrot.lane.b32.xlu1 %v1473_v34, %s1345_s24 }
 0x629   : > { %880 = vrot.lane.b32.xlu0 %v1261_v37, %s1345_s24 }
 0x645   : > { %459 = vadd.xlane.f32.xlu1 %v458_v18  ;;  %v349_v18 = vld [vmem:[%s1531_s29 + $0x8] sm:$0x1] }
 0x648   : > { %665 = vadd.xlane.f32.xlu0 %v664_v21 }
 0x649   : > { %453 = vadd.xlane.f32.xlu1 %v452_v23 }
 0x64c   : > { %456 = vadd.xlane.f32.xlu0 %v455_v24 }
 0x64d   : > { %659 = vadd.xlane.f32.xlu1 %v658_v25 }
 0x650   : > { %662 = vadd.xlane.f32.xlu0 %v661_v26 }
 0x69c   : > { %v854_v27 = vpop.xlane.xlu0 %853 }
 0x69d   : > { %v857_v10 = vsub.f32 %v845_v5, %v854_v27  ;;  %v848_v28 = vpop.xlane.xlu1 %847 }
 0x69e   : > { %v855_v29 = vsub.f32 %v843_v7, %v848_v28 }
 0x69f   : > { %v862_v30 = vmul.f32 1.442695, %v857_v10 }
 0x6a0   : > { %v858_v31 = vmul.f32 1.442695, %v855_v29  ;;  %v851_v32 = vpop.xlane.xlu0 %850 }
 0x6a1   : > { %1280 = vpow2.f32 %v862_v30  ;;  %v856_v12 = vsub.f32 %v844_v15, %v851_v32  ;;  %v879_v34 = vpop.permute.xlu1 %878 }
 0x6a2   : > { %1282 = vpow2.f32 %v858_v31  ;;  %1198 = vmatprep.subr.bf16.mxu0 %v879_v34 }
 0x6a3   : > { %v860_v11 = vmul.f32 1.442695, %v856_v12  ;;  %1199 = vmatpush3.bf16.msra.mxu0 %v879_v34 }
 0x6a4   : > { %v881_v37 = vpop.permute.xlu0 %880 }
 0x6a5   : > { %1284 = vpow2.f32 %v860_v11  ;;  %v890_v38 = vand.u32 %v881_v37, %v1395_v8  ;;  %v248_v8 = vsel %vm228_vm3, %v1411_v35, 0.0 }
 0x6a7   : > { %1200 = vmatprep.subr.bf16.mxu0 %v890_v38 }
 0x6a8   : > { %1201 = vmatpush3.bf16.msra.mxu0 %v890_v38 }
 0x6ab   : > { %v1281_v39 = vpop.eup %1280 }
 0x6ac   : > { %v1283_v40 = vpop.eup %1282  ;;  %v870_v41 = vsel %vm235_vm2, %v1281_v39, 0.0  ;;  %v877_v50 = vpack.c.bf16 %v1281_v39, %v1281_v39 }
 0x6ad   : > { %871 = vadd.xlane.f32.xlu1 %v870_v41  ;;  %v864_v42 = vsel %vm228_vm3, %v1283_v40, 0.0 }
 0x6ae   : > { %865 = vadd.xlane.f32.xlu0 %v864_v42 }
 0x6af   : > { %v1285_v43 = vpop.eup %1284 }
 0x6b0   : > { %v867_v46 = vsel %vm228_vm3, %v1285_v43, 0.0  ;;  %v876_v48 = vpack.c.bf16 %v1285_v43, %v1283_v40 }
 0x6b1   : > { %868 = vadd.xlane.f32.xlu1 %v867_v46 }
 0x6b2   : > { %255 = vadd.xlane.f32.xlu0 %v254_v49  ;;  %1202 = vmatprep.mubr.msk.bf16.mxu0 %vm228_vm3, %v876_v48 }
 0x6b3   : > { %1203 = vmatmul.mubr.msk.bf16.vlgmr.msra.gmra.mrb[12].mxu0 %vm228_vm3, %v877_v50 }
 0x6b5   : > { %249 = vadd.xlane.f32.xlu1 %v248_v8 }
 0x6b6   : > { %252 = vadd.xlane.f32.xlu0 %v251_v51 }
 0x6d2   : > { %v460_v52 = vpop.xlane.xlu1 %459 }
 0x6d3   : > { %1286 = vrcp.f32 %v460_v52 }
 0x6d5   : > { %v666_v53 = vpop.xlane.xlu0 %665 }
 0x6d6   : > { %1288 = vrcp.f32 %v666_v53  ;;  %v454_v54 = vpop.xlane.xlu1 %453 }
 0x6d7   : > { %1290 = vrcp.f32 %v454_v54 }
 0x6d9   : > { %v457_v33 = vpop.xlane.xlu0 %456 }
 0x6da   : > { %1292 = vrcp.f32 %v457_v33  ;;  %v660_v55 = vpop.xlane.xlu1 %659 }
 0x6db   : > { %1294 = vrcp.f32 %v660_v55 }
 0x6dd   : > { %v1287_v56 = vpop.eup %1286  ;;  %v663_v57 = vpop.xlane.xlu0 %662 }
 0x6de   : > { %1296 = vrcp.f32 %v663_v57  ;;  %v530_v35 = vmul.f32 %v1287_v56, %v1463_v19 }
 0x6e0   : > { %v1289_v58 = vpop.eup %1288  ;;  %v1103_v59 = vpack.c.bf16 %v530_v35, %v530_v35 }
 0x6e1   : > { %v1291_v60 = vpop.eup %1290  ;;  %v736_v36 = vmul.f32 %v1289_v58, %v1489_v0 }
 0x6e2   : > { %545 = vrot.lane.b32.xlu1 %v1103_v59, %s1346_s25  ;;  %v528_v61 = vmul.f32 %v1291_v60, %v1465_v20 }
 0x6e3   : > { %v1106_v62 = vpack.c.bf16 %v736_v36, %v736_v36 }
 0x6e4   : > { %v1293_v63 = vpop.eup %1292  ;;  %v1101_v2 = vpack.c.bf16 %v528_v61, %v528_v61 }
 0x6e5   : > { %v1295_v4 = vpop.eup %1294  ;;  %751 = vrot.lane.b32.xlu0 %v1106_v62, %s1347_s26  ;;  %v529_v5 = vmul.f32 %v1293_v63, %v1467_v22 }
 0x6e6   : > { %541 = vrot.lane.b32.xlu1 %v1101_v2, %s1346_s25  ;;  %v734_v19 = vmul.f32 %v1295_v4, %v1491_v1 }
 0x6e7   : > { %v1102_v6 = vpack.c.bf16 %v529_v5, %v529_v5 }
 0x6e8   : > { %v1297_v7 = vpop.eup %1296  ;;  %v1104_v9 = vpack.c.bf16 %v734_v19, %v734_v19 }
 0x6e9   : > { %v735_v0 = vmul.f32 %v1297_v7, %v1493_v3 }
 0x6ea   : > { %747 = vrot.lane.b32.xlu0 %v1104_v9, %s1347_s26  ;;  %543 = vrot.lane.b32.xlu1 %v1102_v6, %s1346_s25 }
 0x6eb   : > { %v1105_v20 = vpack.c.bf16 %v735_v0, %v735_v0 }
 0x6ee   : > { %749 = vrot.lane.b32.xlu1 %v1105_v20, %s1347_s26 }
 0x73a   : > { %v872_v13 = vpop.xlane.xlu1 %871 }
 0x73b   : > { %v866_v14 = vpop.xlane.xlu0 %865 }
 0x73e   : > { %v869_v15 = vpop.xlane.xlu1 %868 }
 0x73f   : > { %v256_v16 = vpop.xlane.xlu0 %255 }
 0x740   : > { %1298 = vrcp.f32 %v256_v16 }
 0x742   : > { %v250_v17 = vpop.xlane.xlu1 %249 }
 0x743   : > { %1300 = vrcp.f32 %v250_v17  ;;  %v253_v22 = vpop.xlane.xlu0 %252 }
 0x744   : > { %1302 = vrcp.f32 %v253_v22 }
 0x745   : > { %1304 = vrcp.f32 %v872_v13 }
 0x746   : > { %1306 = vrcp.f32 %v866_v14 }
 0x747   : > { %1308 = vrcp.f32 %v869_v15 }
 0x74a   : > { %v1299_v1 = vpop.eup %1298 }
 0x74b   : > { %v329_v3 = vmul.f32 %v1299_v1, %v1426_v44 }
 0x74d   : > { %v1301_v21 = vpop.eup %1300  ;;  %v1100_v23 = vpack.c.bf16 %v329_v3, %v329_v3 }
 0x74e   : > { %v1303_v24 = vpop.eup %1302  ;;  %v327_v25 = vmul.f32 %v1301_v21, %v1428_v45 }
 0x74f   : > { %v328_v26 = vmul.f32 %v1303_v24, %v1430_v47  ;;  %v350_v27 = vsel %vm348_vm6, %v1100_v23, %v349_v18  ;;  %v1305_v37 = vpop.eup %1304 }
 0x750   : > { %351 = vst [vmem:[%s1531_s29 + $0x8] sm:$0x1] %v350_v27  ;;  %v1098_v10 = vpack.c.bf16 %v327_v25, %v327_v25  ;;  %v1307_v39 = vpop.eup %1306 }
 0x751   : > { %v1099_v28 = vpack.c.bf16 %v328_v26, %v328_v26  ;;  %v1309_v46 = vpop.eup %1308 }
 0x752   : > { %344 = vst.msk [vmem:[%s1531_s29] sm:$0xf] %vm343_vm7, %v1098_v10 }
 0x753   : > { %345 = vst.msk [vmem:[%s1531_s29 + $0x4] sm:$0xf] %vm343_vm7, %v1099_v28 }
 0x754   : > { %v546_v44 = vpop.permute.xlu1 %545 }
 0x757   : > { %v555_v45 = vld [vmem:[%s1531_s29 + $0x8] sm:$0x1]  ;;  %v752_v47 = vpop.permute.xlu0 %751 }
 0x758   : > { %v556_v29 = vsel %vm554_vm9, %v546_v44, %v555_v45  ;;  %v542_v30 = vpop.permute.xlu1 %541 }
 0x759   : > { %557 = vst [vmem:[%s1531_s29 + $0x8] sm:$0x1] %v556_v29  ;;  %551 = vst.msk [vmem:[%s1531_s29] sm:$0xf] %vm550_vm10, %v542_v30 }
 0x75c   : > { %v544_v31 = vpop.permute.xlu1 %543  ;;  %v748_v32 = vpop.permute.xlu0 %747 }
 0x75d   : > { %552 = vst.msk [vmem:[%s1531_s29 + $0x4] sm:$0xf] %vm550_vm10, %v544_v31 }
 0x75e   : > { %757 = vst.msk [vmem:[%s1531_s29] sm:$0xf] %vm756_vm11, %v748_v32 }
 0x760   : > { %v761_v12 = vld [vmem:[%s1531_s29 + $0x8] sm:$0x1]  ;;  %v750_v34 = vpop.permute.xlu1 %749 }
 0x761   : > { %v762_v11 = vsel %vm760_vm13, %v752_v47, %v761_v12  ;;  %758 = vst.msk [vmem:[%s1531_s29 + $0x4] sm:$0xf] %vm756_vm11, %v750_v34 }
 0x762   : > { %763 = vst [vmem:[%s1531_s29 + $0x8] sm:$0x1] %v762_v11 }
 0x769   : > { %v967_v52 = vld [vmem:[%s1531_s29 + $0x8] sm:$0x1] }
 0x786   : > { %v1204_v38 = vpop.f32.mrb[12].mxu0 }
 0x787   : > { %v942_v40 = vmul.f32 %v1305_v37, %v1204_v38  ;;  %v926_v41 = vpop.f32.mrb[13].mxu0 }
 0x788   : > { %v940_v42 = vmul.f32 %v1307_v39, %v926_v41  ;;  %v1205_v43 = vpop.f32.mrb[14].mxu0 }
 0x789   : > { %v1109_v48 = vpack.c.bf16 %v942_v40, %v942_v40  ;;  %v929_v49 = vpop.f32.mrb[15].mxu0 }
 0x78a   : > { %v1107_v50 = vpack.c.bf16 %v940_v42, %v940_v42  ;;  %v941_v8 = vmul.f32 %v1309_v46, %v929_v49 }
 0x78b   : > { %957 = vrot.lane.b32.xlu0 %v1109_v48, %s1348_s30 }
 0x78c   : > { %v1108_v51 = vpack.c.bf16 %v941_v8, %v941_v8  ;;  %953 = vrot.lane.b32.xlu1 %v1107_v50, %s1348_s30 }
 0x78f   : > { %955 = vrot.lane.b32.xlu0 %v1108_v51, %s1348_s30 }
 0x7fd   : > { %v958_v53 = vpop.permute.xlu0 %957 }
 0x7fe   : > { %v968_v54 = vsel %vm966_vm15, %v958_v53, %v967_v52  ;;  %v954_v33 = vpop.permute.xlu1 %953 }
 0x7ff   : > { %969 = vst [vmem:[%s1531_s29 + $0x8] sm:$0x1] %v968_v54  ;;  %963 = vst.msk [vmem:[%s1531_s29] sm:$0xf] %vm962_vm0, %v954_v33 }
 0x801   : > { %v956_v55 = vpop.permute.xlu0 %955 }
 0x802   : > { %964 = vst.msk [vmem:[%s1531_s29 + $0x4] sm:$0xf] %vm962_vm0, %v956_v55 }
 0x803 PF: > { %s11_s8 = sadd.s32 1, %s1332_s8   ;;  %s1567_s6 = smov %s1328_s7 }
 0x804   : > { %p8_p5 = scmp.ge.s32.totalorder %s11_s8, 4   ;;  %s1568_s7 = smov %s1570_s9 }
 0x806   :  { %10 = sbr.rel (!%p8_p5) target bundleno = 2 (0x2), region = 54 }

// kernel: maskclip_backbone_forward.21
= control target key start
LH: loop header
LB: loop body
LE: loop exit
PB: predicated region body
PF: predicated region fallthrough
CT: control target
= control target key end

     0   :  { %v232_v0 = vmov 0.0   ;;  %vm233_vm0 = vmmov 0   ;;  %vm59_vm1 = vcmask 261120   ;;  %vm161_vm2 = vcmask 257024   ;;  %s304_s1 = inlined_call_operand.vmem [shape: bf16[32,32], index: 1, kind: input, shape index: {}]   ;;  %s305_s0 = inlined_call_operand.vmem [shape: bf16[34,32], index: 0, kind: input, shape index: {}]   ;;  %s306_s3 = inlined_call_operand.vmem [shape: bf16[34,32], index: 3, kind: input, shape index: {}]   ;;  %s307_s2 = inlined_call_operand.vmem [shape: f32[1,32], index: 2, kind: input, shape index: {}]   ;;  %s308_s4 = inlined_call_operand.vmem [shape: bf16[34,32], index: 4, kind: output, shape index: {}]  }
   0x1   :  { %221 = vmatprep.subr.bf16.mxu1 %v232_v0  ;;  %v227_v1 = vld [vmem:[%s304_s1] sm:$0xff]   ;;  %205 = vmatprep.subr.bf16.mxu0 %v232_v0  ;;  %v228_v2 = vld [vmem:[%s304_s1 + $0x8] sm:$0xff]   ;;  %v231_v5 = vld [vmem:[%s305_s0 + $0x10] ss:$0 sps:$4 sm:$0x11]   ;;  %vm166_vm3 = vcmask 253952  }
   0x2   :  { %213 = vmatprep.mubr.msk.bf16.mxu1 %vm233_vm0, %v232_v0  ;;  %209 = vmatprep.mubr.msk.bf16.mxu0 %vm233_vm0, %v232_v0  ;;  %v229_v3 = vld [vmem:[%s305_s0 + $0x8] sm:$0xff]   ;;  %v230_v4 = vld [vmem:[%s305_s0] sm:$0xff]   ;;  %v129_v27 = vld [vmem:[%s306_s3 + $0x10] sm:$0x1] }
   0x3   :  { %223 = vmatpush3.bf16.msra.mxu1 %v227_v1  ;;  %206 = vmatpush3.bf16.msra.mxu0 %v227_v1  ;;  %v199_v6 = vld [vmem:[%s306_s3 + $0x8] sm:$0xff]   ;;  %v192_v7 = vld [vmem:[%s306_s3] sm:$0xff]   ;;  %v134_v34 = vunpack.c.l.bf16 %v129_v27 }
   0x4   :  { %222 = vmatprep.subr.bf16.mxu1 %v232_v0  ;;  %207 = vmatprep.subr.bf16.mxu0 %v232_v0  ;;  %v172_v8 = vld [vmem:[%s307_s2] ss:$0 sm:$0xff]  ;;  %v197_v9 = vunpack.c.l.bf16 %v199_v6  ;;  %v193_v10 = vunpack.c.l.bf16 %v192_v7  ;;  %v198_v15 = vunpack.c.h.bf16 %v199_v6  ;;  %v194_v18 = vunpack.c.h.bf16 %v192_v7 }
   0x7   :  { %224 = vmatpush3.bf16.msra.mxu1 %v228_v2  ;;  %208 = vmatpush3.bf16.msra.mxu0 %v228_v2 }
   0xa   :  { %214 = vmatmul.mubr.msk.bf16.vlgmr.msra.gmra.mrb[0].mxu1 %vm59_vm1, %v229_v3  ;;  %210 = vmatmul.mubr.msk.bf16.vlgmr.msra.gmra.mrb[0].mxu0 %vm59_vm1, %v230_v4 }
   0xb   :  { %217 = vmatprep.mubr.msk.bf16.mxu1 %vm233_vm0, %v232_v0 }
  0x12   :  { %218 = vmatmul.mubr.msk.bf16.gmra.mrb[4].mxu1 %vm59_vm1, %v231_v5 }
  0xdd   :  { %v111_v11 = vpop.f32.mrb[0].mxu1  ;;  %v103_v12 = vpop.f32.mrb[0].mxu0 }
  0xde   :  { %v112_v13 = vadd.f32 %v172_v8, %v111_v11  ;;  %v215_v14 = vpop.f32.mrb[1].mxu1  ;;  %v104_v16 = vadd.f32 %v172_v8, %v103_v12  ;;  %v211_v17 = vpop.f32.mrb[1].mxu0 }
  0xdf   :  { %v114_v19 = vpop.f32.mrb[2].mxu1  ;;  %v106_v20 = vpop.f32.mrb[2].mxu0 }
  0xe0   :  { %v137_v21 = vadd.f32 %v197_v9, %v112_v13  ;;  %v115_v22 = vadd.f32 %v172_v8, %v114_v19  ;;  %v135_v23 = vadd.f32 %v193_v10, %v104_v16  ;;  %v216_v24 = vpop.f32.mrb[3].mxu1  ;;  %v107_v25 = vadd.f32 %v172_v8, %v106_v20  ;;  %v212_v26 = vpop.f32.mrb[3].mxu0 }
  0xe2   :  { %v188_v28 = vpack.c.bf16 %v137_v21, %v137_v21  ;;  %v138_v29 = vadd.f32 %v198_v15, %v115_v22  ;;  %v186_v30 = vpack.c.bf16 %v135_v23, %v135_v23  ;;  %v136_v31 = vadd.f32 %v194_v18, %v107_v25 }
  0xe4   :  { %164 = vst.msk [vmem:[%s308_s4 + $0x8] sm:$0xf] %vm161_vm2, %v188_v28  ;;  %v189_v32 = vpack.c.bf16 %v138_v29, %v138_v29  ;;  %162 = vst.msk [vmem:[%s308_s4] sm:$0xf] %vm161_vm2, %v186_v30  ;;  %v187_v33 = vpack.c.bf16 %v136_v31, %v136_v31 }
  0xe5   :  { %v119_v35 = vpop.f32.mrb[4].mxu1 }
  0xe6   :  { %165 = vst.msk [vmem:[%s308_s4 + $0xc] sm:$0xf] %vm161_vm2, %v189_v32  ;;  %163 = vst.msk [vmem:[%s308_s4 + $0x4] sm:$0xf] %vm161_vm2, %v187_v33  ;;  %v120_v36 = vadd.f32 %v172_v8, %v119_v35  ;;  %v219_v37 = vpop.f32.mrb[5].mxu1 }
  0xe7   :  { %v122_v38 = vpop.f32.mrb[6].mxu1 }
  0xe8   :  { %v139_v39 = vadd.f32 %v134_v34, %v120_v36  ;;  %v220_v40 = vpop.f32.mrb[7].mxu1 }
  0xea   :  { %v190_v41 = vpack.c.bf16 %v139_v39, %v139_v39 }
  0xec   :  { %167 = vst.msk [vmem:[%s308_s4 + $0x10] sm:$0x1] %vm166_vm3, %v190_v41 }

// kernel: maskclip_backbone_forward.23
= control target key start
LH: loop header
LB: loop body
LE: loop exit
PB: predicated region body
PF: predicated region fallthrough
CT: control target
= control target key end

     0   :  { %v312_v0 = vmov 0.0   ;;  %vm313_vm0 = vmmov 0   ;;  %vm202_vm1 = vcmask 257024   ;;  %vm207_vm2 = vcmask 253952   ;;  %s402_s1 = inlined_call_operand.vmem [shape: bf16[128,32], index: 1, kind: input, shape index: {}]   ;;  %s403_s0 = inlined_call_operand.vmem [shape: bf16[34,128], index: 0, kind: input, shape index: {}]   ;;  %s404_s3 = inlined_call_operand.vmem [shape: bf16[34,32], index: 3, kind: input, shape index: {}]   ;;  %s405_s2 = inlined_call_operand.vmem [shape: f32[1,32], index: 2, kind: input, shape index: {}]   ;;  %s406_s4 = inlined_call_operand.vmem [shape: bf16[34,32], index: 4, kind: output, shape index: {}]  }
   0x1   :  { %283 = vmatprep.subr.bf16.mxu1 %v312_v0  ;;  %v301_v1 = vld [vmem:[%s402_s1] sm:$0xff]   ;;  %255 = vmatprep.subr.bf16.mxu0 %v312_v0  ;;  %v302_v2 = vld [vmem:[%s402_s1 + $0x8] sm:$0xff]   ;;  %v303_v3 = vld [vmem:[%s402_s1 + $0x10] sm:$0xff]  }
   0x2   :  { %275 = vmatprep.mubr.msk.bf16.mxu1 %vm313_vm0, %v312_v0  ;;  %271 = vmatprep.mubr.msk.bf16.mxu0 %vm313_vm0, %v312_v0  ;;  %v304_v4 = vld [vmem:[%s402_s1 + $0x18] sm:$0xff]   ;;  %v305_v5 = vld [vmem:[%s402_s1 + $0x20] sm:$0xff]   ;;  %v306_v6 = vld [vmem:[%s402_s1 + $0x28] sm:$0xff]  }
   0x3   :  { %291 = vmatpush3.bf16.msra.mxu1 %v301_v1  ;;  %256 = vmatpush3.bf16.msra.mxu0 %v301_v1  ;;  %v307_v7 = vld [vmem:[%s402_s1 + $0x30] sm:$0xff]   ;;  %v308_v8 = vld [vmem:[%s402_s1 + $0x38] sm:$0xff]   ;;  %v309_v9 = vld [vmem:[%s403_s0 + $0x8] sm:$0xff]  }
   0x4   :  { %284 = vmatprep.subr.bf16.mxu1 %v312_v0  ;;  %257 = vmatprep.subr.bf16.mxu0 %v312_v0  ;;  %v310_v10 = vld [vmem:[%s403_s0] sm:$0xff]   ;;  %v311_v11 = vld [vmem:[%s403_s0 + $0x10] ss:$0 sps:$4 sm:$0x11]   ;;  %v243_v12 = vld [vmem:[%s404_s3 + $0x8] sm:$0xff]  }
   0x5   :  { %v236_v13 = vld [vmem:[%s404_s3] sm:$0xff]   ;;  %v241_v15 = vunpack.c.l.bf16 %v243_v12  ;;  %v242_v21 = vunpack.c.h.bf16 %v243_v12  ;;  %v170_v33 = vld [vmem:[%s404_s3 + $0x10] sm:$0x1] }
   0x6   :  { %v213_v14 = vld [vmem:[%s405_s2] ss:$0 sm:$0xff]  ;;  %v237_v16 = vunpack.c.l.bf16 %v236_v13  ;;  %v238_v24 = vunpack.c.h.bf16 %v236_v13  ;;  %v175_v40 = vunpack.c.l.bf16 %v170_v33 }
   0x7   :  { %292 = vmatpush3.bf16.msra.mxu1 %v302_v2  ;;  %258 = vmatpush3.bf16.msra.mxu0 %v302_v2 }
   0x8   :  { %285 = vmatprep.subr.bf16.mxu1 %v312_v0  ;;  %259 = vmatprep.subr.bf16.mxu0 %v312_v0 }
   0xb   :  { %293 = vmatpush3.bf16.msra.mxu1 %v303_v3  ;;  %260 = vmatpush3.bf16.msra.mxu0 %v303_v3 }
   0xc   :  { %286 = vmatprep.subr.bf16.mxu1 %v312_v0  ;;  %261 = vmatprep.subr.bf16.mxu0 %v312_v0 }
   0xf   :  { %294 = vmatpush3.bf16.msra.mxu1 %v304_v4  ;;  %262 = vmatpush3.bf16.msra.mxu0 %v304_v4 }
  0x10   :  { %287 = vmatprep.subr.bf16.mxu1 %v312_v0  ;;  %263 = vmatprep.subr.bf16.mxu0 %v312_v0 }
  0x13   :  { %295 = vmatpush3.bf16.msra.mxu1 %v305_v5  ;;  %264 = vmatpush3.bf16.msra.mxu0 %v305_v5 }
  0x14   :  { %288 = vmatprep.subr.bf16.mxu1 %v312_v0  ;;  %265 = vmatprep.subr.bf16.mxu0 %v312_v0 }
  0x17   :  { %296 = vmatpush3.bf16.msra.mxu1 %v306_v6  ;;  %266 = vmatpush3.bf16.msra.mxu0 %v306_v6 }
  0x18   :  { %289 = vmatprep.subr.bf16.mxu1 %v312_v0  ;;  %267 = vmatprep.subr.bf16.mxu0 %v312_v0 }
  0x1b   :  { %297 = vmatpush3.bf16.msra.mxu1 %v307_v7  ;;  %268 = vmatpush3.bf16.msra.mxu0 %v307_v7 }
  0x1c   :  { %290 = vmatprep.subr.bf16.mxu1 %v312_v0  ;;  %269 = vmatprep.subr.bf16.mxu0 %v312_v0 }
  0x1f   :  { %298 = vmatpush3.bf16.msra.mxu1 %v308_v8  ;;  %270 = vmatpush3.bf16.msra.mxu0 %v308_v8 }
  0x22   :  { %276 = vmatmul.mubr.bf16.vlgmr.msra.gmra.mrb[0].mxu1 %v309_v9  ;;  %272 = vmatmul.mubr.bf16.vlgmr.msra.gmra.mrb[0].mxu0 %v310_v10 }
  0x23   :  { %279 = vmatprep.mubr.msk.bf16.mxu1 %vm313_vm0, %v312_v0 }
  0x2a   :  { %280 = vmatmul.mubr.bf16.gmra.mrb[4].mxu1 %v311_v11 }
  0xf5   :  { %v152_v17 = vpop.f32.mrb[0].mxu1  ;;  %v144_v18 = vpop.f32.mrb[0].mxu0 }
  0xf6   :  { %v153_v19 = vadd.f32 %v213_v14, %v152_v17  ;;  %v277_v20 = vpop.f32.mrb[1].mxu1  ;;  %v145_v22 = vadd.f32 %v213_v14, %v144_v18  ;;  %v273_v23 = vpop.f32.mrb[1].mxu0 }
  0xf7   :  { %v155_v25 = vpop.f32.mrb[2].mxu1  ;;  %v147_v26 = vpop.f32.mrb[2].mxu0 }
  0xf8   :  { %v178_v27 = vadd.f32 %v241_v15, %v153_v19  ;;  %v156_v28 = vadd.f32 %v213_v14, %v155_v25  ;;  %v176_v29 = vadd.f32 %v237_v16, %v145_v22  ;;  %v278_v30 = vpop.f32.mrb[3].mxu1  ;;  %v148_v31 = vadd.f32 %v213_v14, %v147_v26  ;;  %v274_v32 = vpop.f32.mrb[3].mxu0 }
  0xfa   :  { %v232_v34 = vpack.c.bf16 %v178_v27, %v178_v27  ;;  %v179_v35 = vadd.f32 %v242_v21, %v156_v28  ;;  %v230_v36 = vpack.c.bf16 %v176_v29, %v176_v29  ;;  %v177_v37 = vadd.f32 %v238_v24, %v148_v31 }
  0xfc   :  { %205 = vst.msk [vmem:[%s406_s4 + $0x8] sm:$0xf] %vm202_vm1, %v232_v34  ;;  %v233_v38 = vpack.c.bf16 %v179_v35, %v179_v35  ;;  %203 = vst.msk [vmem:[%s406_s4] sm:$0xf] %vm202_vm1, %v230_v36  ;;  %v231_v39 = vpack.c.bf16 %v177_v37, %v177_v37 }
  0xfd   :  { %v160_v41 = vpop.f32.mrb[4].mxu1 }
  0xfe   :  { %206 = vst.msk [vmem:[%s406_s4 + $0xc] sm:$0xf] %vm202_vm1, %v233_v38  ;;  %204 = vst.msk [vmem:[%s406_s4 + $0x4] sm:$0xf] %vm202_vm1, %v231_v39  ;;  %v161_v42 = vadd.f32 %v213_v14, %v160_v41  ;;  %v281_v43 = vpop.f32.mrb[5].mxu1 }
  0xff   :  { %v163_v44 = vpop.f32.mrb[6].mxu1 }
 0x100   :  { %v180_v45 = vadd.f32 %v175_v40, %v161_v42  ;;  %v282_v46 = vpop.f32.mrb[7].mxu1 }
 0x102   :  { %v234_v47 = vpack.c.bf16 %v180_v45, %v180_v45 }
 0x104   :  { %208 = vst.msk [vmem:[%s406_s4 + $0x10] sm:$0x1] %vm207_vm2, %v234_v47 }

// kernel: maskclip_backbone_forward.22
= control target key start
LH: loop header
LB: loop body
LE: loop exit
PB: predicated region body
PF: predicated region fallthrough
CT: control target
= control target key end

     0   :  { %vm31_vm0 = vcmask 261120   ;;  %vm44_vm1 = vcmask 254976   ;;  %v386_v39 = vmov 0.0   ;;  %vm387_vm2 = vmmov 0   ;;  %s482_s0 = inlined_call_operand.vmem [shape: bf16[34,32], index: 0, kind: input, shape index: {}]   ;;  %s483_s3 = inlined_call_operand.vmem [shape: bf16[32,128], index: 3, kind: input, shape index: {}]   ;;  %s484_s1 = inlined_call_operand.vmem [shape: f32[1,32], index: 1, kind: input, shape index: {}]   ;;  %s485_s2 = inlined_call_operand.vmem [shape: f32[1,32], index: 2, kind: input, shape index: {}]   ;;  %s486_s4 = inlined_call_operand.vmem [shape: f32[1,128], index: 4, kind: input, shape index: {}]   ;;  %s487_s5 = inlined_call_operand.vmem [shape: bf16[34,128], index: 5, kind: output, shape index: {}]  }
   0x1   :  { %v325_v0 = vld [vmem:[%s482_s0 + $0x8] sm:$0xff]   ;;  %v308_v1 = vld [vmem:[%s482_s0] sm:$0xff]   ;;  %v25_v5 = vld [vmem:[%s482_s0 + $0x10] sm:$0x1]  ;;  %348 = vmatprep.subr.bf16.mxu1 %v386_v39  ;;  %332 = vmatprep.subr.bf16.mxu0 %v386_v39 }
   0x2   :  { %v313_v2 = vunpack.c.l.bf16 %v325_v0  ;;  %v314_v3 = vunpack.c.h.bf16 %v325_v0  ;;  %v309_v4 = vunpack.c.l.bf16 %v308_v1  ;;  %v310_v6 = vunpack.c.h.bf16 %v308_v1  ;;  %v354_v38 = vld [vmem:[%s483_s3] sm:$0xff]   ;;  %v355_v40 = vld [vmem:[%s483_s3 + $0x8] sm:$0xff]   ;;  %340 = vmatprep.mubr.msk.bf16.mxu1 %vm387_vm2, %v386_v39  ;;  %336 = vmatprep.mubr.msk.bf16.mxu0 %vm387_vm2, %v386_v39 }
   0x3   :  { %v30_v10 = vunpack.c.l.bf16 %v25_v5  ;;  %350 = vmatpush3.bf16.msra.mxu1 %v354_v38  ;;  %333 = vmatpush3.bf16.msra.mxu0 %v354_v38  ;;  %v284_v58 = vld [vmem:[%s484_s1] ss:$0 sm:$0xff] }
   0x4   :  { %v38_v7 = vsel %vm31_vm0, %v313_v2, 0.0  ;;  %v32_v8 = vsel %vm31_vm0, %v309_v4, 0.0  ;;  %v41_v9 = vsel %vm31_vm0, %v314_v3, 0.0  ;;  %v35_v11 = vsel %vm31_vm0, %v310_v6, 0.0  ;;  %349 = vmatprep.subr.bf16.mxu1 %v386_v39  ;;  %334 = vmatprep.subr.bf16.mxu0 %v386_v39  ;;  %v285_v0 = vld [vmem:[%s485_s2] ss:$0 sm:$0xff] }
   0x5   :  { %39 = vadd.xlane.f32.xlu0 %v38_v7  ;;  %33 = vadd.xlane.f32.xlu1 %v32_v8  ;;  %v45_v12 = vsel %vm44_vm1, %v30_v10, 0.0 }
   0x7   :  { %351 = vmatpush3.bf16.msra.mxu1 %v355_v40  ;;  %335 = vmatpush3.bf16.msra.mxu0 %v355_v40 }
   0x9   :  { %42 = vadd.xlane.f32.xlu0 %v41_v9  ;;  %36 = vadd.xlane.f32.xlu1 %v35_v11 }
   0xd   :  { %46 = vadd.xlane.f32.xlu0 %v45_v12 }
  0x92   :  { %v40_v13 = vpop.xlane.xlu0 %39  ;;  %v34_v14 = vpop.xlane.xlu1 %33 }
  0x93   :  { %v51_v15 = vmul.f32 0.03125, %v40_v13  ;;  %v49_v16 = vmul.f32 0.03125, %v34_v14 }
  0x95   :  { %v432_v17 = vsub.f32 %v313_v2, %v51_v15  ;;  %v434_v18 = vsub.f32 %v309_v4, %v49_v16 }
  0x96   :  { %v43_v19 = vpop.xlane.xlu0 %42  ;;  %v37_v20 = vpop.xlane.xlu1 %36 }
  0x97   :  { %v52_v21 = vmul.f32 0.03125, %v43_v19  ;;  %v61_v22 = vmul.f32 %v432_v17, %v432_v17  ;;  %v50_v23 = vmul.f32 0.03125, %v37_v20  ;;  %v59_v24 = vmul.f32 %v434_v18, %v434_v18 }
  0x99   :  { %v57_v25 = vsub.f32 %v314_v3, %v52_v21  ;;  %v70_v26 = vsel %vm31_vm0, %v61_v22, 0.0  ;;  %v441_v27 = vsub.f32 %v310_v6, %v50_v23  ;;  %v64_v31 = vsel %vm31_vm0, %v59_v24, 0.0 }
  0x9a   :  { %v47_v28 = vpop.xlane.xlu0 %46  ;;  %71 = vadd.xlane.f32.xlu1 %v70_v26 }
  0x9b   :  { %v53_v29 = vmul.f32 0.03125, %v47_v28  ;;  %v62_v30 = vmul.f32 %v57_v25, %v57_v25  ;;  %v60_v32 = vmul.f32 %v441_v27, %v441_v27 }
  0x9d   :  { %v58_v33 = vsub.f32 %v30_v10, %v53_v29  ;;  %v73_v34 = vsel %vm31_vm0, %v62_v30, 0.0  ;;  %v67_v36 = vsel %vm31_vm0, %v60_v32, 0.0 }
  0x9e   :  { %74 = vadd.xlane.f32.xlu0 %v73_v34  ;;  %65 = vadd.xlane.f32.xlu1 %v64_v31 }
  0x9f   :  { %v63_v35 = vmul.f32 %v58_v33, %v58_v33 }
  0xa1   :  { %v76_v37 = vsel %vm44_vm1, %v63_v35, 0.0 }
  0xa2   :  { %77 = vadd.xlane.f32.xlu1 %v76_v37  ;;  %68 = vadd.xlane.f32.xlu0 %v67_v36 }
 0x127   :  { %v72_v41 = vpop.xlane.xlu1 %71 }
 0x128   :  { %v81_v42 = vmul.f32 0.03125, %v72_v41 }
 0x12a   :  { %v86_v43 = vadd.f32 1e-05, %v81_v42 }
 0x12b   :  { %v75_v44 = vpop.xlane.xlu0 %74  ;;  %v66_v45 = vpop.xlane.xlu1 %65 }
 0x12c   :  { %356 = vrsqrt.f32 %v86_v43  ;;  %v82_v46 = vmul.f32 0.03125, %v75_v44  ;;  %v79_v47 = vmul.f32 0.03125, %v66_v45 }
 0x12e   :  { %v87_v48 = vadd.f32 1e-05, %v82_v46  ;;  %v84_v49 = vadd.f32 1e-05, %v79_v47 }
 0x12f   :  { %v69_v50 = vpop.xlane.xlu0 %68  ;;  %v78_v51 = vpop.xlane.xlu1 %77 }
 0x130   :  { %358 = vrsqrt.f32 %v87_v48  ;;  %v80_v52 = vmul.f32 0.03125, %v69_v50  ;;  %v83_v53 = vmul.f32 0.03125, %v78_v51 }
 0x131   :  { %360 = vrsqrt.f32 %v84_v49 }
 0x132   :  { %v85_v54 = vadd.f32 1e-05, %v80_v52  ;;  %v88_v55 = vadd.f32 1e-05, %v83_v53 }
 0x134   :  { %362 = vrsqrt.f32 %v85_v54 }
 0x135   :  { %364 = vrsqrt.f32 %v88_v55 }
 0x136   :  { %v357_v56 = vpop.eup %356 }
 0x137   :  { %v96_v57 = vmul.f32 %v357_v56, %v432_v17  ;;  %v286_v17 = vld [vmem:[%s486_s4] ss:$0 sm:$0xff] }
 0x139   :  { %v108_v62 = vmul.f32 %v284_v58, %v96_v57 }
 0x13a   :  { %v359_v59 = vpop.eup %358 }
 0x13b   :  { %v361_v60 = vpop.eup %360  ;;  %v97_v61 = vmul.f32 %v359_v59, %v57_v25  ;;  %v120_v5 = vadd.f32 %v285_v0, %v108_v62 }
 0x13c   :  { %v94_v63 = vmul.f32 %v361_v60, %v434_v18 }
 0x13d   :  { %v109_v1 = vmul.f32 %v284_v58, %v97_v61 }
 0x13e   :  { %v363_v2 = vpop.eup %362  ;;  %v106_v7 = vmul.f32 %v284_v58, %v94_v63 }
 0x13f   :  { %v365_v3 = vpop.eup %364  ;;  %v95_v4 = vmul.f32 %v363_v2, %v441_v27  ;;  %v121_v6 = vadd.f32 %v285_v0, %v109_v1 }
 0x140   :  { %v98_v8 = vmul.f32 %v365_v3, %v58_v33  ;;  %v118_v12 = vadd.f32 %v285_v0, %v106_v7 }
 0x141   :  { %v124_v9 = vpack.c.bf16 %v121_v6, %v120_v5  ;;  %v107_v10 = vmul.f32 %v284_v58, %v95_v4 }
 0x142   :  { %v110_v11 = vmul.f32 %v284_v58, %v98_v8 }
 0x143   :  { %341 = vmatmul.mubr.msk.bf16.vlgmr.msra.gmra.mrb[0].mxu1 %vm31_vm0, %v124_v9  ;;  %v119_v13 = vadd.f32 %v285_v0, %v107_v10 }
 0x144   :  { %344 = vmatprep.mubr.msk.bf16.mxu1 %vm387_vm2, %v386_v39  ;;  %v122_v15 = vadd.f32 %v285_v0, %v110_v11 }
 0x145   :  { %v123_v14 = vpack.c.bf16 %v119_v13, %v118_v12 }
 0x146   :  { %v125_v16 = vpack.c.bf16 %v122_v15, %v122_v15 }
 0x147   :  { %337 = vmatmul.mubr.msk.bf16.vlgmr.msra.gmra.mrb[0].mxu0 %vm31_vm0, %v123_v14 }
 0x14b   :  { %345 = vmatmul.mubr.msk.bf16.gmra.mrb[4].mxu1 %vm31_vm0, %v125_v16 }
 0x216   :  { %v200_v18 = vpop.f32.mrb[0].mxu1 }
 0x217   :  { %v201_v19 = vadd.f32 %v286_v17, %v200_v18  ;;  %v342_v20 = vpop.f32.mrb[1].mxu1 }
 0x218   :  { %v203_v21 = vpop.f32.mrb[2].mxu1 }
 0x219   :  { %v294_v22 = vmul.f32 -1.702, %v201_v19  ;;  %v204_v23 = vadd.f32 %v286_v17, %v203_v21  ;;  %v343_v24 = vpop.f32.mrb[3].mxu1 }
 0x21a   :  { %v192_v25 = vpop.f32.mrb[0].mxu0 }
 0x21b   :  { %v228_v26 = vmul.f32 1.442695, %v294_v22  ;;  %v295_v27 = vmul.f32 -1.702, %v204_v23  ;;  %v193_v28 = vadd.f32 %v286_v17, %v192_v25  ;;  %v338_v29 = vpop.f32.mrb[1].mxu0 }
 0x21c   :  { %v195_v30 = vpop.f32.mrb[2].mxu0 }
 0x21d   :  { %366 = vpow2.f32 %v228_v26  ;;  %v230_v31 = vmul.f32 1.442695, %v295_v27  ;;  %v292_v32 = vmul.f32 -1.702, %v193_v28  ;;  %v196_v33 = vadd.f32 %v286_v17, %v195_v30  ;;  %v339_v34 = vpop.f32.mrb[3].mxu0 }
 0x21e   :  { %v208_v35 = vpop.f32.mrb[4].mxu1 }
 0x21f   :  { %368 = vpow2.f32 %v230_v31  ;;  %v224_v36 = vmul.f32 1.442695, %v292_v32  ;;  %v293_v37 = vmul.f32 -1.702, %v196_v33  ;;  %v209_v38 = vadd.f32 %v286_v17, %v208_v35  ;;  %v346_v39 = vpop.f32.mrb[5].mxu1 }
 0x220   :  { %v211_v40 = vpop.f32.mrb[6].mxu1 }
 0x221   :  { %370 = vpow2.f32 %v224_v36  ;;  %v226_v41 = vmul.f32 1.442695, %v293_v37  ;;  %v296_v42 = vmul.f32 -1.702, %v209_v38  ;;  %v347_v43 = vpop.f32.mrb[7].mxu1 }
 0x223   :  { %372 = vpow2.f32 %v226_v41  ;;  %v232_v44 = vmul.f32 1.442695, %v296_v42 }
 0x225   :  { %374 = vpow2.f32 %v232_v44 }
 0x227   :  { %v367_v45 = vpop.eup %366 }
 0x228   :  { %v236_v46 = vadd.f32 1.0, %v367_v45 }
 0x229   :  { %v369_v47 = vpop.eup %368 }
 0x22a   :  { %376 = vrcp.f32 %v236_v46  ;;  %v237_v48 = vadd.f32 1.0, %v369_v47 }
 0x22b   :  { %v371_v49 = vpop.eup %370 }
 0x22c   :  { %378 = vrcp.f32 %v237_v48  ;;  %v234_v50 = vadd.f32 1.0, %v371_v49 }
 0x22d   :  { %v373_v51 = vpop.eup %372 }
 0x22e   :  { %380 = vrcp.f32 %v234_v50  ;;  %v235_v52 = vadd.f32 1.0, %v373_v51 }
 0x22f   :  { %v375_v53 = vpop.eup %374 }
 0x230   :  { %382 = vrcp.f32 %v235_v52  ;;  %v238_v54 = vadd.f32 1.0, %v375_v53 }
 0x232   :  { %384 = vrcp.f32 %v238_v54 }
 0x234   :  { %v377_v55 = vpop.eup %376 }
 0x235   :  { %v251_v57 = vmul.f32 %v377_v55, %v201_v19 }
 0x236   :  { %v379_v56 = vpop.eup %378 }
 0x237   :  { %v252_v58 = vmul.f32 %v379_v56, %v204_v23 }
 0x238   :  { %v381_v59 = vpop.eup %380 }
 0x239   :  { %v323_v60 = vpack.c.bf16 %v252_v58, %v251_v57  ;;  %v249_v62 = vmul.f32 %v381_v59, %v193_v28 }
 0x23a   :  { %v383_v61 = vpop.eup %382 }
 0x23b   :  { %326 = vst [vmem:[%s487_s5 + $0x8] sm:$0xff] %v323_v60   ;;  %v250_v63 = vmul.f32 %v383_v61, %v196_v33 }
 0x23c   :  { %v385_v0 = vpop.eup %384 }
 0x23d   :  { %v318_v1 = vpack.c.bf16 %v250_v63, %v249_v62  ;;  %v253_v2 = vmul.f32 %v385_v0, %v209_v38 }
 0x23f   :  { %319 = vst [vmem:[%s487_s5] sm:$0xff] %v318_v1   ;;  %v306_v3 = vpack.c.bf16 %v253_v2, %v253_v2 }
 0x241   :  { %279 = vst [vmem:[%s487_s5 + $0x10] sm:$0x1] %v306_v3 }

// kernel: maskclip_backbone_forward.29
= control target key start
LH: loop header
LB: loop body
LE: loop exit
PB: predicated region body
PF: predicated region fallthrough
CT: control target
= control target key end

     0   :  { %vm31_vm0 = vcmask 261120   ;;  %vm44_vm1 = vcmask 254976   ;;  %v312_v39 = vmov 0.0   ;;  %vm313_vm2 = vmmov 0   ;;  %s418_s0 = inlined_call_operand.vmem [shape: bf16[34,32], index: 0, kind: input, shape index: {}]   ;;  %s419_s3 = inlined_call_operand.vmem [shape: bf16[32,32], index: 3, kind: input, shape index: {}]   ;;  %s420_s1 = inlined_call_operand.vmem [shape: f32[1,32], index: 1, kind: input, shape index: {}]   ;;  %s421_s2 = inlined_call_operand.vmem [shape: f32[1,32], index: 2, kind: input, shape index: {}]   ;;  %s422_s4 = inlined_call_operand.vmem [shape: f32[1,32], index: 4, kind: input, shape index: {}]   ;;  %s423_s5 = inlined_call_operand.vmem [shape: bf16[34,32], index: 5, kind: output, shape index: {}]  }
   0x1   :  { %v272_v0 = vld [vmem:[%s418_s0 + $0x8] sm:$0xff]   ;;  %v265_v1 = vld [vmem:[%s418_s0] sm:$0xff]   ;;  %v25_v5 = vld [vmem:[%s418_s0 + $0x10] sm:$0x1]  ;;  %294 = vmatprep.subr.bf16.mxu1 %v312_v39  ;;  %278 = vmatprep.subr.bf16.mxu0 %v312_v39  ;;  %vm235_vm3 = vcmask 257024   ;;  %vm240_vm4 = vcmask 253952  }
   0x2   :  { %v270_v2 = vunpack.c.l.bf16 %v272_v0  ;;  %v271_v3 = vunpack.c.h.bf16 %v272_v0  ;;  %v266_v4 = vunpack.c.l.bf16 %v265_v1  ;;  %v267_v6 = vunpack.c.h.bf16 %v265_v1  ;;  %v300_v38 = vld [vmem:[%s419_s3] sm:$0xff]   ;;  %v301_v40 = vld [vmem:[%s419_s3 + $0x8] sm:$0xff]   ;;  %286 = vmatprep.mubr.msk.bf16.mxu1 %vm313_vm2, %v312_v39  ;;  %282 = vmatprep.mubr.msk.bf16.mxu0 %vm313_vm2, %v312_v39 }
   0x3   :  { %v30_v10 = vunpack.c.l.bf16 %v25_v5  ;;  %296 = vmatpush3.bf16.msra.mxu1 %v300_v38  ;;  %279 = vmatpush3.bf16.msra.mxu0 %v300_v38  ;;  %v246_v58 = vld [vmem:[%s420_s1] ss:$0 sm:$0xff] }
   0x4   :  { %v38_v7 = vsel %vm31_vm0, %v270_v2, 0.0  ;;  %v32_v8 = vsel %vm31_vm0, %v266_v4, 0.0  ;;  %v41_v9 = vsel %vm31_vm0, %v271_v3, 0.0  ;;  %v35_v11 = vsel %vm31_vm0, %v267_v6, 0.0  ;;  %295 = vmatprep.subr.bf16.mxu1 %v312_v39  ;;  %280 = vmatprep.subr.bf16.mxu0 %v312_v39  ;;  %v247_v0 = vld [vmem:[%s421_s2] ss:$0 sm:$0xff] }
   0x5   :  { %39 = vadd.xlane.f32.xlu0 %v38_v7  ;;  %33 = vadd.xlane.f32.xlu1 %v32_v8  ;;  %v45_v12 = vsel %vm44_vm1, %v30_v10, 0.0 }
   0x7   :  { %297 = vmatpush3.bf16.msra.mxu1 %v301_v40  ;;  %281 = vmatpush3.bf16.msra.mxu0 %v301_v40 }
   0x9   :  { %42 = vadd.xlane.f32.xlu0 %v41_v9  ;;  %36 = vadd.xlane.f32.xlu1 %v35_v11 }
   0xd   :  { %46 = vadd.xlane.f32.xlu0 %v45_v12 }
  0x92   :  { %v40_v13 = vpop.xlane.xlu0 %39  ;;  %v34_v14 = vpop.xlane.xlu1 %33 }
  0x93   :  { %v51_v15 = vmul.f32 0.03125, %v40_v13  ;;  %v49_v16 = vmul.f32 0.03125, %v34_v14 }
  0x95   :  { %v358_v17 = vsub.f32 %v270_v2, %v51_v15  ;;  %v360_v18 = vsub.f32 %v266_v4, %v49_v16 }
  0x96   :  { %v43_v19 = vpop.xlane.xlu0 %42  ;;  %v37_v20 = vpop.xlane.xlu1 %36 }
  0x97   :  { %v52_v21 = vmul.f32 0.03125, %v43_v19  ;;  %v61_v22 = vmul.f32 %v358_v17, %v358_v17  ;;  %v50_v23 = vmul.f32 0.03125, %v37_v20  ;;  %v59_v24 = vmul.f32 %v360_v18, %v360_v18 }
  0x99   :  { %v57_v25 = vsub.f32 %v271_v3, %v52_v21  ;;  %v70_v26 = vsel %vm31_vm0, %v61_v22, 0.0  ;;  %v367_v27 = vsub.f32 %v267_v6, %v50_v23  ;;  %v64_v31 = vsel %vm31_vm0, %v59_v24, 0.0 }
  0x9a   :  { %v47_v28 = vpop.xlane.xlu0 %46  ;;  %71 = vadd.xlane.f32.xlu1 %v70_v26 }
  0x9b   :  { %v53_v29 = vmul.f32 0.03125, %v47_v28  ;;  %v62_v30 = vmul.f32 %v57_v25, %v57_v25  ;;  %v60_v32 = vmul.f32 %v367_v27, %v367_v27 }
  0x9d   :  { %v58_v33 = vsub.f32 %v30_v10, %v53_v29  ;;  %v73_v34 = vsel %vm31_vm0, %v62_v30, 0.0  ;;  %v67_v36 = vsel %vm31_vm0, %v60_v32, 0.0 }
  0x9e   :  { %74 = vadd.xlane.f32.xlu0 %v73_v34  ;;  %65 = vadd.xlane.f32.xlu1 %v64_v31 }
  0x9f   :  { %v63_v35 = vmul.f32 %v58_v33, %v58_v33 }
  0xa1   :  { %v76_v37 = vsel %vm44_vm1, %v63_v35, 0.0 }
  0xa2   :  { %77 = vadd.xlane.f32.xlu1 %v76_v37  ;;  %68 = vadd.xlane.f32.xlu0 %v67_v36 }
 0x127   :  { %v72_v41 = vpop.xlane.xlu1 %71 }
 0x128   :  { %v81_v42 = vmul.f32 0.03125, %v72_v41 }
 0x12a   :  { %v86_v43 = vadd.f32 1e-05, %v81_v42 }
 0x12b   :  { %v75_v44 = vpop.xlane.xlu0 %74  ;;  %v66_v45 = vpop.xlane.xlu1 %65 }
 0x12c   :  { %302 = vrsqrt.f32 %v86_v43  ;;  %v82_v46 = vmul.f32 0.03125, %v75_v44  ;;  %v79_v47 = vmul.f32 0.03125, %v66_v45 }
 0x12e   :  { %v87_v48 = vadd.f32 1e-05, %v82_v46  ;;  %v84_v49 = vadd.f32 1e-05, %v79_v47 }
 0x12f   :  { %v69_v50 = vpop.xlane.xlu0 %68  ;;  %v78_v51 = vpop.xlane.xlu1 %77 }
 0x130   :  { %304 = vrsqrt.f32 %v87_v48  ;;  %v80_v52 = vmul.f32 0.03125, %v69_v50  ;;  %v83_v53 = vmul.f32 0.03125, %v78_v51 }
 0x131   :  { %306 = vrsqrt.f32 %v84_v49 }
 0x132   :  { %v85_v54 = vadd.f32 1e-05, %v80_v52  ;;  %v88_v55 = vadd.f32 1e-05, %v83_v53 }
 0x134   :  { %308 = vrsqrt.f32 %v85_v54 }
 0x135   :  { %310 = vrsqrt.f32 %v88_v55 }
 0x136   :  { %v303_v56 = vpop.eup %302 }
 0x137   :  { %v96_v57 = vmul.f32 %v303_v56, %v358_v17  ;;  %v248_v17 = vld [vmem:[%s422_s4] ss:$0 sm:$0xff] }
 0x139   :  { %v108_v62 = vmul.f32 %v246_v58, %v96_v57 }
 0x13a   :  { %v305_v59 = vpop.eup %304 }
 0x13b   :  { %v307_v60 = vpop.eup %306  ;;  %v97_v61 = vmul.f32 %v305_v59, %v57_v25  ;;  %v120_v5 = vadd.f32 %v247_v0, %v108_v62 }
 0x13c   :  { %v94_v63 = vmul.f32 %v307_v60, %v360_v18 }
 0x13d   :  { %v109_v1 = vmul.f32 %v246_v58, %v97_v61 }
 0x13e   :  { %v309_v2 = vpop.eup %308  ;;  %v106_v7 = vmul.f32 %v246_v58, %v94_v63 }
 0x13f   :  { %v311_v3 = vpop.eup %310  ;;  %v95_v4 = vmul.f32 %v309_v2, %v367_v27  ;;  %v121_v6 = vadd.f32 %v247_v0, %v109_v1 }
 0x140   :  { %v98_v8 = vmul.f32 %v311_v3, %v58_v33  ;;  %v118_v12 = vadd.f32 %v247_v0, %v106_v7 }
 0x141   :  { %v124_v9 = vpack.c.bf16 %v121_v6, %v120_v5  ;;  %v107_v10 = vmul.f32 %v246_v58, %v95_v4 }
 0x142   :  { %v110_v11 = vmul.f32 %v246_v58, %v98_v8 }
 0x143   :  { %287 = vmatmul.mubr.msk.bf16.vlgmr.msra.gmra.mrb[0].mxu1 %vm31_vm0, %v124_v9  ;;  %v119_v13 = vadd.f32 %v247_v0, %v107_v10 }
 0x144   :  { %290 = vmatprep.mubr.msk.bf16.mxu1 %vm313_vm2, %v312_v39  ;;  %v122_v15 = vadd.f32 %v247_v0, %v110_v11 }
 0x145   :  { %v123_v14 = vpack.c.bf16 %v119_v13, %v118_v12 }
 0x146   :  { %v125_v16 = vpack.c.bf16 %v122_v15, %v122_v15 }
 0x147   :  { %283 = vmatmul.mubr.msk.bf16.vlgmr.msra.gmra.mrb[0].mxu0 %vm31_vm0, %v123_v14 }
 0x14b   :  { %291 = vmatmul.mubr.msk.bf16.gmra.mrb[4].mxu1 %vm31_vm0, %v125_v16 }
 0x216   :  { %v200_v18 = vpop.f32.mrb[0].mxu1 }
 0x217   :  { %v201_v19 = vadd.f32 %v248_v17, %v200_v18  ;;  %v288_v20 = vpop.f32.mrb[1].mxu1 }
 0x218   :  { %v203_v21 = vpop.f32.mrb[2].mxu1 }
 0x219   :  { %v261_v22 = vpack.c.bf16 %v201_v19, %v201_v19  ;;  %v204_v23 = vadd.f32 %v248_v17, %v203_v21  ;;  %v289_v24 = vpop.f32.mrb[3].mxu1 }
 0x21a   :  { %v192_v25 = vpop.f32.mrb[0].mxu0 }
 0x21b   :  { %238 = vst.msk [vmem:[%s423_s5 + $0x8] sm:$0xf] %vm235_vm3, %v261_v22  ;;  %v262_v26 = vpack.c.bf16 %v204_v23, %v204_v23  ;;  %v193_v27 = vadd.f32 %v248_v17, %v192_v25  ;;  %v284_v28 = vpop.f32.mrb[1].mxu0 }
 0x21c   :  { %v195_v29 = vpop.f32.mrb[2].mxu0 }
 0x21d   :  { %239 = vst.msk [vmem:[%s423_s5 + $0xc] sm:$0xf] %vm235_vm3, %v262_v26  ;;  %v259_v30 = vpack.c.bf16 %v193_v27, %v193_v27  ;;  %v196_v31 = vadd.f32 %v248_v17, %v195_v29  ;;  %v285_v32 = vpop.f32.mrb[3].mxu0 }
 0x21e   :  { %v208_v33 = vpop.f32.mrb[4].mxu1 }
 0x21f   :  { %236 = vst.msk [vmem:[%s423_s5] sm:$0xf] %vm235_vm3, %v259_v30  ;;  %v260_v34 = vpack.c.bf16 %v196_v31, %v196_v31  ;;  %v209_v35 = vadd.f32 %v248_v17, %v208_v33  ;;  %v292_v36 = vpop.f32.mrb[5].mxu1 }
 0x220   :  { %v211_v37 = vpop.f32.mrb[6].mxu1 }
 0x221   :  { %237 = vst.msk [vmem:[%s423_s5 + $0x4] sm:$0xf] %vm235_vm3, %v260_v34  ;;  %v263_v38 = vpack.c.bf16 %v209_v35, %v209_v35  ;;  %v293_v39 = vpop.f32.mrb[7].mxu1 }
 0x223   :  { %241 = vst.msk [vmem:[%s423_s5 + $0x10] sm:$0x1] %vm240_vm4, %v263_v38 }

// kernel: maskclip_backbone_forward.33
= control target key start
LH: loop header
LB: loop body
LE: loop exit
PB: predicated region body
PF: predicated region fallthrough
CT: control target
= control target key end

     0   :  { %vm28_vm0 = vcmask 261120   ;;  %vm41_vm1 = vcmask 254976   ;;  %v268_v39 = vmov 0.0   ;;  %vm269_vm2 = vmmov 0   ;;  %s367_s0 = inlined_call_operand.vmem [shape: bf16[34,32], index: 0, kind: input, shape index: {}]   ;;  %s368_s3 = inlined_call_operand.vmem [shape: bf16[32,32], index: 3, kind: input, shape index: {}]   ;;  %s369_s1 = inlined_call_operand.vmem [shape: f32[1,32], index: 1, kind: input, shape index: {}]   ;;  %s370_s2 = inlined_call_operand.vmem [shape: f32[1,32], index: 2, kind: input, shape index: {}]   ;;  %s371_s4 = inlined_call_operand.vmem [shape: f32[34,32], index: 4, kind: output, shape index: {}]  }
   0x1   :  { %v228_v0 = vld [vmem:[%s367_s0 + $0x8] sm:$0xff]   ;;  %v221_v1 = vld [vmem:[%s367_s0] sm:$0xff]   ;;  %v22_v5 = vld [vmem:[%s367_s0 + $0x10] sm:$0x1]  ;;  %250 = vmatprep.subr.bf16.mxu1 %v268_v39  ;;  %234 = vmatprep.subr.bf16.mxu0 %v268_v39 }
   0x2   :  { %v226_v2 = vunpack.c.l.bf16 %v228_v0  ;;  %v227_v3 = vunpack.c.h.bf16 %v228_v0  ;;  %v222_v4 = vunpack.c.l.bf16 %v221_v1  ;;  %v223_v6 = vunpack.c.h.bf16 %v221_v1  ;;  %v256_v38 = vld [vmem:[%s368_s3] sm:$0xff]   ;;  %v257_v40 = vld [vmem:[%s368_s3 + $0x8] sm:$0xff]   ;;  %242 = vmatprep.mubr.msk.bf16.mxu1 %vm269_vm2, %v268_v39  ;;  %238 = vmatprep.mubr.msk.bf16.mxu0 %vm269_vm2, %v268_v39 }
   0x3   :  { %v27_v10 = vunpack.c.l.bf16 %v22_v5  ;;  %252 = vmatpush3.bf16.msra.mxu1 %v256_v38  ;;  %235 = vmatpush3.bf16.msra.mxu0 %v256_v38  ;;  %v213_v58 = vld [vmem:[%s369_s1] ss:$0 sm:$0xff] }
   0x4   :  { %v35_v7 = vsel %vm28_vm0, %v226_v2, 0.0  ;;  %v29_v8 = vsel %vm28_vm0, %v222_v4, 0.0  ;;  %v38_v9 = vsel %vm28_vm0, %v227_v3, 0.0  ;;  %v32_v11 = vsel %vm28_vm0, %v223_v6, 0.0  ;;  %251 = vmatprep.subr.bf16.mxu1 %v268_v39  ;;  %236 = vmatprep.subr.bf16.mxu0 %v268_v39  ;;  %v214_v0 = vld [vmem:[%s370_s2] ss:$0 sm:$0xff] }
   0x5   :  { %36 = vadd.xlane.f32.xlu0 %v35_v7  ;;  %30 = vadd.xlane.f32.xlu1 %v29_v8  ;;  %v42_v12 = vsel %vm41_vm1, %v27_v10, 0.0 }
   0x7   :  { %253 = vmatpush3.bf16.msra.mxu1 %v257_v40  ;;  %237 = vmatpush3.bf16.msra.mxu0 %v257_v40 }
   0x9   :  { %39 = vadd.xlane.f32.xlu0 %v38_v9  ;;  %33 = vadd.xlane.f32.xlu1 %v32_v11 }
   0xd   :  { %43 = vadd.xlane.f32.xlu0 %v42_v12 }
  0x92   :  { %v37_v13 = vpop.xlane.xlu0 %36  ;;  %v31_v14 = vpop.xlane.xlu1 %30 }
  0x93   :  { %v48_v15 = vmul.f32 0.03125, %v37_v13  ;;  %v46_v16 = vmul.f32 0.03125, %v31_v14 }
  0x95   :  { %v309_v17 = vsub.f32 %v226_v2, %v48_v15  ;;  %v311_v18 = vsub.f32 %v222_v4, %v46_v16 }
  0x96   :  { %v40_v19 = vpop.xlane.xlu0 %39  ;;  %v34_v20 = vpop.xlane.xlu1 %33 }
  0x97   :  { %v49_v21 = vmul.f32 0.03125, %v40_v19  ;;  %v58_v22 = vmul.f32 %v309_v17, %v309_v17  ;;  %v47_v23 = vmul.f32 0.03125, %v34_v20  ;;  %v56_v24 = vmul.f32 %v311_v18, %v311_v18 }
  0x99   :  { %v54_v25 = vsub.f32 %v227_v3, %v49_v21  ;;  %v67_v26 = vsel %vm28_vm0, %v58_v22, 0.0  ;;  %v318_v27 = vsub.f32 %v223_v6, %v47_v23  ;;  %v61_v31 = vsel %vm28_vm0, %v56_v24, 0.0 }
  0x9a   :  { %v44_v28 = vpop.xlane.xlu0 %43  ;;  %68 = vadd.xlane.f32.xlu1 %v67_v26 }
  0x9b   :  { %v50_v29 = vmul.f32 0.03125, %v44_v28  ;;  %v59_v30 = vmul.f32 %v54_v25, %v54_v25  ;;  %v57_v32 = vmul.f32 %v318_v27, %v318_v27 }
  0x9d   :  { %v55_v33 = vsub.f32 %v27_v10, %v50_v29  ;;  %v70_v34 = vsel %vm28_vm0, %v59_v30, 0.0  ;;  %v64_v36 = vsel %vm28_vm0, %v57_v32, 0.0 }
  0x9e   :  { %71 = vadd.xlane.f32.xlu0 %v70_v34  ;;  %62 = vadd.xlane.f32.xlu1 %v61_v31 }
  0x9f   :  { %v60_v35 = vmul.f32 %v55_v33, %v55_v33 }
  0xa1   :  { %v73_v37 = vsel %vm41_vm1, %v60_v35, 0.0 }
  0xa2   :  { %74 = vadd.xlane.f32.xlu1 %v73_v37  ;;  %65 = vadd.xlane.f32.xlu0 %v64_v36 }
 0x127   :  { %v69_v41 = vpop.xlane.xlu1 %68 }
 0x128   :  { %v78_v42 = vmul.f32 0.03125, %v69_v41 }
 0x12a   :  { %v83_v43 = vadd.f32 1e-05, %v78_v42 }
 0x12b   :  { %v72_v44 = vpop.xlane.xlu0 %71  ;;  %v63_v45 = vpop.xlane.xlu1 %62 }
 0x12c   :  { %258 = vrsqrt.f32 %v83_v43  ;;  %v79_v46 = vmul.f32 0.03125, %v72_v44  ;;  %v76_v47 = vmul.f32 0.03125, %v63_v45 }
 0x12e   :  { %v84_v48 = vadd.f32 1e-05, %v79_v46  ;;  %v81_v49 = vadd.f32 1e-05, %v76_v47 }
 0x12f   :  { %v66_v50 = vpop.xlane.xlu0 %65  ;;  %v75_v51 = vpop.xlane.xlu1 %74 }
 0x130   :  { %260 = vrsqrt.f32 %v84_v48  ;;  %v77_v52 = vmul.f32 0.03125, %v66_v50  ;;  %v80_v53 = vmul.f32 0.03125, %v75_v51 }
 0x131   :  { %262 = vrsqrt.f32 %v81_v49 }
 0x132   :  { %v82_v54 = vadd.f32 1e-05, %v77_v52  ;;  %v85_v55 = vadd.f32 1e-05, %v80_v53 }
 0x134   :  { %264 = vrsqrt.f32 %v82_v54 }
 0x135   :  { %266 = vrsqrt.f32 %v85_v55 }
 0x136   :  { %v259_v56 = vpop.eup %258 }
 0x137   :  { %v93_v57 = vmul.f32 %v259_v56, %v309_v17 }
 0x139   :  { %v105_v62 = vmul.f32 %v213_v58, %v93_v57 }
 0x13a   :  { %v261_v59 = vpop.eup %260 }
 0x13b   :  { %v263_v60 = vpop.eup %262  ;;  %v94_v61 = vmul.f32 %v261_v59, %v54_v25  ;;  %v117_v5 = vadd.f32 %v214_v0, %v105_v62 }
 0x13c   :  { %v91_v63 = vmul.f32 %v263_v60, %v311_v18 }
 0x13d   :  { %v106_v1 = vmul.f32 %v213_v58, %v94_v61 }
 0x13e   :  { %v265_v2 = vpop.eup %264  ;;  %v103_v7 = vmul.f32 %v213_v58, %v91_v63 }
 0x13f   :  { %v267_v3 = vpop.eup %266  ;;  %v92_v4 = vmul.f32 %v265_v2, %v318_v27  ;;  %v118_v6 = vadd.f32 %v214_v0, %v106_v1 }
 0x140   :  { %v95_v8 = vmul.f32 %v267_v3, %v55_v33  ;;  %v115_v12 = vadd.f32 %v214_v0, %v103_v7 }
 0x141   :  { %v121_v9 = vpack.c.bf16 %v118_v6, %v117_v5  ;;  %v104_v10 = vmul.f32 %v213_v58, %v92_v4 }
 0x142   :  { %v107_v11 = vmul.f32 %v213_v58, %v95_v8 }
 0x143   :  { %243 = vmatmul.mubr.msk.bf16.vlgmr.msra.gmra.mrb[0].mxu1 %vm28_vm0, %v121_v9  ;;  %v116_v13 = vadd.f32 %v214_v0, %v104_v10 }
 0x144   :  { %246 = vmatprep.mubr.msk.bf16.mxu1 %vm269_vm2, %v268_v39  ;;  %v119_v15 = vadd.f32 %v214_v0, %v107_v11 }
 0x145   :  { %v120_v14 = vpack.c.bf16 %v116_v13, %v115_v12 }
 0x146   :  { %v122_v16 = vpack.c.bf16 %v119_v15, %v119_v15 }
 0x147   :  { %239 = vmatmul.mubr.msk.bf16.vlgmr.msra.gmra.mrb[0].mxu0 %vm28_vm0, %v120_v14 }
 0x14b   :  { %247 = vmatmul.mubr.msk.bf16.gmra.mrb[4].mxu1 %vm28_vm0, %v122_v16 }
 0x216   :  { %v190_v17 = vpop.f32.mrb[0].mxu1 }
 0x217   :  { %206 = vst.msk [vmem:[%s371_s4 + $0x10] sm:$0xff] %vm28_vm0, %v190_v17  ;;  %v244_v18 = vpop.f32.mrb[1].mxu1 }
 0x218   :  { %v193_v19 = vpop.f32.mrb[2].mxu1 }
 0x219   :  { %207 = vst.msk [vmem:[%s371_s4 + $0x18] sm:$0xff] %vm28_vm0, %v193_v19  ;;  %v245_v20 = vpop.f32.mrb[3].mxu1 }
 0x21a   :  { %v182_v21 = vpop.f32.mrb[0].mxu0 }
 0x21b   :  { %204 = vst.msk [vmem:[%s371_s4] sm:$0xff] %vm28_vm0, %v182_v21  ;;  %v240_v22 = vpop.f32.mrb[1].mxu0 }
 0x21c   :  { %v185_v23 = vpop.f32.mrb[2].mxu0 }
 0x21d   :  { %205 = vst.msk [vmem:[%s371_s4 + $0x8] sm:$0xff] %vm28_vm0, %v185_v23  ;;  %v241_v24 = vpop.f32.mrb[3].mxu0 }
 0x21e   :  { %v198_v25 = vpop.f32.mrb[4].mxu1 }
 0x21f   :  { %208 = vst.msk [vmem:[%s371_s4 + $0x20] sm:$0x3] %vm41_vm1, %v198_v25  ;;  %v248_v26 = vpop.f32.mrb[5].mxu1 }
 0x220   :  { %v201_v27 = vpop.f32.mrb[6].mxu1 }
 0x221   :  { %v249_v28 = vpop.f32.mrb[7].mxu1 }

</bundles_post_ra>
